<compile_context>
chip_gen: v5e
topology: v5e:2x2
jax: 0.10.0
libtpu: 0.0.40
codegen_flags: <defaults>
</compile_context>

<pallas_src>
import math
import functools

import jax
import jax.numpy as jnp
from jax import lax
from jax.experimental import pallas as pl
from jax.experimental.pallas import tpu as pltpu

F32 = jnp.float32
BF16 = jnp.bfloat16
SQRT_HALF = math.sqrt(0.5)
NEG_BIG = -1e30                       # finite fill -> no NaN on fully-masked rows
VMEM_LIMIT = 32 * 1024 * 1024         # TODO(synk): re-derive per kernel for large shapes (v7x: 64 MiB VMEM)


def _cp(n_grid_axes=0):
    if n_grid_axes:
        return pltpu.CompilerParams(
            dimension_semantics=("parallel",) * n_grid_axes,
            vmem_limit_bytes=VMEM_LIMIT)
    return pltpu.CompilerParams(vmem_limit_bytes=VMEM_LIMIT)


# ----------------------------- Pallas kernels -----------------------------

def _ln_fc1_kernel(x_ref, g_ref, b_ref, w_ref, wb_ref, ln_ref, o_ref):
    x = x_ref[...].astype(F32)                             # (N, E)
    mean = jnp.mean(x, axis=-1, keepdims=True)
    var = jnp.mean((x - mean) ** 2, axis=-1, keepdims=True)
    ln = (x - mean) * lax.rsqrt(var + 1e-5) * g_ref[...] + b_ref[...]
    lnb = ln.astype(BF16)
    ln_ref[...] = lnb
    o_ref[...] = (jnp.dot(lnb, w_ref[...], preferred_element_type=F32)
                  + wb_ref[...]).astype(BF16)


def ln_fc1_pallas(x, gamma, beta, w, b):
    """Fused LayerNorm -> Linear over (B*T) rows.  Returns (layernorm_out, fc1_out)."""
    B, T, E = x.shape
    C = w.shape[1]
    N = B * T
    ln, o = pl.pallas_call(
        _ln_fc1_kernel,
        out_shape=(jax.ShapeDtypeStruct((N, E), BF16),
                   jax.ShapeDtypeStruct((N, C), BF16)),
        compiler_params=_cp(),
    )(x.reshape(N, E).astype(BF16),
      gamma.reshape(1, E).astype(F32), beta.reshape(1, E).astype(F32),
      w.astype(BF16), b.reshape(1, C).astype(F32))
    return ln.reshape(B, T, E), o.reshape(B, T, C)


def _conv_glu(x, w_ref, b_ref, K, pad_l, T, Cout):
    """Causal/symmetric 1-D conv over time + GLU, all in-register.

    x: (T, Cin) bf16 (already pad-masked where required).  For tap k with shift
    s = k - pad_l the shifted rows are gathered with a 0/1 select matrix (exact in bf16),
    so no padded buffer / unaligned slices are needed.
    """
    row = lax.broadcasted_iota(jnp.int32, (T, T), 0)
    col = lax.broadcasted_iota(jnp.int32, (T, T), 1)
    y = jnp.zeros((T, 2 * Cout), F32) + b_ref[...]
    for k in range(K):                                     # static unrolled taps
        s = k - pad_l
        if s == 0:
            xk = x
        else:
            sel = (col == row + s).astype(BF16)            # (T, T) shift-select matrix
            xk = jnp.dot(sel, x, preferred_element_type=F32).astype(BF16)  # exact row gather
        y = y + jnp.dot(xk, w_ref[k], preferred_element_type=F32)
    val = y[:, :Cout]
    gate = y[:, Cout:]
    return val * jax.nn.sigmoid(gate)                      # (T, Cout) f32


def _enc_layer_kernel(x_ref, mrow_ref, w_ref, b_ref, *rest,
                      K, pad_l, has_attn, attn_scale):
    if has_attn:
        mkey_ref, inw_ref, inb_ref, outw_ref, outb_ref, o_ref = rest
    else:
        (o_ref,) = rest
    T = x_ref.shape[1]
    Cout = o_ref.shape[2]

    x = x_ref[0]                                           # (T, Cin) bf16
    mrow = mrow_ref[0]                                     # (T, 1) f32
    xm = jnp.where(mrow > 0.5, jnp.zeros_like(x), x)       # masked_fill(pad, 0)

    x1 = _conv_glu(xm, w_ref, b_ref, K, pad_l, T, Cout)    # (T, Cout) f32

    if has_attn:
        mkey = mkey_ref[0]                                 # (1, T) f32
        temb = xm.astype(F32)                              # target_embedding (Cin == Cout)
        xq = (jnp.dot(x1.astype(BF16), inw_ref[...], preferred_element_type=F32)
              + inb_ref[...] + temb) * SQRT_HALF
        keys = x1.astype(BF16)                             # keys == values == GLU output
        scores = lax.dot_general(xq.astype(BF16), keys,
                                 (((1,), (1,)), ((), ())),
                                 preferred_element_type=F32)        # (T, T)
        scores = jnp.where(mkey > 0.5, NEG_BIG, scores)
        mx = jnp.max(scores, axis=-1, keepdims=True)
        e = jnp.exp(scores - mx)
        p = e * pl.reciprocal(jnp.sum(e, axis=-1, keepdims=True), approx=True)
        av = jnp.dot(p.astype(BF16), keys, preferred_element_type=F32) * attn_scale
        out = (jnp.dot(av.astype(BF16), outw_ref[...], preferred_element_type=F32)
               + outb_ref[...] + x1) * SQRT_HALF
        # encoder: glu(cat([x, out])) == x * sigmoid(out)
        x1 = x1 * jax.nn.sigmoid(out)

    o_ref[0] = x1.astype(BF16)


def enc_layer_pallas(x, mask_row, mask_key, layer):
    """One fused encoder layer: masked_fill + ConvTBC + GLU [+ self-attention + GLU gate]."""
    B, T, Cin = x.shape
    w = layer['conv_w']                                    # (K, Cin, 2*Cout)
    K = w.shape[0]
    Cout = w.shape[2] // 2
    has_attn = layer['attn'] is not None
    pad_l = (K - 1) // 2                                   # matches odd/even handling in ref
    attn_scale = float(T * math.sqrt(1.0 / T)) if T > 0 else 0.0
    kern = functools.partial(_enc_layer_kernel, K=K, pad_l=pad_l,
                             has_attn=has_attn, attn_scale=attn_scale)

    in_specs = [pl.BlockSpec((1, T, Cin), lambda i: (i, 0, 0)),
                pl.BlockSpec((1, T, 1), lambda i: (i, 0, 0)),
                pl.BlockSpec((K, Cin, 2 * Cout), lambda i: (0, 0, 0)),
                pl.BlockSpec((1, 2 * Cout), lambda i: (0, 0))]
    args = [x.astype(BF16), mask_row, w.astype(BF16),
            layer['conv_b'].reshape(1, 2 * Cout).astype(F32)]
    if has_attn:
        a = layer['attn']
        E = a['in_w'].shape[1]
        in_specs += [pl.BlockSpec((1, 1, T), lambda i: (i, 0, 0)),
                     pl.BlockSpec((Cout, E), lambda i: (0, 0)),
                     pl.BlockSpec((1, E), lambda i: (0, 0)),
                     pl.BlockSpec((E, Cout), lambda i: (0, 0)),
                     pl.BlockSpec((1, Cout), lambda i: (0, 0))]
        args += [mask_key, a['in_w'].astype(BF16), a['in_b'].reshape(1, E).astype(F32),
                 a['out_w'].astype(BF16), a['out_b'].reshape(1, Cout).astype(F32)]

    return pl.pallas_call(
        kern,
        out_shape=jax.ShapeDtypeStruct((B, T, Cout), BF16),
        grid=(B,),
        in_specs=in_specs,
        out_specs=pl.BlockSpec((1, T, Cout), lambda i: (i, 0, 0)),
        compiler_params=_cp(1),
    )(*args)


def _dec_layer_kernel(x_ref, temb_ref, keys_ref, vals_ref, mkey_ref,
                      w_ref, b_ref, inw_ref, inb_ref, outw_ref, outb_ref,
                      o_ref, attn_ref, *, K, pad_l, attn_scale):
    T = x_ref.shape[1]
    Cout = o_ref.shape[2]

    x = x_ref[0]                                           # (T, Cin) bf16
    x1 = _conv_glu(x, w_ref, b_ref, K, pad_l, T, Cout)     # causal conv + GLU, f32

    temb = temb_ref[0].astype(F32)                         # (T, E)
    xq = (jnp.dot(x1.astype(BF16), inw_ref[...], preferred_element_type=F32)
          + inb_ref[...] + temb) * SQRT_HALF               # (T, E)
    keys = keys_ref[0]                                     # (S, E) bf16
    scores = lax.dot_general(xq.astype(BF16), keys,
                             (((1,), (1,)), ((), ())),
                             preferred_element_type=F32)   # (T, S), no key transpose
    scores = jnp.where(mkey_ref[0] > 0.5, NEG_BIG, scores)
    mx = jnp.max(scores, axis=-1, keepdims=True)
    e = jnp.exp(scores - mx)
    p = e * pl.reciprocal(jnp.sum(e, axis=-1, keepdims=True), approx=True)
    attn_ref[0] = p
    av = jnp.dot(p.astype(BF16), vals_ref[0], preferred_element_type=F32) * attn_scale
    out = (jnp.dot(av.astype(BF16), outw_ref[...], preferred_element_type=F32)
           + outb_ref[...] + x1) * SQRT_HALF
    o_ref[0] = out.astype(BF16)


def dec_layer_pallas(x, temb, enc_keys, enc_vals, mask_key, layer):
    """One fused decoder layer: causal ConvTBC + GLU + encoder-decoder attention."""
    B, T, Cin = x.shape
    S, E = enc_keys.shape[1], enc_keys.shape[2]
    w = layer['conv_w']
    K = w.shape[0]
    Cout = w.shape[2] // 2
    # TODO(synk): ConvTBC(remove_future=True) source not shown; implemented as a causal
    # conv (left pad K-1, drop future), matching the fairseq convention.
    pad_l = K - 1
    attn_scale = float(S * math.sqrt(1.0 / S)) if S > 0 else 0.0
    a = layer['attn']
    kern = functools.partial(_dec_layer_kernel, K=K, pad_l=pad_l, attn_scale=attn_scale)
    out, attn = pl.pallas_call(
        kern,
        out_shape=(jax.ShapeDtypeStruct((B, T, Cout), BF16),
                   jax.ShapeDtypeStruct((B, T, S), F32)),
        grid=(B,),
        in_specs=[pl.BlockSpec((1, T, Cin), lambda i: (i, 0, 0)),
                  pl.BlockSpec((1, T, E), lambda i: (i, 0, 0)),
                  pl.BlockSpec((1, S, E), lambda i: (i, 0, 0)),
                  pl.BlockSpec((1, S, E), lambda i: (i, 0, 0)),
                  pl.BlockSpec((1, 1, S), lambda i: (i, 0, 0)),
                  pl.BlockSpec((K, Cin, 2 * Cout), lambda i: (0, 0, 0)),
                  pl.BlockSpec((1, 2 * Cout), lambda i: (0, 0)),
                  pl.BlockSpec((Cout, E), lambda i: (0, 0)),
                  pl.BlockSpec((1, E), lambda i: (0, 0)),
                  pl.BlockSpec((E, Cout), lambda i: (0, 0)),
                  pl.BlockSpec((1, Cout), lambda i: (0, 0))],
        out_specs=(pl.BlockSpec((1, T, Cout), lambda i: (i, 0, 0)),
                   pl.BlockSpec((1, T, S), lambda i: (i, 0, 0))),
        compiler_params=_cp(1),
    )(x.astype(BF16), temb.astype(BF16), enc_keys.astype(BF16), enc_vals.astype(BF16),
      mask_key, w.astype(BF16), layer['conv_b'].reshape(1, 2 * Cout).astype(F32),
      a['in_w'].astype(BF16), a['in_b'].reshape(1, E).astype(F32),
      a['out_w'].astype(BF16), a['out_b'].reshape(1, Cout).astype(F32))
    return out, attn


def _enc_tail_kernel(x_ref, ie_ref, m_ref, w_ref, b_ref, xo_ref, yo_ref):
    xf = jnp.dot(x_ref[...], w_ref[...], preferred_element_type=F32) + b_ref[...]
    xf = jnp.where(m_ref[...] > 0.5, 0.0, xf)
    xo_ref[...] = xf.astype(BF16)
    yo_ref[...] = ((xf + ie_ref[...].astype(F32)) * SQRT_HALF).astype(BF16)


def enc_tail_pallas(x, input_embedding, pad_mask, w, b):
    """Fused fc2 + pad masking + y = (x + input_embedding)*sqrt(0.5), over (B*T) rows."""
    B, T, C = x.shape
    E = w.shape[1]
    N = B * T
    xo, yo = pl.pallas_call(
        _enc_tail_kernel,
        out_shape=(jax.ShapeDtypeStruct((N, E), BF16),
                   jax.ShapeDtypeStruct((N, E), BF16)),
        compiler_params=_cp(),
    )(x.reshape(N, C).astype(BF16), input_embedding.reshape(N, E).astype(BF16),
      pad_mask.reshape(N, 1).astype(F32), w.astype(BF16), b.reshape(1, E).astype(F32))
    return xo.reshape(B, T, E), yo.reshape(B, T, E)


def _final_kernel(x_ref, temb_ref, copy_ref, src_ref,
                  w2_ref, b2_ref, gx_ref, ge_ref, gb_ref, o_ref, *, V):
    x = x_ref[0]                                           # (T, C) bf16
    temb = temb_ref[0]                                     # (T, E) bf16
    copy = copy_ref[0]                                     # (T, S) f32
    src = src_ref[0]                                       # (S, 1) int32

    logits = jnp.dot(x, w2_ref[...], preferred_element_type=F32) + b2_ref[...]   # (T, V)
    # fcg over h = cat([x, temb]) as two row-wise dot products (no HBM concat, no N=1 matmul)
    pg_raw = (jnp.sum(x.astype(F32) * gx_ref[...], axis=-1, keepdims=True)
              + jnp.sum(temb.astype(F32) * ge_ref[...], axis=-1, keepdims=True)
              + gb_ref[...])                                                     # (T, 1)
    pg = jax.nn.sigmoid(pg_raw)

    mx = jnp.max(logits, axis=-1, keepdims=True)
    e = jnp.exp(logits - mx)
    probs = e * pl.reciprocal(jnp.sum(e, axis=-1, keepdims=True), approx=True)
    gen = probs * pg

    S = copy.shape[1]
    # scatter_add over vocab via in-VMEM bf16 one-hot (exactly representable)
    onehot = (lax.broadcasted_iota(jnp.int32, (S, V), 1) == src).astype(BF16)
    cp = jnp.dot((copy * (1.0 - pg)).astype(BF16), onehot, preferred_element_type=F32)
    o_ref[0] = jnp.log(gen + cp + 1e-32)


def final_output_pallas(x, temb, copy_scores, src_tokens,
                        fc2_w, fc2_b, fcg_wx, fcg_we, fcg_b, vocab):
    B, T, C = x.shape
    E = temb.shape[2]
    S = copy_scores.shape[2]
    V = vocab
    kern = functools.partial(_final_kernel, V=V)
    return pl.pallas_call(
        kern,
        out_shape=jax.ShapeDtypeStruct((B, T, V), F32),
        grid=(B,),
        in_specs=[pl.BlockSpec((1, T, C), lambda i: (i, 0, 0)),
                  pl.BlockSpec((1, T, E), lambda i: (i, 0, 0)),
                  pl.BlockSpec((1, T, S), lambda i: (i, 0, 0)),
                  pl.BlockSpec((1, S, 1), lambda i: (i, 0, 0)),
                  pl.BlockSpec((C, V), lambda i: (0, 0)),
                  pl.BlockSpec((1, V), lambda i: (0, 0)),
                  pl.BlockSpec((1, C), lambda i: (0, 0)),
                  pl.BlockSpec((1, E), lambda i: (0, 0)),
                  pl.BlockSpec((1, 1), lambda i: (0, 0))],
        out_specs=pl.BlockSpec((1, T, V), lambda i: (i, 0, 0)),
        compiler_params=_cp(1),
    )(x.astype(BF16), temb.astype(BF16), copy_scores.astype(F32),
      src_tokens[:, :, None].astype(jnp.int32),
      fc2_w.astype(BF16), fc2_b.reshape(1, V).astype(F32),
      fcg_wx.reshape(1, C).astype(F32), fcg_we.reshape(1, E).astype(F32),
      fcg_b.reshape(1, 1).astype(F32))


def _lm_head_kernel(x_ref, w_ref, b_ref, o_ref):
    logits = jnp.dot(x_ref[...], w_ref[...], preferred_element_type=F32) + b_ref[...]
    mx = jnp.max(logits, axis=-1, keepdims=True)
    lse = jnp.log(jnp.sum(jnp.exp(logits - mx), axis=-1, keepdims=True)) + mx
    o_ref[...] = logits - lse


def lm_head_pallas(x, w, b):
    """Fused lm_head matmul + log_softmax over (B*L) rows.
    TODO(synk): tile V with an online log-softmax for realistic vocab sizes."""
    B, L, E = x.shape
    V = w.shape[1]
    N = B * L
    out = pl.pallas_call(
        _lm_head_kernel,
        out_shape=jax.ShapeDtypeStruct((N, V), F32),
        compiler_params=_cp(),
    )(x.reshape(N, E).astype(BF16), w.astype(BF16), b.reshape(1, V).astype(F32))
    return out.reshape(B, L, V)


# ----------------------------- model glue (plain JAX) -----------------------------

def extend_conv_spec(convolutions):
    extended = []
    for spec in convolutions:
        if len(spec) == 3:
            extended.append(spec)
        elif len(spec) == 2:
            extended.append(spec + (1,))
        else:
            raise Exception('invalid conv spec ' + str(spec))
    return tuple(extended)


def gather_selected(x, index_mask, n_sel):
    """Select rows where index_mask==1 (each row has exactly n_sel ones), preserving order."""
    B, L = index_mask.shape
    rank = jnp.cumsum(index_mask, axis=1) - 1
    tgt = jnp.where(index_mask == 1, rank, n_sel)
    idx = jnp.zeros((B, n_sel + 1), jnp.int32)
    idx = idx.at[jnp.arange(B)[:, None], tgt].set(
        jnp.broadcast_to(jnp.arange(L, dtype=jnp.int32)[None, :], (B, L)))
    idx = idx[:, :n_sel]
    return jnp.take_along_axis(x, idx[:, :, None], axis=1), idx


def embed_lookup(ep, tokens):
    # TODO(synk): the external share_embed_model GPT-2 transformer is not part of this
    # module; replaced by a deterministic token+position embedding stub.
    L = tokens.shape[1]
    return ep['tok'][tokens] + ep['pos'][:L][None, :, :]


def fconv_encoder_forward(p, tokens, embed_params, tokens_with_prev=None, n_sel=None):
    if tokens_with_prev is not None:
        embed = embed_lookup(embed_params, tokens_with_prev)          # (B, L, E)
        x, idx = gather_selected(embed, tokens, n_sel)                # (B, T, E)
        src_tokens = jnp.take_along_axis(tokens_with_prev, idx, axis=1)
    else:
        x = embed_lookup(embed_params, tokens)
        src_tokens = tokens

    # fused LayerNorm + fc1 (dropout: eval mode -> identity)
    input_embedding, x = ln_fc1_pallas(x, p['ln_g'], p['ln_b'], p['fc1_w'], p['fc1_b'])
    pad_mask = (src_tokens == 0)                                      # (B, T) bool
    mask_row = pad_mask[:, :, None].astype(F32)                       # (B, T, 1)
    mask_key = pad_mask[:, None, :].astype(F32)                       # (B, 1, T)

    for layer in p['layers']:
        # one fused pallas_call per layer: masked_fill + conv + GLU [+ self-attn + gate]
        x = enc_layer_pallas(x, mask_row, mask_key, layer)

    x, y = enc_tail_pallas(x, input_embedding, mask_row, p['fc2_w'], p['fc2_b'])
    return src_tokens, (x, y), pad_mask


def fconv_decoder_forward(p, prev_tokens_index, enc_dict, prev_tokens_with_context,
                          embed_params, n_sel, vocab):
    src_tokens = enc_dict['src_tokens']                               # (B, S)
    enc_x, enc_y = enc_dict['encoder_out']                            # (B, S, E) each
    pad_mask = enc_dict['encoder_padding_mask']                       # (B, S) bool
    mask_key = pad_mask[:, None, :].astype(F32)                       # (B, 1, S)

    embed = embed_lookup(embed_params, prev_tokens_with_context)      # (B, L, E)
    lm_logits = lm_head_pallas(embed, embed_params['lm_w'], embed_params['lm_b'])

    x_sel, _ = gather_selected(embed, prev_tokens_index, n_sel)       # (B, T, E)
    target_embedding, x = ln_fc1_pallas(x_sel, p['ln_g'], p['ln_b'],
                                        p['fc1_w'], p['fc1_b'])

    avg_attn = None
    copy_scores = None
    num_layers = len(p['layers'])
    for layer in p['layers']:
        x, attn_scores = dec_layer_pallas(x, target_embedding, enc_x, enc_y,
                                          mask_key, layer)
        copy_scores = attn_scores
        a = attn_scores / num_layers
        avg_attn = a if avg_attn is None else avg_attn + a

    out = final_output_pallas(x, target_embedding, copy_scores, src_tokens,
                              p['fc2_w'], p['fc2_b'],
                              p['fcg_wx'], p['fcg_we'], p['fcg_b'], vocab)
    return out, avg_attn, lm_logits


def gpt_conut_forward(params, src_tokens, src_tokens_with_pre_context, ctx_tokens,
                      prev_tokens_index, prev_tokens_with_context, n_sel_src,
                      n_sel_prev, vocab):
    ep = params['embed']
    src_tok, src_out, src_pad = fconv_encoder_forward(
        params['src_enc'], src_tokens, ep,
        tokens_with_prev=src_tokens_with_pre_context, n_sel=n_sel_src)
    ctx_tok, ctx_out, ctx_pad = fconv_encoder_forward(params['ctx_enc'], ctx_tokens, ep)
    enc_dict = {
        'src_tokens': jnp.concatenate([src_tok, ctx_tok], axis=1),
        'encoder_out': (jnp.concatenate([src_out[0], ctx_out[0]], axis=1),
                        jnp.concatenate([src_out[1], ctx_out[1]], axis=1)),
        'encoder_padding_mask': jnp.concatenate([src_pad, ctx_pad], axis=1),
    }
    return fconv_decoder_forward(params['dec'], prev_tokens_index, enc_dict,
                                 prev_tokens_with_context, ep, n_sel_prev, vocab)


# ----------------------------- deterministic parameter init -----------------------------

def _key_iter(key):
    while True:
        key, sub = jax.random.split(key)
        yield sub


def init_linear(key, in_f, out_f, dropout=0.0):
    std = math.sqrt((1 - dropout) / in_f)
    w = std * jax.random.normal(key, (in_f, out_f), F32)
    return w, jnp.zeros((out_f,), F32)


def init_convtbc(key, in_c, out_c2, k, dropout=0.0):
    std = math.sqrt(4 * (1.0 - dropout) / (k * in_c))
    w = std * jax.random.normal(key, (k, in_c, out_c2), F32)
    return w, jnp.zeros((out_c2,), F32)


def init_fconv_encoder(key, embed_dim, convolutions, dropout):
    ks = _key_iter(key)
    convolutions = extend_conv_spec(convolutions)
    in_channels = convolutions[0][0]
    p = {'ln_g': jnp.ones((embed_dim,), F32), 'ln_b': jnp.zeros((embed_dim,), F32)}
    p['fc1_w'], p['fc1_b'] = init_linear(next(ks), embed_dim, in_channels, dropout)
    layers, ic = [], in_channels
    for i, (oc, k, _res) in enumerate(convolutions):
        layer = {}
        layer['conv_w'], layer['conv_b'] = init_convtbc(next(ks), ic, oc * 2, k, dropout)
        if i == len(convolutions) - 1:
            attn = {}
            attn['in_w'], attn['in_b'] = init_linear(next(ks), oc, oc)
            attn['out_w'], attn['out_b'] = init_linear(next(ks), oc, oc)
            layer['attn'] = attn
        else:
            layer['attn'] = None
        layers.append(layer)
        ic = oc
    p['layers'] = layers
    p['fc2_w'], p['fc2_b'] = init_linear(next(ks), ic, embed_dim)
    return p


def init_fconv_decoder(key, embed_dim, convolutions, dropout, vocab):
    ks = _key_iter(key)
    convolutions = extend_conv_spec(convolutions)
    in_channels = convolutions[0][0]
    p = {'ln_g': jnp.ones((embed_dim,), F32), 'ln_b': jnp.zeros((embed_dim,), F32)}
    p['fc1_w'], p['fc1_b'] = init_linear(next(ks), embed_dim, in_channels, dropout)
    layers, ic = [], in_channels
    for (oc, k, _res) in convolutions:
        layer = {}
        layer['conv_w'], layer['conv_b'] = init_convtbc(next(ks), ic, oc * 2, k, dropout)
        attn = {}
        attn['in_w'], attn['in_b'] = init_linear(next(ks), oc, embed_dim)
        attn['out_w'], attn['out_b'] = init_linear(next(ks), embed_dim, oc)
        layer['attn'] = attn
        layers.append(layer)
        ic = oc
    p['layers'] = layers
    # fcg over cat([x (ic), target_embedding (embed_dim)]), pre-split for in-kernel fusion
    wg, bg = init_linear(next(ks), embed_dim + ic, 1)
    p['fcg_wx'] = wg[:ic]
    p['fcg_we'] = wg[ic:]
    p['fcg_b'] = bg
    p['fc2_w'], p['fc2_b'] = init_linear(next(ks), ic, vocab)
    return p


def init_embed_model(key, vocab, embed_dim, max_pos):
    k1, k2, k3 = jax.random.split(key, 3)
    return {'tok': 0.02 * jax.random.normal(k1, (vocab, embed_dim), F32),
            'pos': 0.02 * jax.random.normal(k2, (max_pos, embed_dim), F32),
            'lm_w': 0.02 * jax.random.normal(k3, (embed_dim, vocab), F32),
            'lm_b': jnp.zeros((vocab,), F32)}


# ----------------------------- main -----------------------------

if __name__ == "__main__":
    key = jax.random.PRNGKey(0)
    k_src, k_ctx, k_dec, k_emb, k_t1, k_t2, k_t3 = jax.random.split(key, 7)

    # small config consistent with the module structure
    VOCAB = 50
    EMBED_DIM = 32
    MAX_POS = 64
    SRC_CONVS = ((16, 3),) * 2
    CTX_CONVS = ((32, 3),) * 2
    DEC_CONVS = ((16, 3),) * 2
    DROPOUT = 0.1

    params = {
        'src_enc': init_fconv_encoder(k_src, EMBED_DIM, SRC_CONVS, DROPOUT),
        'ctx_enc': init_fconv_encoder(k_ctx, EMBED_DIM, CTX_CONVS, DROPOUT),
        'dec': init_fconv_decoder(k_dec, EMBED_DIM, DEC_CONVS, DROPOUT, VOCAB),
        'embed': init_embed_model(k_emb, VOCAB, EMBED_DIM, MAX_POS),
    }

    B, L_FULL, T_SRC = 2, 16, 8
    T_CTX = 8
    L_PREV, T_PREV = 16, 8

    pos = jnp.arange(L_FULL)
    # binary index masks (exactly T_SRC / T_PREV ones per row), as in the reference usage
    src_tokens = jnp.stack([((pos >= 2) & (pos < 10)).astype(jnp.int32),
                            ((pos >= 6) & (pos < 14)).astype(jnp.int32)])
    prev_tokens_index = jnp.stack([((pos >= 1) & (pos < 9)).astype(jnp.int32),
                                   ((pos >= 5) & (pos < 13)).astype(jnp.int32)])

    src_tokens_with_pre_context = jax.random.randint(k_t1, (B, L_FULL), 2, VOCAB, jnp.int32)
    ctx_tokens = jax.random.randint(k_t2, (B, T_CTX), 2, VOCAB, jnp.int32)
    ctx_tokens = ctx_tokens.at[1, -2:].set(0)   # some padding in the context
    prev_tokens_with_context = jax.random.randint(k_t3, (B, L_PREV), 2, VOCAB, jnp.int32)

    fwd = jax.jit(functools.partial(gpt_conut_forward, n_sel_src=T_SRC,
                                    n_sel_prev=T_PREV, vocab=VOCAB))

    logits, avg_attn, lm_logits = fwd(
        params, src_tokens, src_tokens_with_pre_context, ctx_tokens,
        prev_tokens_index, prev_tokens_with_context)

    jax.block_until_ready(logits)
    jax.block_until_ready(avg_attn)
    jax.block_until_ready(lm_logits)

    assert logits.shape == (B, T_PREV, VOCAB)
    assert avg_attn.shape == (B, T_PREV, T_SRC + T_CTX)
    assert lm_logits.shape == (B, L_PREV, VOCAB)
    print("KERNEL_OK")
</pallas_src>

<mosaic_0001>
module attributes {stable_mosaic.version = 11 : i64} {
  func.func @_ln_fc1_kernel(%arg0: memref<16x32xbf16, #tpu.memory_space<vmem>>, %arg1: memref<1x32xf32, #tpu.memory_space<vmem>>, %arg2: memref<1x32xf32, #tpu.memory_space<vmem>>, %arg3: memref<32x16xbf16, #tpu.memory_space<vmem>>, %arg4: memref<1x16xf32, #tpu.memory_space<vmem>>, %arg5: memref<16x32xbf16, #tpu.memory_space<vmem>>, %arg6: memref<16x16xbf16, #tpu.memory_space<vmem>>) attributes {dimension_semantics = [], scalar_prefetch = 0 : i64, scratch_operands = 0 : i64, tpu.core_type = #tpu.core_type<tc>} {
    %c0 = arith.constant 0 : index
    %c0_0 = arith.constant 0 : index
    %0 = vector.load %arg0[%c0, %c0_0] : memref<16x32xbf16, #tpu.memory_space<vmem>>, vector<16x32xbf16>
    %1 = arith.extf %0 : vector<16x32xbf16> to vector<16x32xf32>
    %cst = arith.constant dense<0.000000e+00> : vector<16xf32>
    %2 = vector.multi_reduction <add>, %1, %cst [1] : vector<16x32xf32> to vector<16xf32>
    %3 = vector.shape_cast %2 : vector<16xf32> to vector<16x1xf32>
    %cst_1 = arith.constant 3.200000e+01 : f32
    %4 = vector.broadcast %cst_1 : f32 to vector<16x1xf32>
    %5 = arith.divf %3, %4 : vector<16x1xf32>
    %6 = vector.broadcast %5 : vector<16x1xf32> to vector<16x32xf32>
    %7 = arith.subf %1, %6 : vector<16x32xf32>
    %8 = arith.mulf %7, %7 : vector<16x32xf32>
    %cst_2 = arith.constant dense<0.000000e+00> : vector<16xf32>
    %9 = vector.multi_reduction <add>, %8, %cst_2 [1] : vector<16x32xf32> to vector<16xf32>
    %10 = vector.shape_cast %9 : vector<16xf32> to vector<16x1xf32>
    %cst_3 = arith.constant 3.200000e+01 : f32
    %11 = vector.broadcast %cst_3 : f32 to vector<16x1xf32>
    %12 = arith.divf %10, %11 : vector<16x1xf32>
    %13 = vector.broadcast %5 : vector<16x1xf32> to vector<16x32xf32>
    %14 = arith.subf %1, %13 : vector<16x32xf32>
    %cst_4 = arith.constant 9.99999974E-6 : f32
    %15 = vector.broadcast %cst_4 : f32 to vector<16x1xf32>
    %16 = arith.addf %12, %15 : vector<16x1xf32>
    %17 = math.rsqrt %16 : vector<16x1xf32>
    %18 = vector.broadcast %17 : vector<16x1xf32> to vector<16x32xf32>
    %19 = arith.mulf %14, %18 : vector<16x32xf32>
    %c0_5 = arith.constant 0 : index
    %c0_6 = arith.constant 0 : index
    %20 = vector.load %arg1[%c0_5, %c0_6] : memref<1x32xf32, #tpu.memory_space<vmem>>, vector<1x32xf32>
    %21 = vector.broadcast %20 : vector<1x32xf32> to vector<16x32xf32>
    %22 = arith.mulf %19, %21 : vector<16x32xf32>
    %c0_7 = arith.constant 0 : index
    %c0_8 = arith.constant 0 : index
    %23 = vector.load %arg2[%c0_7, %c0_8] : memref<1x32xf32, #tpu.memory_space<vmem>>, vector<1x32xf32>
    %24 = vector.broadcast %23 : vector<1x32xf32> to vector<16x32xf32>
    %25 = arith.addf %22, %24 : vector<16x32xf32>
    %26 = arith.truncf %25 : vector<16x32xf32> to vector<16x32xbf16>
    %c0_9 = arith.constant 0 : index
    %c0_10 = arith.constant 0 : index
    %27 = vector.load %arg5[%c0_9, %c0_10] : memref<16x32xbf16, #tpu.memory_space<vmem>>, vector<16x32xbf16>
    tpu.vector_store %arg5[%c0_9, %c0_10], %26 {strides = array<i32>} : memref<16x32xbf16, #tpu.memory_space<vmem>>, vector<16x32xbf16>,
    %c0_11 = arith.constant 0 : index
    %c0_12 = arith.constant 0 : index
    %28 = vector.load %arg3[%c0_11, %c0_12] : memref<32x16xbf16, #tpu.memory_space<vmem>>, vector<32x16xbf16>
    %cst_13 = arith.constant dense<0.000000e+00> : vector<16x16xf32>
    %29 = tpu.matmul %26, %28, %cst_13 {dimension_numbers = #tpu.dot_dimension_numbers<[1], [0], [0], [1], [0, 0, 1, 1], [], []>} : vector<16x32xbf16>, vector<32x16xbf16>, vector<16x16xf32> -> vector<16x16xf32>
    %c0_14 = arith.constant 0 : index
    %c0_15 = arith.constant 0 : index
    %30 = vector.load %arg4[%c0_14, %c0_15] : memref<1x16xf32, #tpu.memory_space<vmem>>, vector<1x16xf32>
    %31 = vector.broadcast %30 : vector<1x16xf32> to vector<16x16xf32>
    %32 = arith.addf %29, %31 : vector<16x16xf32>
    %33 = arith.truncf %32 : vector<16x16xf32> to vector<16x16xbf16>
    %c0_16 = arith.constant 0 : index
    %c0_17 = arith.constant 0 : index
    %34 = vector.load %arg6[%c0_16, %c0_17] : memref<16x16xbf16, #tpu.memory_space<vmem>>, vector<16x16xbf16>
    tpu.vector_store %arg6[%c0_16, %c0_17], %33 {strides = array<i32>} : memref<16x16xbf16, #tpu.memory_space<vmem>>, vector<16x16xbf16>,
    return
  }
}

module attributes {stable_mosaic.version = 11 : i64} {
  func.func @_enc_layer_kernel(%arg0: i32, %arg1: memref<1x8x16xbf16, #tpu.memory_space<vmem>>, %arg2: memref<1x8x1xf32, #tpu.memory_space<vmem>>, %arg3: memref<3x16x32xbf16, #tpu.memory_space<vmem>>, %arg4: memref<1x32xf32, #tpu.memory_space<vmem>>, %arg5: memref<1x1x8xf32, #tpu.memory_space<vmem>>, %arg6: memref<16x16xbf16, #tpu.memory_space<vmem>>, %arg7: memref<1x16xf32, #tpu.memory_space<vmem>>, %arg8: memref<16x16xbf16, #tpu.memory_space<vmem>>, %arg9: memref<1x16xf32, #tpu.memory_space<vmem>>, %arg10: memref<1x8x16xbf16, #tpu.memory_space<vmem>>) attributes {dimension_semantics = [#tpu.dimension_semantics<parallel>], iteration_bounds = array<i64: 2>, scalar_prefetch = 0 : i64, scratch_operands = 0 : i64, tpu.core_type = #tpu.core_type<tc>, window_params = [{transform_indices = @transform_0, window_bounds = array<i64: 1, 8, 16>}, {transform_indices = @transform_1, window_bounds = array<i64: 1, 8, 1>}, {pipeline_mode = #tpu.pipeline_mode<synchronous>, transform_indices = @transform_2, window_bounds = array<i64: 3, 16, 32>}, {pipeline_mode = #tpu.pipeline_mode<synchronous>, transform_indices = @transform_3, window_bounds = array<i64: 1, 32>}, {transform_indices = @transform_4, window_bounds = array<i64: 1, 1, 8>}, {pipeline_mode = #tpu.pipeline_mode<synchronous>, transform_indices = @transform_5, window_bounds = array<i64: 16, 16>}, {pipeline_mode = #tpu.pipeline_mode<synchronous>, transform_indices = @transform_6, window_bounds = array<i64: 1, 16>}, {pipeline_mode = #tpu.pipeline_mode<synchronous>, transform_indices = @transform_7, window_bounds = array<i64: 16, 16>}, {pipeline_mode = #tpu.pipeline_mode<synchronous>, transform_indices = @transform_8, window_bounds = array<i64: 1, 16>}, {transform_indices = @transform_9, window_bounds = array<i64: 1, 8, 16>}]} {
    %c0 = arith.constant 0 : index
    %c0_0 = arith.constant 0 : index
    %c0_1 = arith.constant 0 : index
    %0 = vector.load %arg1[%c0, %c0_0, %c0_1] : memref<1x8x16xbf16, #tpu.memory_space<vmem>>, vector<1x8x16xbf16>
    %1 = vector.shape_cast %0 : vector<1x8x16xbf16> to vector<8x16xbf16>
    %c0_2 = arith.constant 0 : index
    %c0_3 = arith.constant 0 : index
    %c0_4 = arith.constant 0 : index
    %2 = vector.load %arg2[%c0_2, %c0_3, %c0_4] : memref<1x8x1xf32, #tpu.memory_space<vmem>>, vector<1x8x1xf32>
    %3 = vector.shape_cast %2 : vector<1x8x1xf32> to vector<8x1xf32>
    %cst = arith.constant 5.000000e-01 : f32
    %4 = vector.broadcast %cst : f32 to vector<8x1xf32>
    %5 = arith.cmpf ogt, %3, %4 : vector<8x1xf32>
    %cst_5 = arith.constant 0.000000e+00 : bf16
    %6 = vector.broadcast %cst_5 : bf16 to vector<8x16xbf16>
    %7 = vector.shape_cast %5 : vector<8x1xi1> to vector<8x1xi1>
    %8 = vector.broadcast %7 : vector<8x1xi1> to vector<8x16xi1>
    %9 = arith.select %8, %6, %1 : vector<8x16xi1>, vector<8x16xbf16>
    %10 = tpu.iota {dimensions = array<i32: 0>} : vector<8x8xi32>
    %11 = tpu.iota {dimensions = array<i32: 1>} : vector<8x8xi32>
    %cst_6 = arith.constant 0.000000e+00 : f32
    %12 = vector.broadcast %cst_6 : f32 to vector<8x32xf32>
    %c0_7 = arith.constant 0 : index
    %c0_8 = arith.constant 0 : index
    %13 = vector.load %arg4[%c0_7, %c0_8] : memref<1x32xf32, #tpu.memory_space<vmem>>, vector<1x32xf32>
    %14 = vector.broadcast %13 : vector<1x32xf32> to vector<8x32xf32>
    %15 = arith.addf %12, %14 : vector<8x32xf32>
    %c-1_i32 = arith.constant -1 : i32
    %16 = vector.broadcast %c-1_i32 : i32 to vector<8x8xi32>
    %17 = arith.addi %10, %16 : vector<8x8xi32>
    %18 = arith.cmpi eq, %11, %17 : vector<8x8xi32>
    %19 = arith.extui %18 : vector<8x8xi1> to vector<8x8xi32>
    %20 = arith.sitofp %19 : vector<8x8xi32> to vector<8x8xf32>
    %21 = arith.truncf %20 : vector<8x8xf32> to vector<8x8xbf16>
    %cst_9 = arith.constant dense<0.000000e+00> : vector<8x16xf32>
    %22 = tpu.matmul %21, %9, %cst_9 {dimension_numbers = #tpu.dot_dimension_numbers<[1], [0], [0], [1], [0, 0, 1, 1], [], []>} : vector<8x8xbf16>, vector<8x16xbf16>, vector<8x16xf32> -> vector<8x16xf32>
    %23 = arith.truncf %22 : vector<8x16xf32> to vector<8x16xbf16>
    %c0_10 = arith.constant 0 : index
    %c0_11 = arith.constant 0 : index
    %c0_12 = arith.constant 0 : index
    %24 = vector.load %arg3[%c0_10, %c0_11, %c0_12] : memref<3x16x32xbf16, #tpu.memory_space<vmem>>, vector<1x16x32xbf16>
    %25 = vector.shape_cast %24 : vector<1x16x32xbf16> to vector<16x32xbf16>
    %cst_13 = arith.constant dense<0.000000e+00> : vector<8x32xf32>
    %26 = tpu.matmul %23, %25, %cst_13 {dimension_numbers = #tpu.dot_dimension_numbers<[1], [0], [0], [1], [0, 0, 1, 1], [], []>} : vector<8x16xbf16>, vector<16x32xbf16>, vector<8x32xf32> -> vector<8x32xf32>
    %27 = arith.addf %15, %26 : vector<8x32xf32>
    %c1 = arith.constant 1 : index
    %c0_14 = arith.constant 0 : index
    %c0_15 = arith.constant 0 : index
    %28 = vector.load %arg3[%c1, %c0_14, %c0_15] : memref<3x16x32xbf16, #tpu.memory_space<vmem>>, vector<1x16x32xbf16>
    %29 = vector.shape_cast %28 : vector<1x16x32xbf16> to vector<16x32xbf16>
    %cst_16 = arith.constant dense<0.000000e+00> : vector<8x32xf32>
    %30 = tpu.matmul %9, %29, %cst_16 {dimension_numbers = #tpu.dot_dimension_numbers<[1], [0], [0], [1], [0, 0, 1, 1], [], []>} : vector<8x16xbf16>, vector<16x32xbf16>, vector<8x32xf32> -> vector<8x32xf32>
    %31 = arith.addf %27, %30 : vector<8x32xf32>
    %c1_i32 = arith.constant 1 : i32
    %32 = vector.broadcast %c1_i32 : i32 to vector<8x8xi32>
    %33 = arith.addi %10, %32 : vector<8x8xi32>
    %34 = arith.cmpi eq, %11, %33 : vector<8x8xi32>
    %35 = arith.extui %34 : vector<8x8xi1> to vector<8x8xi32>
    %36 = arith.sitofp %35 : vector<8x8xi32> to vector<8x8xf32>
    %37 = arith.truncf %36 : vector<8x8xf32> to vector<8x8xbf16>
    %cst_17 = arith.constant dense<0.000000e+00> : vector<8x16xf32>
    %38 = tpu.matmul %37, %9, %cst_17 {dimension_numbers = #tpu.dot_dimension_numbers<[1], [0], [0], [1], [0, 0, 1, 1], [], []>} : vector<8x8xbf16>, vector<8x16xbf16>, vector<8x16xf32> -> vector<8x16xf32>
    %39 = arith.truncf %38 : vector<8x16xf32> to vector<8x16xbf16>
    %c2 = arith.constant 2 : index
    %c0_18 = arith.constant 0 : index
    %c0_19 = arith.constant 0 : index
    %40 = vector.load %arg3[%c2, %c0_18, %c0_19] : memref<3x16x32xbf16, #tpu.memory_space<vmem>>, vector<1x16x32xbf16>
    %41 = vector.shape_cast %40 : vector<1x16x32xbf16> to vector<16x32xbf16>
    %cst_20 = arith.constant dense<0.000000e+00> : vector<8x32xf32>
    %42 = tpu.matmul %39, %41, %cst_20 {dimension_numbers = #tpu.dot_dimension_numbers<[1], [0], [0], [1], [0, 0, 1, 1], [], []>} : vector<8x16xbf16>, vector<16x32xbf16>, vector<8x32xf32> -> vector<8x32xf32>
    %43 = arith.addf %31, %42 : vector<8x32xf32>
    %44 = vector.extract_strided_slice %43 {offsets = [0, 0], sizes = [8, 16], strides = [1, 1]} : vector<8x32xf32> to vector<8x16xf32>
    %45 = vector.extract_strided_slice %43 {offsets = [0, 16], sizes = [8, 16], strides = [1, 1]} : vector<8x32xf32> to vector<8x16xf32>
    %46 = arith.negf %45 : vector<8x16xf32>
    %47 = math.exp %46 : vector<8x16xf32>
    %cst_21 = arith.constant 1.000000e+00 : f32
    %48 = vector.broadcast %cst_21 : f32 to vector<8x16xf32>
    %49 = arith.addf %48, %47 : vector<8x16xf32>
    %50 = arith.divf %48, %49 : vector<8x16xf32>
    %51 = arith.mulf %44, %50 : vector<8x16xf32>
    %c0_22 = arith.constant 0 : index
    %c0_23 = arith.constant 0 : index
    %c0_24 = arith.constant 0 : index
    %52 = vector.load %arg5[%c0_22, %c0_23, %c0_24] : memref<1x1x8xf32, #tpu.memory_space<vmem>>, vector<1x1x8xf32>
    %53 = vector.shape_cast %52 : vector<1x1x8xf32> to vector<1x8xf32>
    %54 = arith.extf %9 : vector<8x16xbf16> to vector<8x16xf32>
    %55 = arith.truncf %51 : vector<8x16xf32> to vector<8x16xbf16>
    %c0_25 = arith.constant 0 : index
    %c0_26 = arith.constant 0 : index
    %56 = vector.load %arg6[%c0_25, %c0_26] : memref<16x16xbf16, #tpu.memory_space<vmem>>, vector<16x16xbf16>
    %cst_27 = arith.constant dense<0.000000e+00> : vector<8x16xf32>
    %57 = tpu.matmul %55, %56, %cst_27 {dimension_numbers = #tpu.dot_dimension_numbers<[1], [0], [0], [1], [0, 0, 1, 1], [], []>} : vector<8x16xbf16>, vector<16x16xbf16>, vector<8x16xf32> -> vector<8x16xf32>
    %c0_28 = arith.constant 0 : index
    %c0_29 = arith.constant 0 : index
    %58 = vector.load %arg7[%c0_28, %c0_29] : memref<1x16xf32, #tpu.memory_space<vmem>>, vector<1x16xf32>
    %59 = vector.broadcast %58 : vector<1x16xf32> to vector<8x16xf32>
    %60 = arith.addf %57, %59 : vector<8x16xf32>
    %61 = arith.addf %60, %54 : vector<8x16xf32>
    %cst_30 = arith.constant 0.707106769 : f32
    %62 = vector.broadcast %cst_30 : f32 to vector<8x16xf32>
    %63 = arith.mulf %61, %62 : vector<8x16xf32>
    %64 = arith.truncf %51 : vector<8x16xf32> to vector<8x16xbf16>
    %65 = arith.truncf %63 : vector<8x16xf32> to vector<8x16xbf16>
    %cst_31 = arith.constant dense<0.000000e+00> : vector<8x8xf32>
    %66 = tpu.matmul %65, %64, %cst_31 {dimension_numbers = #tpu.dot_dimension_numbers<[1], [1], [0], [0], [0, 0, 1, 0], [], []>} : vector<8x16xbf16>, vector<8x16xbf16>, vector<8x8xf32> -> vector<8x8xf32>
    %cst_32 = arith.constant 5.000000e-01 : f32
    %67 = vector.broadcast %cst_32 : f32 to vector<1x8xf32>
    %68 = arith.cmpf ogt, %53, %67 : vector<1x8xf32>
    %cst_33 = arith.constant -1.000000e+30 : f32
    %69 = vector.shape_cast %68 : vector<1x8xi1> to vector<1x8xi1>
    %70 = vector.broadcast %69 : vector<1x8xi1> to vector<8x8xi1>
    %71 = vector.broadcast %cst_33 : f32 to vector<8x8xf32>
    %72 = arith.select %70, %71, %66 : vector<8x8xi1>, vector<8x8xf32>
    %cst_34 = arith.constant dense<0xFF800000> : vector<8xf32>
    %73 = vector.multi_reduction <maximumf>, %72, %cst_34 [1] : vector<8x8xf32> to vector<8xf32>
    %74 = vector.shape_cast %73 : vector<8xf32> to vector<8x1xf32>
    %75 = vector.broadcast %74 : vector<8x1xf32> to vector<8x8xf32>
    %76 = arith.subf %72, %75 : vector<8x8xf32>
    %77 = math.exp %76 : vector<8x8xf32>
    %cst_35 = arith.constant dense<0.000000e+00> : vector<8xf32>
    %78 = vector.multi_reduction <add>, %77, %cst_35 [1] : vector<8x8xf32> to vector<8xf32>
    %79 = vector.shape_cast %78 : vector<8xf32> to vector<8x1xf32>
    %80 = tpu.reciprocal %79 {approx = true} : vector<8x1xf32> -> vector<8x1xf32>
    %81 = vector.broadcast %80 : vector<8x1xf32> to vector<8x8xf32>
    %82 = arith.mulf %77, %81 : vector<8x8xf32>
    %83 = arith.truncf %82 : vector<8x8xf32> to vector<8x8xbf16>
    %cst_36 = arith.constant dense<0.000000e+00> : vector<8x16xf32>
    %84 = tpu.matmul %83, %64, %cst_36 {dimension_numbers = #tpu.dot_dimension_numbers<[1], [0], [0], [1], [0, 0, 1, 1], [], []>} : vector<8x8xbf16>, vector<8x16xbf16>, vector<8x16xf32> -> vector<8x16xf32>
    %cst_37 = arith.constant 2.82842708 : f32
    %85 = vector.broadcast %cst_37 : f32 to vector<8x16xf32>
    %86 = arith.mulf %84, %85 : vector<8x16xf32>
    %87 = arith.truncf %86 : vector<8x16xf32> to vector<8x16xbf16>
    %c0_38 = arith.constant 0 : index
    %c0_39 = arith.constant 0 : index
    %88 = vector.load %arg8[%c0_38, %c0_39] : memref<16x16xbf16, #tpu.memory_space<vmem>>, vector<16x16xbf16>
    %cst_40 = arith.constant dense<0.000000e+00> : vector<8x16xf32>
    %89 = tpu.matmul %87, %88, %cst_40 {dimension_numbers = #tpu.dot_dimension_numbers<[1], [0], [0], [1], [0, 0, 1, 1], [], []>} : vector<8x16xbf16>, vector<16x16xbf16>, vector<8x16xf32> -> vector<8x16xf32>
    %c0_41 = arith.constant 0 : index
    %c0_42 = arith.constant 0 : index
    %90 = vector.load %arg9[%c0_41, %c0_42] : memref<1x16xf32, #tpu.memory_space<vmem>>, vector<1x16xf32>
    %91 = vector.broadcast %90 : vector<1x16xf32> to vector<8x16xf32>
    %92 = arith.addf %89, %91 : vector<8x16xf32>
    %93 = arith.addf %92, %51 : vector<8x16xf32>
    %cst_43 = arith.constant 0.707106769 : f32
    %94 = vector.broadcast %cst_43 : f32 to vector<8x16xf32>
    %95 = arith.mulf %93, %94 : vector<8x16xf32>
    %96 = arith.negf %95 : vector<8x16xf32>
    %97 = math.exp %96 : vector<8x16xf32>
    %cst_44 = arith.constant 1.000000e+00 : f32
    %98 = vector.broadcast %cst_44 : f32 to vector<8x16xf32>
    %99 = arith.addf %98, %97 : vector<8x16xf32>
    %100 = arith.divf %98, %99 : vector<8x16xf32>
    %101 = arith.mulf %51, %100 : vector<8x16xf32>
    %102 = arith.truncf %101 : vector<8x16xf32> to vector<8x16xbf16>
    %c0_45 = arith.constant 0 : index
    %c0_46 = arith.constant 0 : index
    %c0_47 = arith.constant 0 : index
    %103 = vector.load %arg10[%c0_45, %c0_46, %c0_47] : memref<1x8x16xbf16, #tpu.memory_space<vmem>>, vector<1x8x16xbf16>
    %104 = vector.shape_cast %103 : vector<1x8x16xbf16> to vector<8x16xbf16>
    %105 = vector.shape_cast %102 : vector<8x16xbf16> to vector<1x8x16xbf16>
    tpu.vector_store %arg10[%c0_45, %c0_46, %c0_47], %105 {strides = array<i32>} : memref<1x8x16xbf16, #tpu.memory_space<vmem>>, vector<1x8x16xbf16>,
    return
  }
  func.func @transform_0(%arg0: i32) -> (i32, i32, i32) {
    %c0_i32 = arith.constant 0 : i32
    %c0_i32_0 = arith.constant 0 : i32
    %c0_i32_1 = arith.constant 0 : i32
    return %arg0, %c0_i32, %c0_i32_0 : i32, i32, i32
  }
  func.func @transform_1(%arg0: i32) -> (i32, i32, i32) {
    %c0_i32 = arith.constant 0 : i32
    %c0_i32_0 = arith.constant 0 : i32
    %c0_i32_1 = arith.constant 0 : i32
    return %arg0, %c0_i32, %c0_i32_0 : i32, i32, i32
  }
  func.func @transform_2(%arg0: i32) -> (i32, i32, i32) {
    %c0_i32 = arith.constant 0 : i32
    %c0_i32_0 = arith.constant 0 : i32
    %c0_i32_1 = arith.constant 0 : i32
    %c0_i32_2 = arith.constant 0 : i32
    return %c0_i32, %c0_i32_0, %c0_i32_1 : i32, i32, i32
  }
  func.func @transform_3(%arg0: i32) -> (i32, i32) {
    %c0_i32 = arith.constant 0 : i32
    %c0_i32_0 = arith.constant 0 : i32
    %c0_i32_1 = arith.constant 0 : i32
    return %c0_i32, %c0_i32_0 : i32, i32
  }
  func.func @transform_4(%arg0: i32) -> (i32, i32, i32) {
    %c0_i32 = arith.constant 0 : i32
    %c0_i32_0 = arith.constant 0 : i32
    %c0_i32_1 = arith.constant 0 : i32
    return %arg0, %c0_i32, %c0_i32_0 : i32, i32, i32
  }
  func.func @transform_5(%arg0: i32) -> (i32, i32) {
    %c0_i32 = arith.constant 0 : i32
    %c0_i32_0 = arith.constant 0 : i32
    %c0_i32_1 = arith.constant 0 : i32
    return %c0_i32, %c0_i32_0 : i32, i32
  }
  func.func @transform_6(%arg0: i32) -> (i32, i32) {
    %c0_i32 = arith.constant 0 : i32
    %c0_i32_0 = arith.constant 0 : i32
    %c0_i32_1 = arith.constant 0 : i32
    return %c0_i32, %c0_i32_0 : i32, i32
  }
  func.func @transform_7(%arg0: i32) -> (i32, i32) {
    %c0_i32 = arith.constant 0 : i32
    %c0_i32_0 = arith.constant 0 : i32
    %c0_i32_1 = arith.constant 0 : i32
    return %c0_i32, %c0_i32_0 : i32, i32
  }
  func.func @transform_8(%arg0: i32) -> (i32, i32) {
    %c0_i32 = arith.constant 0 : i32
    %c0_i32_0 = arith.constant 0 : i32
    %c0_i32_1 = arith.constant 0 : i32
    return %c0_i32, %c0_i32_0 : i32, i32
  }
  func.func @transform_9(%arg0: i32) -> (i32, i32, i32) {
    %c0_i32 = arith.constant 0 : i32
    %c0_i32_0 = arith.constant 0 : i32
    %c0_i32_1 = arith.constant 0 : i32
    return %arg0, %c0_i32, %c0_i32_0 : i32, i32, i32
  }
}

module attributes {stable_mosaic.version = 11 : i64} {
  func.func @_enc_layer_kernel(%arg0: i32, %arg1: memref<1x8x16xbf16, #tpu.memory_space<vmem>>, %arg2: memref<1x8x1xf32, #tpu.memory_space<vmem>>, %arg3: memref<3x16x32xbf16, #tpu.memory_space<vmem>>, %arg4: memref<1x32xf32, #tpu.memory_space<vmem>>, %arg5: memref<1x8x16xbf16, #tpu.memory_space<vmem>>) attributes {dimension_semantics = [#tpu.dimension_semantics<parallel>], iteration_bounds = array<i64: 2>, scalar_prefetch = 0 : i64, scratch_operands = 0 : i64, tpu.core_type = #tpu.core_type<tc>, window_params = [{transform_indices = @transform_0, window_bounds = array<i64: 1, 8, 16>}, {transform_indices = @transform_1, window_bounds = array<i64: 1, 8, 1>}, {pipeline_mode = #tpu.pipeline_mode<synchronous>, transform_indices = @transform_2, window_bounds = array<i64: 3, 16, 32>}, {pipeline_mode = #tpu.pipeline_mode<synchronous>, transform_indices = @transform_3, window_bounds = array<i64: 1, 32>}, {transform_indices = @transform_4, window_bounds = array<i64: 1, 8, 16>}]} {
    %c0 = arith.constant 0 : index
    %c0_0 = arith.constant 0 : index
    %c0_1 = arith.constant 0 : index
    %0 = vector.load %arg1[%c0, %c0_0, %c0_1] : memref<1x8x16xbf16, #tpu.memory_space<vmem>>, vector<1x8x16xbf16>
    %1 = vector.shape_cast %0 : vector<1x8x16xbf16> to vector<8x16xbf16>
    %c0_2 = arith.constant 0 : index
    %c0_3 = arith.constant 0 : index
    %c0_4 = arith.constant 0 : index
    %2 = vector.load %arg2[%c0_2, %c0_3, %c0_4] : memref<1x8x1xf32, #tpu.memory_space<vmem>>, vector<1x8x1xf32>
    %3 = vector.shape_cast %2 : vector<1x8x1xf32> to vector<8x1xf32>
    %cst = arith.constant 5.000000e-01 : f32
    %4 = vector.broadcast %cst : f32 to vector<8x1xf32>
    %5 = arith.cmpf ogt, %3, %4 : vector<8x1xf32>
    %cst_5 = arith.constant 0.000000e+00 : bf16
    %6 = vector.broadcast %cst_5 : bf16 to vector<8x16xbf16>
    %7 = vector.shape_cast %5 : vector<8x1xi1> to vector<8x1xi1>
    %8 = vector.broadcast %7 : vector<8x1xi1> to vector<8x16xi1>
    %9 = arith.select %8, %6, %1 : vector<8x16xi1>, vector<8x16xbf16>
    %10 = tpu.iota {dimensions = array<i32: 0>} : vector<8x8xi32>
    %11 = tpu.iota {dimensions = array<i32: 1>} : vector<8x8xi32>
    %cst_6 = arith.constant 0.000000e+00 : f32
    %12 = vector.broadcast %cst_6 : f32 to vector<8x32xf32>
    %c0_7 = arith.constant 0 : index
    %c0_8 = arith.constant 0 : index
    %13 = vector.load %arg4[%c0_7, %c0_8] : memref<1x32xf32, #tpu.memory_space<vmem>>, vector<1x32xf32>
    %14 = vector.broadcast %13 : vector<1x32xf32> to vector<8x32xf32>
    %15 = arith.addf %12, %14 : vector<8x32xf32>
    %c-1_i32 = arith.constant -1 : i32
    %16 = vector.broadcast %c-1_i32 : i32 to vector<8x8xi32>
    %17 = arith.addi %10, %16 : vector<8x8xi32>
    %18 = arith.cmpi eq, %11, %17 : vector<8x8xi32>
    %19 = arith.extui %18 : vector<8x8xi1> to vector<8x8xi32>
    %20 = arith.sitofp %19 : vector<8x8xi32> to vector<8x8xf32>
    %21 = arith.truncf %20 : vector<8x8xf32> to vector<8x8xbf16>
    %cst_9 = arith.constant dense<0.000000e+00> : vector<8x16xf32>
    %22 = tpu.matmul %21, %9, %cst_9 {dimension_numbers = #tpu.dot_dimension_numbers<[1], [0], [0], [1], [0, 0, 1, 1], [], []>} : vector<8x8xbf16>, vector<8x16xbf16>, vector<8x16xf32> -> vector<8x16xf32>
    %23 = arith.truncf %22 : vector<8x16xf32> to vector<8x16xbf16>
    %c0_10 = arith.constant 0 : index
    %c0_11 = arith.constant 0 : index
    %c0_12 = arith.constant 0 : index
    %24 = vector.load %arg3[%c0_10, %c0_11, %c0_12] : memref<3x16x32xbf16, #tpu.memory_space<vmem>>, vector<1x16x32xbf16>
    %25 = vector.shape_cast %24 : vector<1x16x32xbf16> to vector<16x32xbf16>
    %cst_13 = arith.constant dense<0.000000e+00> : vector<8x32xf32>
    %26 = tpu.matmul %23, %25, %cst_13 {dimension_numbers = #tpu.dot_dimension_numbers<[1], [0], [0], [1], [0, 0, 1, 1], [], []>} : vector<8x16xbf16>, vector<16x32xbf16>, vector<8x32xf32> -> vector<8x32xf32>
    %27 = arith.addf %15, %26 : vector<8x32xf32>
    %c1 = arith.constant 1 : index
    %c0_14 = arith.constant 0 : index
    %c0_15 = arith.constant 0 : index
    %28 = vector.load %arg3[%c1, %c0_14, %c0_15] : memref<3x16x32xbf16, #tpu.memory_space<vmem>>, vector<1x16x32xbf16>
    %29 = vector.shape_cast %28 : vector<1x16x32xbf16> to vector<16x32xbf16>
    %cst_16 = arith.constant dense<0.000000e+00> : vector<8x32xf32>
    %30 = tpu.matmul %9, %29, %cst_16 {dimension_numbers = #tpu.dot_dimension_numbers<[1], [0], [0], [1], [0, 0, 1, 1], [], []>} : vector<8x16xbf16>, vector<16x32xbf16>, vector<8x32xf32> -> vector<8x32xf32>
    %31 = arith.addf %27, %30 : vector<8x32xf32>
    %c1_i32 = arith.constant 1 : i32
    %32 = vector.broadcast %c1_i32 : i32 to vector<8x8xi32>
    %33 = arith.addi %10, %32 : vector<8x8xi32>
    %34 = arith.cmpi eq, %11, %33 : vector<8x8xi32>
    %35 = arith.extui %34 : vector<8x8xi1> to vector<8x8xi32>
    %36 = arith.sitofp %35 : vector<8x8xi32> to vector<8x8xf32>
    %37 = arith.truncf %36 : vector<8x8xf32> to vector<8x8xbf16>
    %cst_17 = arith.constant dense<0.000000e+00> : vector<8x16xf32>
    %38 = tpu.matmul %37, %9, %cst_17 {dimension_numbers = #tpu.dot_dimension_numbers<[1], [0], [0], [1], [0, 0, 1, 1], [], []>} : vector<8x8xbf16>, vector<8x16xbf16>, vector<8x16xf32> -> vector<8x16xf32>
    %39 = arith.truncf %38 : vector<8x16xf32> to vector<8x16xbf16>
    %c2 = arith.constant 2 : index
    %c0_18 = arith.constant 0 : index
    %c0_19 = arith.constant 0 : index
    %40 = vector.load %arg3[%c2, %c0_18, %c0_19] : memref<3x16x32xbf16, #tpu.memory_space<vmem>>, vector<1x16x32xbf16>
    %41 = vector.shape_cast %40 : vector<1x16x32xbf16> to vector<16x32xbf16>
    %cst_20 = arith.constant dense<0.000000e+00> : vector<8x32xf32>
    %42 = tpu.matmul %39, %41, %cst_20 {dimension_numbers = #tpu.dot_dimension_numbers<[1], [0], [0], [1], [0, 0, 1, 1], [], []>} : vector<8x16xbf16>, vector<16x32xbf16>, vector<8x32xf32> -> vector<8x32xf32>
    %43 = arith.addf %31, %42 : vector<8x32xf32>
    %44 = vector.extract_strided_slice %43 {offsets = [0, 0], sizes = [8, 16], strides = [1, 1]} : vector<8x32xf32> to vector<8x16xf32>
    %45 = vector.extract_strided_slice %43 {offsets = [0, 16], sizes = [8, 16], strides = [1, 1]} : vector<8x32xf32> to vector<8x16xf32>
    %46 = arith.negf %45 : vector<8x16xf32>
    %47 = math.exp %46 : vector<8x16xf32>
    %cst_21 = arith.constant 1.000000e+00 : f32
    %48 = vector.broadcast %cst_21 : f32 to vector<8x16xf32>
    %49 = arith.addf %48, %47 : vector<8x16xf32>
    %50 = arith.divf %48, %49 : vector<8x16xf32>
    %51 = arith.mulf %44, %50 : vector<8x16xf32>
    %52 = arith.truncf %51 : vector<8x16xf32> to vector<8x16xbf16>
    %c0_22 = arith.constant 0 : index
    %c0_23 = arith.constant 0 : index
    %c0_24 = arith.constant 0 : index
    %53 = vector.load %arg5[%c0_22, %c0_23, %c0_24] : memref<1x8x16xbf16, #tpu.memory_space<vmem>>, vector<1x8x16xbf16>
    %54 = vector.shape_cast %53 : vector<1x8x16xbf16> to vector<8x16xbf16>
    %55 = vector.shape_cast %52 : vector<8x16xbf16> to vector<1x8x16xbf16>
    tpu.vector_store %arg5[%c0_22, %c0_23, %c0_24], %55 {strides = array<i32>} : memref<1x8x16xbf16, #tpu.memory_space<vmem>>, vector<1x8x16xbf16>,
    return
  }
  func.func @transform_0(%arg0: i32) -> (i32, i32, i32) {
    %c0_i32 = arith.constant 0 : i32
    %c0_i32_0 = arith.constant 0 : i32
    %c0_i32_1 = arith.constant 0 : i32
    return %arg0, %c0_i32, %c0_i32_0 : i32, i32, i32
  }
  func.func @transform_1(%arg0: i32) -> (i32, i32, i32) {
    %c0_i32 = arith.constant 0 : i32
    %c0_i32_0 = arith.constant 0 : i32
    %c0_i32_1 = arith.constant 0 : i32
    return %arg0, %c0_i32, %c0_i32_0 : i32, i32, i32
  }
  func.func @transform_2(%arg0: i32) -> (i32, i32, i32) {
    %c0_i32 = arith.constant 0 : i32
    %c0_i32_0 = arith.constant 0 : i32
    %c0_i32_1 = arith.constant 0 : i32
    %c0_i32_2 = arith.constant 0 : i32
    return %c0_i32, %c0_i32_0, %c0_i32_1 : i32, i32, i32
  }
  func.func @transform_3(%arg0: i32) -> (i32, i32) {
    %c0_i32 = arith.constant 0 : i32
    %c0_i32_0 = arith.constant 0 : i32
    %c0_i32_1 = arith.constant 0 : i32
    return %c0_i32, %c0_i32_0 : i32, i32
  }
  func.func @transform_4(%arg0: i32) -> (i32, i32, i32) {
    %c0_i32 = arith.constant 0 : i32
    %c0_i32_0 = arith.constant 0 : i32
    %c0_i32_1 = arith.constant 0 : i32
    return %arg0, %c0_i32, %c0_i32_0 : i32, i32, i32
  }
}

module attributes {stable_mosaic.version = 11 : i64} {
  func.func @_enc_tail_kernel(%arg0: memref<16x16xbf16, #tpu.memory_space<vmem>>, %arg1: memref<16x32xbf16, #tpu.memory_space<vmem>>, %arg2: memref<16x1xf32, #tpu.memory_space<vmem>>, %arg3: memref<16x32xbf16, #tpu.memory_space<vmem>>, %arg4: memref<1x32xf32, #tpu.memory_space<vmem>>, %arg5: memref<16x32xbf16, #tpu.memory_space<vmem>>, %arg6: memref<16x32xbf16, #tpu.memory_space<vmem>>) attributes {dimension_semantics = [], scalar_prefetch = 0 : i64, scratch_operands = 0 : i64, tpu.core_type = #tpu.core_type<tc>} {
    %c0 = arith.constant 0 : index
    %c0_0 = arith.constant 0 : index
    %0 = vector.load %arg0[%c0, %c0_0] : memref<16x16xbf16, #tpu.memory_space<vmem>>, vector<16x16xbf16>
    %c0_1 = arith.constant 0 : index
    %c0_2 = arith.constant 0 : index
    %1 = vector.load %arg3[%c0_1, %c0_2] : memref<16x32xbf16, #tpu.memory_space<vmem>>, vector<16x32xbf16>
    %cst = arith.constant dense<0.000000e+00> : vector<16x32xf32>
    %2 = tpu.matmul %0, %1, %cst {dimension_numbers = #tpu.dot_dimension_numbers<[1], [0], [0], [1], [0, 0, 1, 1], [], []>} : vector<16x16xbf16>, vector<16x32xbf16>, vector<16x32xf32> -> vector<16x32xf32>
    %c0_3 = arith.constant 0 : index
    %c0_4 = arith.constant 0 : index
    %3 = vector.load %arg4[%c0_3, %c0_4] : memref<1x32xf32, #tpu.memory_space<vmem>>, vector<1x32xf32>
    %4 = vector.broadcast %3 : vector<1x32xf32> to vector<16x32xf32>
    %5 = arith.addf %2, %4 : vector<16x32xf32>
    %c0_5 = arith.constant 0 : index
    %c0_6 = arith.constant 0 : index
    %6 = vector.load %arg2[%c0_5, %c0_6] : memref<16x1xf32, #tpu.memory_space<vmem>>, vector<16x1xf32>
    %cst_7 = arith.constant 5.000000e-01 : f32
    %7 = vector.broadcast %cst_7 : f32 to vector<16x1xf32>
    %8 = arith.cmpf ogt, %6, %7 : vector<16x1xf32>
    %cst_8 = arith.constant 0.000000e+00 : f32
    %9 = vector.shape_cast %8 : vector<16x1xi1> to vector<16x1xi1>
    %10 = vector.broadcast %9 : vector<16x1xi1> to vector<16x32xi1>
    %11 = vector.broadcast %cst_8 : f32 to vector<16x32xf32>
    %12 = arith.select %10, %11, %5 : vector<16x32xi1>, vector<16x32xf32>
    %13 = arith.truncf %12 : vector<16x32xf32> to vector<16x32xbf16>
    %c0_9 = arith.constant 0 : index
    %c0_10 = arith.constant 0 : index
    %14 = vector.load %arg5[%c0_9, %c0_10] : memref<16x32xbf16, #tpu.memory_space<vmem>>, vector<16x32xbf16>
    tpu.vector_store %arg5[%c0_9, %c0_10], %13 {strides = array<i32>} : memref<16x32xbf16, #tpu.memory_space<vmem>>, vector<16x32xbf16>,
    %c0_11 = arith.constant 0 : index
    %c0_12 = arith.constant 0 : index
    %15 = vector.load %arg1[%c0_11, %c0_12] : memref<16x32xbf16, #tpu.memory_space<vmem>>, vector<16x32xbf16>
    %16 = arith.extf %15 : vector<16x32xbf16> to vector<16x32xf32>
    %17 = arith.addf %12, %16 : vector<16x32xf32>
    %cst_13 = arith.constant 0.707106769 : f32
    %18 = vector.broadcast %cst_13 : f32 to vector<16x32xf32>
    %19 = arith.mulf %17, %18 : vector<16x32xf32>
    %20 = arith.truncf %19 : vector<16x32xf32> to vector<16x32xbf16>
    %c0_14 = arith.constant 0 : index
    %c0_15 = arith.constant 0 : index
    %21 = vector.load %arg6[%c0_14, %c0_15] : memref<16x32xbf16, #tpu.memory_space<vmem>>, vector<16x32xbf16>
    tpu.vector_store %arg6[%c0_14, %c0_15], %20 {strides = array<i32>} : memref<16x32xbf16, #tpu.memory_space<vmem>>, vector<16x32xbf16>,
    return
  }
}

module attributes {stable_mosaic.version = 11 : i64} {
  func.func @_ln_fc1_kernel(%arg0: memref<16x32xbf16, #tpu.memory_space<vmem>>, %arg1: memref<1x32xf32, #tpu.memory_space<vmem>>, %arg2: memref<1x32xf32, #tpu.memory_space<vmem>>, %arg3: memref<32x32xbf16, #tpu.memory_space<vmem>>, %arg4: memref<1x32xf32, #tpu.memory_space<vmem>>, %arg5: memref<16x32xbf16, #tpu.memory_space<vmem>>, %arg6: memref<16x32xbf16, #tpu.memory_space<vmem>>) attributes {dimension_semantics = [], scalar_prefetch = 0 : i64, scratch_operands = 0 : i64, tpu.core_type = #tpu.core_type<tc>} {
    %c0 = arith.constant 0 : index
    %c0_0 = arith.constant 0 : index
    %0 = vector.load %arg0[%c0, %c0_0] : memref<16x32xbf16, #tpu.memory_space<vmem>>, vector<16x32xbf16>
    %1 = arith.extf %0 : vector<16x32xbf16> to vector<16x32xf32>
    %cst = arith.constant dense<0.000000e+00> : vector<16xf32>
    %2 = vector.multi_reduction <add>, %1, %cst [1] : vector<16x32xf32> to vector<16xf32>
    %3 = vector.shape_cast %2 : vector<16xf32> to vector<16x1xf32>
    %cst_1 = arith.constant 3.200000e+01 : f32
    %4 = vector.broadcast %cst_1 : f32 to vector<16x1xf32>
    %5 = arith.divf %3, %4 : vector<16x1xf32>
    %6 = vector.broadcast %5 : vector<16x1xf32> to vector<16x32xf32>
    %7 = arith.subf %1, %6 : vector<16x32xf32>
    %8 = arith.mulf %7, %7 : vector<16x32xf32>
    %cst_2 = arith.constant dense<0.000000e+00> : vector<16xf32>
    %9 = vector.multi_reduction <add>, %8, %cst_2 [1] : vector<16x32xf32> to vector<16xf32>
    %10 = vector.shape_cast %9 : vector<16xf32> to vector<16x1xf32>
    %cst_3 = arith.constant 3.200000e+01 : f32
    %11 = vector.broadcast %cst_3 : f32 to vector<16x1xf32>
    %12 = arith.divf %10, %11 : vector<16x1xf32>
    %13 = vector.broadcast %5 : vector<16x1xf32> to vector<16x32xf32>
    %14 = arith.subf %1, %13 : vector<16x32xf32>
    %cst_4 = arith.constant 9.99999974E-6 : f32
    %15 = vector.broadcast %cst_4 : f32 to vector<16x1xf32>
    %16 = arith.addf %12, %15 : vector<16x1xf32>
    %17 = math.rsqrt %16 : vector<16x1xf32>
    %18 = vector.broadcast %17 : vector<16x1xf32> to vector<16x32xf32>
    %19 = arith.mulf %14, %18 : vector<16x32xf32>
    %c0_5 = arith.constant 0 : index
    %c0_6 = arith.constant 0 : index
    %20 = vector.load %arg1[%c0_5, %c0_6] : memref<1x32xf32, #tpu.memory_space<vmem>>, vector<1x32xf32>
    %21 = vector.broadcast %20 : vector<1x32xf32> to vector<16x32xf32>
    %22 = arith.mulf %19, %21 : vector<16x32xf32>
    %c0_7 = arith.constant 0 : index
    %c0_8 = arith.constant 0 : index
    %23 = vector.load %arg2[%c0_7, %c0_8] : memref<1x32xf32, #tpu.memory_space<vmem>>, vector<1x32xf32>
    %24 = vector.broadcast %23 : vector<1x32xf32> to vector<16x32xf32>
    %25 = arith.addf %22, %24 : vector<16x32xf32>
    %26 = arith.truncf %25 : vector<16x32xf32> to vector<16x32xbf16>
    %c0_9 = arith.constant 0 : index
    %c0_10 = arith.constant 0 : index
    %27 = vector.load %arg5[%c0_9, %c0_10] : memref<16x32xbf16, #tpu.memory_space<vmem>>, vector<16x32xbf16>
    tpu.vector_store %arg5[%c0_9, %c0_10], %26 {strides = array<i32>} : memref<16x32xbf16, #tpu.memory_space<vmem>>, vector<16x32xbf16>,
    %c0_11 = arith.constant 0 : index
    %c0_12 = arith.constant 0 : index
    %28 = vector.load %arg3[%c0_11, %c0_12] : memref<32x32xbf16, #tpu.memory_space<vmem>>, vector<32x32xbf16>
    %cst_13 = arith.constant dense<0.000000e+00> : vector<16x32xf32>
    %29 = tpu.matmul %26, %28, %cst_13 {dimension_numbers = #tpu.dot_dimension_numbers<[1], [0], [0], [1], [0, 0, 1, 1], [], []>} : vector<16x32xbf16>, vector<32x32xbf16>, vector<16x32xf32> -> vector<16x32xf32>
    %c0_14 = arith.constant 0 : index
    %c0_15 = arith.constant 0 : index
    %30 = vector.load %arg4[%c0_14, %c0_15] : memref<1x32xf32, #tpu.memory_space<vmem>>, vector<1x32xf32>
    %31 = vector.broadcast %30 : vector<1x32xf32> to vector<16x32xf32>
    %32 = arith.addf %29, %31 : vector<16x32xf32>
    %33 = arith.truncf %32 : vector<16x32xf32> to vector<16x32xbf16>
    %c0_16 = arith.constant 0 : index
    %c0_17 = arith.constant 0 : index
    %34 = vector.load %arg6[%c0_16, %c0_17] : memref<16x32xbf16, #tpu.memory_space<vmem>>, vector<16x32xbf16>
    tpu.vector_store %arg6[%c0_16, %c0_17], %33 {strides = array<i32>} : memref<16x32xbf16, #tpu.memory_space<vmem>>, vector<16x32xbf16>,
    return
  }
}

module attributes {stable_mosaic.version = 11 : i64} {
  func.func @_enc_layer_kernel(%arg0: i32, %arg1: memref<1x8x32xbf16, #tpu.memory_space<vmem>>, %arg2: memref<1x8x1xf32, #tpu.memory_space<vmem>>, %arg3: memref<3x32x64xbf16, #tpu.memory_space<vmem>>, %arg4: memref<1x64xf32, #tpu.memory_space<vmem>>, %arg5: memref<1x8x32xbf16, #tpu.memory_space<vmem>>) attributes {dimension_semantics = [#tpu.dimension_semantics<parallel>], iteration_bounds = array<i64: 2>, scalar_prefetch = 0 : i64, scratch_operands = 0 : i64, tpu.core_type = #tpu.core_type<tc>, window_params = [{transform_indices = @transform_0, window_bounds = array<i64: 1, 8, 32>}, {transform_indices = @transform_1, window_bounds = array<i64: 1, 8, 1>}, {pipeline_mode = #tpu.pipeline_mode<synchronous>, transform_indices = @transform_2, window_bounds = array<i64: 3, 32, 64>}, {pipeline_mode = #tpu.pipeline_mode<synchronous>, transform_indices = @transform_3, window_bounds = array<i64: 1, 64>}, {transform_indices = @transform_4, window_bounds = array<i64: 1, 8, 32>}]} {
    %c0 = arith.constant 0 : index
    %c0_0 = arith.constant 0 : index
    %c0_1 = arith.constant 0 : index
    %0 = vector.load %arg1[%c0, %c0_0, %c0_1] : memref<1x8x32xbf16, #tpu.memory_space<vmem>>, vector<1x8x32xbf16>
    %1 = vector.shape_cast %0 : vector<1x8x32xbf16> to vector<8x32xbf16>
    %c0_2 = arith.constant 0 : index
    %c0_3 = arith.constant 0 : index
    %c0_4 = arith.constant 0 : index
    %2 = vector.load %arg2[%c0_2, %c0_3, %c0_4] : memref<1x8x1xf32, #tpu.memory_space<vmem>>, vector<1x8x1xf32>
    %3 = vector.shape_cast %2 : vector<1x8x1xf32> to vector<8x1xf32>
    %cst = arith.constant 5.000000e-01 : f32
    %4 = vector.broadcast %cst : f32 to vector<8x1xf32>
    %5 = arith.cmpf ogt, %3, %4 : vector<8x1xf32>
    %cst_5 = arith.constant 0.000000e+00 : bf16
    %6 = vector.broadcast %cst_5 : bf16 to vector<8x32xbf16>
    %7 = vector.shape_cast %5 : vector<8x1xi1> to vector<8x1xi1>
    %8 = vector.broadcast %7 : vector<8x1xi1> to vector<8x32xi1>
    %9 = arith.select %8, %6, %1 : vector<8x32xi1>, vector<8x32xbf16>
    %10 = tpu.iota {dimensions = array<i32: 0>} : vector<8x8xi32>
    %11 = tpu.iota {dimensions = array<i32: 1>} : vector<8x8xi32>
    %cst_6 = arith.constant 0.000000e+00 : f32
    %12 = vector.broadcast %cst_6 : f32 to vector<8x64xf32>
    %c0_7 = arith.constant 0 : index
    %c0_8 = arith.constant 0 : index
    %13 = vector.load %arg4[%c0_7, %c0_8] : memref<1x64xf32, #tpu.memory_space<vmem>>, vector<1x64xf32>
    %14 = vector.broadcast %13 : vector<1x64xf32> to vector<8x64xf32>
    %15 = arith.addf %12, %14 : vector<8x64xf32>
    %c-1_i32 = arith.constant -1 : i32
    %16 = vector.broadcast %c-1_i32 : i32 to vector<8x8xi32>
    %17 = arith.addi %10, %16 : vector<8x8xi32>
    %18 = arith.cmpi eq, %11, %17 : vector<8x8xi32>
    %19 = arith.extui %18 : vector<8x8xi1> to vector<8x8xi32>
    %20 = arith.sitofp %19 : vector<8x8xi32> to vector<8x8xf32>
    %21 = arith.truncf %20 : vector<8x8xf32> to vector<8x8xbf16>
    %cst_9 = arith.constant dense<0.000000e+00> : vector<8x32xf32>
    %22 = tpu.matmul %21, %9, %cst_9 {dimension_numbers = #tpu.dot_dimension_numbers<[1], [0], [0], [1], [0, 0, 1, 1], [], []>} : vector<8x8xbf16>, vector<8x32xbf16>, vector<8x32xf32> -> vector<8x32xf32>
    %23 = arith.truncf %22 : vector<8x32xf32> to vector<8x32xbf16>
    %c0_10 = arith.constant 0 : index
    %c0_11 = arith.constant 0 : index
    %c0_12 = arith.constant 0 : index
    %24 = vector.load %arg3[%c0_10, %c0_11, %c0_12] : memref<3x32x64xbf16, #tpu.memory_space<vmem>>, vector<1x32x64xbf16>
    %25 = vector.shape_cast %24 : vector<1x32x64xbf16> to vector<32x64xbf16>
    %cst_13 = arith.constant dense<0.000000e+00> : vector<8x64xf32>
    %26 = tpu.matmul %23, %25, %cst_13 {dimension_numbers = #tpu.dot_dimension_numbers<[1], [0], [0], [1], [0, 0, 1, 1], [], []>} : vector<8x32xbf16>, vector<32x64xbf16>, vector<8x64xf32> -> vector<8x64xf32>
    %27 = arith.addf %15, %26 : vector<8x64xf32>
    %c1 = arith.constant 1 : index
    %c0_14 = arith.constant 0 : index
    %c0_15 = arith.constant 0 : index
    %28 = vector.load %arg3[%c1, %c0_14, %c0_15] : memref<3x32x64xbf16, #tpu.memory_space<vmem>>, vector<1x32x64xbf16>
    %29 = vector.shape_cast %28 : vector<1x32x64xbf16> to vector<32x64xbf16>
    %cst_16 = arith.constant dense<0.000000e+00> : vector<8x64xf32>
    %30 = tpu.matmul %9, %29, %cst_16 {dimension_numbers = #tpu.dot_dimension_numbers<[1], [0], [0], [1], [0, 0, 1, 1], [], []>} : vector<8x32xbf16>, vector<32x64xbf16>, vector<8x64xf32> -> vector<8x64xf32>
    %31 = arith.addf %27, %30 : vector<8x64xf32>
    %c1_i32 = arith.constant 1 : i32
    %32 = vector.broadcast %c1_i32 : i32 to vector<8x8xi32>
    %33 = arith.addi %10, %32 : vector<8x8xi32>
    %34 = arith.cmpi eq, %11, %33 : vector<8x8xi32>
    %35 = arith.extui %34 : vector<8x8xi1> to vector<8x8xi32>
    %36 = arith.sitofp %35 : vector<8x8xi32> to vector<8x8xf32>
    %37 = arith.truncf %36 : vector<8x8xf32> to vector<8x8xbf16>
    %cst_17 = arith.constant dense<0.000000e+00> : vector<8x32xf32>
    %38 = tpu.matmul %37, %9, %cst_17 {dimension_numbers = #tpu.dot_dimension_numbers<[1], [0], [0], [1], [0, 0, 1, 1], [], []>} : vector<8x8xbf16>, vector<8x32xbf16>, vector<8x32xf32> -> vector<8x32xf32>
    %39 = arith.truncf %38 : vector<8x32xf32> to vector<8x32xbf16>
    %c2 = arith.constant 2 : index
    %c0_18 = arith.constant 0 : index
    %c0_19 = arith.constant 0 : index
    %40 = vector.load %arg3[%c2, %c0_18, %c0_19] : memref<3x32x64xbf16, #tpu.memory_space<vmem>>, vector<1x32x64xbf16>
    %41 = vector.shape_cast %40 : vector<1x32x64xbf16> to vector<32x64xbf16>
    %cst_20 = arith.constant dense<0.000000e+00> : vector<8x64xf32>
    %42 = tpu.matmul %39, %41, %cst_20 {dimension_numbers = #tpu.dot_dimension_numbers<[1], [0], [0], [1], [0, 0, 1, 1], [], []>} : vector<8x32xbf16>, vector<32x64xbf16>, vector<8x64xf32> -> vector<8x64xf32>
    %43 = arith.addf %31, %42 : vector<8x64xf32>
    %44 = vector.extract_strided_slice %43 {offsets = [0, 0], sizes = [8, 32], strides = [1, 1]} : vector<8x64xf32> to vector<8x32xf32>
    %45 = vector.extract_strided_slice %43 {offsets = [0, 32], sizes = [8, 32], strides = [1, 1]} : vector<8x64xf32> to vector<8x32xf32>
    %46 = arith.negf %45 : vector<8x32xf32>
    %47 = math.exp %46 : vector<8x32xf32>
    %cst_21 = arith.constant 1.000000e+00 : f32
    %48 = vector.broadcast %cst_21 : f32 to vector<8x32xf32>
    %49 = arith.addf %48, %47 : vector<8x32xf32>
    %50 = arith.divf %48, %49 : vector<8x32xf32>
    %51 = arith.mulf %44, %50 : vector<8x32xf32>
    %52 = arith.truncf %51 : vector<8x32xf32> to vector<8x32xbf16>
    %c0_22 = arith.constant 0 : index
    %c0_23 = arith.constant 0 : index
    %c0_24 = arith.constant 0 : index
    %53 = vector.load %arg5[%c0_22, %c0_23, %c0_24] : memref<1x8x32xbf16, #tpu.memory_space<vmem>>, vector<1x8x32xbf16>
    %54 = vector.shape_cast %53 : vector<1x8x32xbf16> to vector<8x32xbf16>
    %55 = vector.shape_cast %52 : vector<8x32xbf16> to vector<1x8x32xbf16>
    tpu.vector_store %arg5[%c0_22, %c0_23, %c0_24], %55 {strides = array<i32>} : memref<1x8x32xbf16, #tpu.memory_space<vmem>>, vector<1x8x32xbf16>,
    return
  }
  func.func @transform_0(%arg0: i32) -> (i32, i32, i32) {
    %c0_i32 = arith.constant 0 : i32
    %c0_i32_0 = arith.constant 0 : i32
    %c0_i32_1 = arith.constant 0 : i32
    return %arg0, %c0_i32, %c0_i32_0 : i32, i32, i32
  }
  func.func @transform_1(%arg0: i32) -> (i32, i32, i32) {
    %c0_i32 = arith.constant 0 : i32
    %c0_i32_0 = arith.constant 0 : i32
    %c0_i32_1 = arith.constant 0 : i32
    return %arg0, %c0_i32, %c0_i32_0 : i32, i32, i32
  }
  func.func @transform_2(%arg0: i32) -> (i32, i32, i32) {
    %c0_i32 = arith.constant 0 : i32
    %c0_i32_0 = arith.constant 0 : i32
    %c0_i32_1 = arith.constant 0 : i32
    %c0_i32_2 = arith.constant 0 : i32
    return %c0_i32, %c0_i32_0, %c0_i32_1 : i32, i32, i32
  }
  func.func @transform_3(%arg0: i32) -> (i32, i32) {
    %c0_i32 = arith.constant 0 : i32
    %c0_i32_0 = arith.constant 0 : i32
    %c0_i32_1 = arith.constant 0 : i32
    return %c0_i32, %c0_i32_0 : i32, i32
  }
  func.func @transform_4(%arg0: i32) -> (i32, i32, i32) {
    %c0_i32 = arith.constant 0 : i32
    %c0_i32_0 = arith.constant 0 : i32
    %c0_i32_1 = arith.constant 0 : i32
    return %arg0, %c0_i32, %c0_i32_0 : i32, i32, i32
  }
}

module attributes {stable_mosaic.version = 11 : i64} {
  func.func @_enc_tail_kernel(%arg0: memref<16x32xbf16, #tpu.memory_space<vmem>>, %arg1: memref<16x32xbf16, #tpu.memory_space<vmem>>, %arg2: memref<16x1xf32, #tpu.memory_space<vmem>>, %arg3: memref<32x32xbf16, #tpu.memory_space<vmem>>, %arg4: memref<1x32xf32, #tpu.memory_space<vmem>>, %arg5: memref<16x32xbf16, #tpu.memory_space<vmem>>, %arg6: memref<16x32xbf16, #tpu.memory_space<vmem>>) attributes {dimension_semantics = [], scalar_prefetch = 0 : i64, scratch_operands = 0 : i64, tpu.core_type = #tpu.core_type<tc>} {
    %c0 = arith.constant 0 : index
    %c0_0 = arith.constant 0 : index
    %0 = vector.load %arg0[%c0, %c0_0] : memref<16x32xbf16, #tpu.memory_space<vmem>>, vector<16x32xbf16>
    %c0_1 = arith.constant 0 : index
    %c0_2 = arith.constant 0 : index
    %1 = vector.load %arg3[%c0_1, %c0_2] : memref<32x32xbf16, #tpu.memory_space<vmem>>, vector<32x32xbf16>
    %cst = arith.constant dense<0.000000e+00> : vector<16x32xf32>
    %2 = tpu.matmul %0, %1, %cst {dimension_numbers = #tpu.dot_dimension_numbers<[1], [0], [0], [1], [0, 0, 1, 1], [], []>} : vector<16x32xbf16>, vector<32x32xbf16>, vector<16x32xf32> -> vector<16x32xf32>
    %c0_3 = arith.constant 0 : index
    %c0_4 = arith.constant 0 : index
    %3 = vector.load %arg4[%c0_3, %c0_4] : memref<1x32xf32, #tpu.memory_space<vmem>>, vector<1x32xf32>
    %4 = vector.broadcast %3 : vector<1x32xf32> to vector<16x32xf32>
    %5 = arith.addf %2, %4 : vector<16x32xf32>
    %c0_5 = arith.constant 0 : index
    %c0_6 = arith.constant 0 : index
    %6 = vector.load %arg2[%c0_5, %c0_6] : memref<16x1xf32, #tpu.memory_space<vmem>>, vector<16x1xf32>
    %cst_7 = arith.constant 5.000000e-01 : f32
    %7 = vector.broadcast %cst_7 : f32 to vector<16x1xf32>
    %8 = arith.cmpf ogt, %6, %7 : vector<16x1xf32>
    %cst_8 = arith.constant 0.000000e+00 : f32
    %9 = vector.shape_cast %8 : vector<16x1xi1> to vector<16x1xi1>
    %10 = vector.broadcast %9 : vector<16x1xi1> to vector<16x32xi1>
    %11 = vector.broadcast %cst_8 : f32 to vector<16x32xf32>
    %12 = arith.select %10, %11, %5 : vector<16x32xi1>, vector<16x32xf32>
    %13 = arith.truncf %12 : vector<16x32xf32> to vector<16x32xbf16>
    %c0_9 = arith.constant 0 : index
    %c0_10 = arith.constant 0 : index
    %14 = vector.load %arg5[%c0_9, %c0_10] : memref<16x32xbf16, #tpu.memory_space<vmem>>, vector<16x32xbf16>
    tpu.vector_store %arg5[%c0_9, %c0_10], %13 {strides = array<i32>} : memref<16x32xbf16, #tpu.memory_space<vmem>>, vector<16x32xbf16>,
    %c0_11 = arith.constant 0 : index
    %c0_12 = arith.constant 0 : index
    %15 = vector.load %arg1[%c0_11, %c0_12] : memref<16x32xbf16, #tpu.memory_space<vmem>>, vector<16x32xbf16>
    %16 = arith.extf %15 : vector<16x32xbf16> to vector<16x32xf32>
    %17 = arith.addf %12, %16 : vector<16x32xf32>
    %cst_13 = arith.constant 0.707106769 : f32
    %18 = vector.broadcast %cst_13 : f32 to vector<16x32xf32>
    %19 = arith.mulf %17, %18 : vector<16x32xf32>
    %20 = arith.truncf %19 : vector<16x32xf32> to vector<16x32xbf16>
    %c0_14 = arith.constant 0 : index
    %c0_15 = arith.constant 0 : index
    %21 = vector.load %arg6[%c0_14, %c0_15] : memref<16x32xbf16, #tpu.memory_space<vmem>>, vector<16x32xbf16>
    tpu.vector_store %arg6[%c0_14, %c0_15], %20 {strides = array<i32>} : memref<16x32xbf16, #tpu.memory_space<vmem>>, vector<16x32xbf16>,
    return
  }
}

module attributes {stable_mosaic.version = 11 : i64} {
  func.func @_enc_layer_kernel(%arg0: i32, %arg1: memref<1x8x32xbf16, #tpu.memory_space<vmem>>, %arg2: memref<1x8x1xf32, #tpu.memory_space<vmem>>, %arg3: memref<3x32x64xbf16, #tpu.memory_space<vmem>>, %arg4: memref<1x64xf32, #tpu.memory_space<vmem>>, %arg5: memref<1x1x8xf32, #tpu.memory_space<vmem>>, %arg6: memref<32x32xbf16, #tpu.memory_space<vmem>>, %arg7: memref<1x32xf32, #tpu.memory_space<vmem>>, %arg8: memref<32x32xbf16, #tpu.memory_space<vmem>>, %arg9: memref<1x32xf32, #tpu.memory_space<vmem>>, %arg10: memref<1x8x32xbf16, #tpu.memory_space<vmem>>) attributes {dimension_semantics = [#tpu.dimension_semantics<parallel>], iteration_bounds = array<i64: 2>, scalar_prefetch = 0 : i64, scratch_operands = 0 : i64, tpu.core_type = #tpu.core_type<tc>, window_params = [{transform_indices = @transform_0, window_bounds = array<i64: 1, 8, 32>}, {transform_indices = @transform_1, window_bounds = array<i64: 1, 8, 1>}, {pipeline_mode = #tpu.pipeline_mode<synchronous>, transform_indices = @transform_2, window_bounds = array<i64: 3, 32, 64>}, {pipeline_mode = #tpu.pipeline_mode<synchronous>, transform_indices = @transform_3, window_bounds = array<i64: 1, 64>}, {transform_indices = @transform_4, window_bounds = array<i64: 1, 1, 8>}, {pipeline_mode = #tpu.pipeline_mode<synchronous>, transform_indices = @transform_5, window_bounds = array<i64: 32, 32>}, {pipeline_mode = #tpu.pipeline_mode<synchronous>, transform_indices = @transform_6, window_bounds = array<i64: 1, 32>}, {pipeline_mode = #tpu.pipeline_mode<synchronous>, transform_indices = @transform_7, window_bounds = array<i64: 32, 32>}, {pipeline_mode = #tpu.pipeline_mode<synchronous>, transform_indices = @transform_8, window_bounds = array<i64: 1, 32>}, {transform_indices = @transform_9, window_bounds = array<i64: 1, 8, 32>}]} {
    %c0 = arith.constant 0 : index
    %c0_0 = arith.constant 0 : index
    %c0_1 = arith.constant 0 : index
    %0 = vector.load %arg1[%c0, %c0_0, %c0_1] : memref<1x8x32xbf16, #tpu.memory_space<vmem>>, vector<1x8x32xbf16>
    %1 = vector.shape_cast %0 : vector<1x8x32xbf16> to vector<8x32xbf16>
    %c0_2 = arith.constant 0 : index
    %c0_3 = arith.constant 0 : index
    %c0_4 = arith.constant 0 : index
    %2 = vector.load %arg2[%c0_2, %c0_3, %c0_4] : memref<1x8x1xf32, #tpu.memory_space<vmem>>, vector<1x8x1xf32>
    %3 = vector.shape_cast %2 : vector<1x8x1xf32> to vector<8x1xf32>
    %cst = arith.constant 5.000000e-01 : f32
    %4 = vector.broadcast %cst : f32 to vector<8x1xf32>
    %5 = arith.cmpf ogt, %3, %4 : vector<8x1xf32>
    %cst_5 = arith.constant 0.000000e+00 : bf16
    %6 = vector.broadcast %cst_5 : bf16 to vector<8x32xbf16>
    %7 = vector.shape_cast %5 : vector<8x1xi1> to vector<8x1xi1>
    %8 = vector.broadcast %7 : vector<8x1xi1> to vector<8x32xi1>
    %9 = arith.select %8, %6, %1 : vector<8x32xi1>, vector<8x32xbf16>
    %10 = tpu.iota {dimensions = array<i32: 0>} : vector<8x8xi32>
    %11 = tpu.iota {dimensions = array<i32: 1>} : vector<8x8xi32>
    %cst_6 = arith.constant 0.000000e+00 : f32
    %12 = vector.broadcast %cst_6 : f32 to vector<8x64xf32>
    %c0_7 = arith.constant 0 : index
    %c0_8 = arith.constant 0 : index
    %13 = vector.load %arg4[%c0_7, %c0_8] : memref<1x64xf32, #tpu.memory_space<vmem>>, vector<1x64xf32>
    %14 = vector.broadcast %13 : vector<1x64xf32> to vector<8x64xf32>
    %15 = arith.addf %12, %14 : vector<8x64xf32>
    %c-1_i32 = arith.constant -1 : i32
    %16 = vector.broadcast %c-1_i32 : i32 to vector<8x8xi32>
    %17 = arith.addi %10, %16 : vector<8x8xi32>
    %18 = arith.cmpi eq, %11, %17 : vector<8x8xi32>
    %19 = arith.extui %18 : vector<8x8xi1> to vector<8x8xi32>
    %20 = arith.sitofp %19 : vector<8x8xi32> to vector<8x8xf32>
    %21 = arith.truncf %20 : vector<8x8xf32> to vector<8x8xbf16>
    %cst_9 = arith.constant dense<0.000000e+00> : vector<8x32xf32>
    %22 = tpu.matmul %21, %9, %cst_9 {dimension_numbers = #tpu.dot_dimension_numbers<[1], [0], [0], [1], [0, 0, 1, 1], [], []>} : vector<8x8xbf16>, vector<8x32xbf16>, vector<8x32xf32> -> vector<8x32xf32>
    %23 = arith.truncf %22 : vector<8x32xf32> to vector<8x32xbf16>
    %c0_10 = arith.constant 0 : index
    %c0_11 = arith.constant 0 : index
    %c0_12 = arith.constant 0 : index
    %24 = vector.load %arg3[%c0_10, %c0_11, %c0_12] : memref<3x32x64xbf16, #tpu.memory_space<vmem>>, vector<1x32x64xbf16>
    %25 = vector.shape_cast %24 : vector<1x32x64xbf16> to vector<32x64xbf16>
    %cst_13 = arith.constant dense<0.000000e+00> : vector<8x64xf32>
    %26 = tpu.matmul %23, %25, %cst_13 {dimension_numbers = #tpu.dot_dimension_numbers<[1], [0], [0], [1], [0, 0, 1, 1], [], []>} : vector<8x32xbf16>, vector<32x64xbf16>, vector<8x64xf32> -> vector<8x64xf32>
    %27 = arith.addf %15, %26 : vector<8x64xf32>
    %c1 = arith.constant 1 : index
    %c0_14 = arith.constant 0 : index
    %c0_15 = arith.constant 0 : index
    %28 = vector.load %arg3[%c1, %c0_14, %c0_15] : memref<3x32x64xbf16, #tpu.memory_space<vmem>>, vector<1x32x64xbf16>
    %29 = vector.shape_cast %28 : vector<1x32x64xbf16> to vector<32x64xbf16>
    %cst_16 = arith.constant dense<0.000000e+00> : vector<8x64xf32>
    %30 = tpu.matmul %9, %29, %cst_16 {dimension_numbers = #tpu.dot_dimension_numbers<[1], [0], [0], [1], [0, 0, 1, 1], [], []>} : vector<8x32xbf16>, vector<32x64xbf16>, vector<8x64xf32> -> vector<8x64xf32>
    %31 = arith.addf %27, %30 : vector<8x64xf32>
    %c1_i32 = arith.constant 1 : i32
    %32 = vector.broadcast %c1_i32 : i32 to vector<8x8xi32>
    %33 = arith.addi %10, %32 : vector<8x8xi32>
    %34 = arith.cmpi eq, %11, %33 : vector<8x8xi32>
    %35 = arith.extui %34 : vector<8x8xi1> to vector<8x8xi32>
    %36 = arith.sitofp %35 : vector<8x8xi32> to vector<8x8xf32>
    %37 = arith.truncf %36 : vector<8x8xf32> to vector<8x8xbf16>
    %cst_17 = arith.constant dense<0.000000e+00> : vector<8x32xf32>
    %38 = tpu.matmul %37, %9, %cst_17 {dimension_numbers = #tpu.dot_dimension_numbers<[1], [0], [0], [1], [0, 0, 1, 1], [], []>} : vector<8x8xbf16>, vector<8x32xbf16>, vector<8x32xf32> -> vector<8x32xf32>
    %39 = arith.truncf %38 : vector<8x32xf32> to vector<8x32xbf16>
    %c2 = arith.constant 2 : index
    %c0_18 = arith.constant 0 : index
    %c0_19 = arith.constant 0 : index
    %40 = vector.load %arg3[%c2, %c0_18, %c0_19] : memref<3x32x64xbf16, #tpu.memory_space<vmem>>, vector<1x32x64xbf16>
    %41 = vector.shape_cast %40 : vector<1x32x64xbf16> to vector<32x64xbf16>
    %cst_20 = arith.constant dense<0.000000e+00> : vector<8x64xf32>
    %42 = tpu.matmul %39, %41, %cst_20 {dimension_numbers = #tpu.dot_dimension_numbers<[1], [0], [0], [1], [0, 0, 1, 1], [], []>} : vector<8x32xbf16>, vector<32x64xbf16>, vector<8x64xf32> -> vector<8x64xf32>
    %43 = arith.addf %31, %42 : vector<8x64xf32>
    %44 = vector.extract_strided_slice %43 {offsets = [0, 0], sizes = [8, 32], strides = [1, 1]} : vector<8x64xf32> to vector<8x32xf32>
    %45 = vector.extract_strided_slice %43 {offsets = [0, 32], sizes = [8, 32], strides = [1, 1]} : vector<8x64xf32> to vector<8x32xf32>
    %46 = arith.negf %45 : vector<8x32xf32>
    %47 = math.exp %46 : vector<8x32xf32>
    %cst_21 = arith.constant 1.000000e+00 : f32
    %48 = vector.broadcast %cst_21 : f32 to vector<8x32xf32>
    %49 = arith.addf %48, %47 : vector<8x32xf32>
    %50 = arith.divf %48, %49 : vector<8x32xf32>
    %51 = arith.mulf %44, %50 : vector<8x32xf32>
    %c0_22 = arith.constant 0 : index
    %c0_23 = arith.constant 0 : index
    %c0_24 = arith.constant 0 : index
    %52 = vector.load %arg5[%c0_22, %c0_23, %c0_24] : memref<1x1x8xf32, #tpu.memory_space<vmem>>, vector<1x1x8xf32>
    %53 = vector.shape_cast %52 : vector<1x1x8xf32> to vector<1x8xf32>
    %54 = arith.extf %9 : vector<8x32xbf16> to vector<8x32xf32>
    %55 = arith.truncf %51 : vector<8x32xf32> to vector<8x32xbf16>
    %c0_25 = arith.constant 0 : index
    %c0_26 = arith.constant 0 : index
    %56 = vector.load %arg6[%c0_25, %c0_26] : memref<32x32xbf16, #tpu.memory_space<vmem>>, vector<32x32xbf16>
    %cst_27 = arith.constant dense<0.000000e+00> : vector<8x32xf32>
    %57 = tpu.matmul %55, %56, %cst_27 {dimension_numbers = #tpu.dot_dimension_numbers<[1], [0], [0], [1], [0, 0, 1, 1], [], []>} : vector<8x32xbf16>, vector<32x32xbf16>, vector<8x32xf32> -> vector<8x32xf32>
    %c0_28 = arith.constant 0 : index
    %c0_29 = arith.constant 0 : index
    %58 = vector.load %arg7[%c0_28, %c0_29] : memref<1x32xf32, #tpu.memory_space<vmem>>, vector<1x32xf32>
    %59 = vector.broadcast %58 : vector<1x32xf32> to vector<8x32xf32>
    %60 = arith.addf %57, %59 : vector<8x32xf32>
    %61 = arith.addf %60, %54 : vector<8x32xf32>
    %cst_30 = arith.constant 0.707106769 : f32
    %62 = vector.broadcast %cst_30 : f32 to vector<8x32xf32>
    %63 = arith.mulf %61, %62 : vector<8x32xf32>
    %64 = arith.truncf %51 : vector<8x32xf32> to vector<8x32xbf16>
    %65 = arith.truncf %63 : vector<8x32xf32> to vector<8x32xbf16>
    %cst_31 = arith.constant dense<0.000000e+00> : vector<8x8xf32>
    %66 = tpu.matmul %65, %64, %cst_31 {dimension_numbers = #tpu.dot_dimension_numbers<[1], [1], [0], [0], [0, 0, 1, 0], [], []>} : vector<8x32xbf16>, vector<8x32xbf16>, vector<8x8xf32> -> vector<8x8xf32>
    %cst_32 = arith.constant 5.000000e-01 : f32
    %67 = vector.broadcast %cst_32 : f32 to vector<1x8xf32>
    %68 = arith.cmpf ogt, %53, %67 : vector<1x8xf32>
    %cst_33 = arith.constant -1.000000e+30 : f32
    %69 = vector.shape_cast %68 : vector<1x8xi1> to vector<1x8xi1>
    %70 = vector.broadcast %69 : vector<1x8xi1> to vector<8x8xi1>
    %71 = vector.broadcast %cst_33 : f32 to vector<8x8xf32>
    %72 = arith.select %70, %71, %66 : vector<8x8xi1>, vector<8x8xf32>
    %cst_34 = arith.constant dense<0xFF800000> : vector<8xf32>
    %73 = vector.multi_reduction <maximumf>, %72, %cst_34 [1] : vector<8x8xf32> to vector<8xf32>
    %74 = vector.shape_cast %73 : vector<8xf32> to vector<8x1xf32>
    %75 = vector.broadcast %74 : vector<8x1xf32> to vector<8x8xf32>
    %76 = arith.subf %72, %75 : vector<8x8xf32>
    %77 = math.exp %76 : vector<8x8xf32>
    %cst_35 = arith.constant dense<0.000000e+00> : vector<8xf32>
    %78 = vector.multi_reduction <add>, %77, %cst_35 [1] : vector<8x8xf32> to vector<8xf32>
    %79 = vector.shape_cast %78 : vector<8xf32> to vector<8x1xf32>
    %80 = tpu.reciprocal %79 {approx = true} : vector<8x1xf32> -> vector<8x1xf32>
    %81 = vector.broadcast %80 : vector<8x1xf32> to vector<8x8xf32>
    %82 = arith.mulf %77, %81 : vector<8x8xf32>
    %83 = arith.truncf %82 : vector<8x8xf32> to vector<8x8xbf16>
    %cst_36 = arith.constant dense<0.000000e+00> : vector<8x32xf32>
    %84 = tpu.matmul %83, %64, %cst_36 {dimension_numbers = #tpu.dot_dimension_numbers<[1], [0], [0], [1], [0, 0, 1, 1], [], []>} : vector<8x8xbf16>, vector<8x32xbf16>, vector<8x32xf32> -> vector<8x32xf32>
    %cst_37 = arith.constant 2.82842708 : f32
    %85 = vector.broadcast %cst_37 : f32 to vector<8x32xf32>
    %86 = arith.mulf %84, %85 : vector<8x32xf32>
    %87 = arith.truncf %86 : vector<8x32xf32> to vector<8x32xbf16>
    %c0_38 = arith.constant 0 : index
    %c0_39 = arith.constant 0 : index
    %88 = vector.load %arg8[%c0_38, %c0_39] : memref<32x32xbf16, #tpu.memory_space<vmem>>, vector<32x32xbf16>
    %cst_40 = arith.constant dense<0.000000e+00> : vector<8x32xf32>
    %89 = tpu.matmul %87, %88, %cst_40 {dimension_numbers = #tpu.dot_dimension_numbers<[1], [0], [0], [1], [0, 0, 1, 1], [], []>} : vector<8x32xbf16>, vector<32x32xbf16>, vector<8x32xf32> -> vector<8x32xf32>
    %c0_41 = arith.constant 0 : index
    %c0_42 = arith.constant 0 : index
    %90 = vector.load %arg9[%c0_41, %c0_42] : memref<1x32xf32, #tpu.memory_space<vmem>>, vector<1x32xf32>
    %91 = vector.broadcast %90 : vector<1x32xf32> to vector<8x32xf32>
    %92 = arith.addf %89, %91 : vector<8x32xf32>
    %93 = arith.addf %92, %51 : vector<8x32xf32>
    %cst_43 = arith.constant 0.707106769 : f32
    %94 = vector.broadcast %cst_43 : f32 to vector<8x32xf32>
    %95 = arith.mulf %93, %94 : vector<8x32xf32>
    %96 = arith.negf %95 : vector<8x32xf32>
    %97 = math.exp %96 : vector<8x32xf32>
    %cst_44 = arith.constant 1.000000e+00 : f32
    %98 = vector.broadcast %cst_44 : f32 to vector<8x32xf32>
    %99 = arith.addf %98, %97 : vector<8x32xf32>
    %100 = arith.divf %98, %99 : vector<8x32xf32>
    %101 = arith.mulf %51, %100 : vector<8x32xf32>
    %102 = arith.truncf %101 : vector<8x32xf32> to vector<8x32xbf16>
    %c0_45 = arith.constant 0 : index
    %c0_46 = arith.constant 0 : index
    %c0_47 = arith.constant 0 : index
    %103 = vector.load %arg10[%c0_45, %c0_46, %c0_47] : memref<1x8x32xbf16, #tpu.memory_space<vmem>>, vector<1x8x32xbf16>
    %104 = vector.shape_cast %103 : vector<1x8x32xbf16> to vector<8x32xbf16>
    %105 = vector.shape_cast %102 : vector<8x32xbf16> to vector<1x8x32xbf16>
    tpu.vector_store %arg10[%c0_45, %c0_46, %c0_47], %105 {strides = array<i32>} : memref<1x8x32xbf16, #tpu.memory_space<vmem>>, vector<1x8x32xbf16>,
    return
  }
  func.func @transform_0(%arg0: i32) -> (i32, i32, i32) {
    %c0_i32 = arith.constant 0 : i32
    %c0_i32_0 = arith.constant 0 : i32
    %c0_i32_1 = arith.constant 0 : i32
    return %arg0, %c0_i32, %c0_i32_0 : i32, i32, i32
  }
  func.func @transform_1(%arg0: i32) -> (i32, i32, i32) {
    %c0_i32 = arith.constant 0 : i32
    %c0_i32_0 = arith.constant 0 : i32
    %c0_i32_1 = arith.constant 0 : i32
    return %arg0, %c0_i32, %c0_i32_0 : i32, i32, i32
  }
  func.func @transform_2(%arg0: i32) -> (i32, i32, i32) {
    %c0_i32 = arith.constant 0 : i32
    %c0_i32_0 = arith.constant 0 : i32
    %c0_i32_1 = arith.constant 0 : i32
    %c0_i32_2 = arith.constant 0 : i32
    return %c0_i32, %c0_i32_0, %c0_i32_1 : i32, i32, i32
  }
  func.func @transform_3(%arg0: i32) -> (i32, i32) {
    %c0_i32 = arith.constant 0 : i32
    %c0_i32_0 = arith.constant 0 : i32
    %c0_i32_1 = arith.constant 0 : i32
    return %c0_i32, %c0_i32_0 : i32, i32
  }
  func.func @transform_4(%arg0: i32) -> (i32, i32, i32) {
    %c0_i32 = arith.constant 0 : i32
    %c0_i32_0 = arith.constant 0 : i32
    %c0_i32_1 = arith.constant 0 : i32
    return %arg0, %c0_i32, %c0_i32_0 : i32, i32, i32
  }
  func.func @transform_5(%arg0: i32) -> (i32, i32) {
    %c0_i32 = arith.constant 0 : i32
    %c0_i32_0 = arith.constant 0 : i32
    %c0_i32_1 = arith.constant 0 : i32
    return %c0_i32, %c0_i32_0 : i32, i32
  }
  func.func @transform_6(%arg0: i32) -> (i32, i32) {
    %c0_i32 = arith.constant 0 : i32
    %c0_i32_0 = arith.constant 0 : i32
    %c0_i32_1 = arith.constant 0 : i32
    return %c0_i32, %c0_i32_0 : i32, i32
  }
  func.func @transform_7(%arg0: i32) -> (i32, i32) {
    %c0_i32 = arith.constant 0 : i32
    %c0_i32_0 = arith.constant 0 : i32
    %c0_i32_1 = arith.constant 0 : i32
    return %c0_i32, %c0_i32_0 : i32, i32
  }
  func.func @transform_8(%arg0: i32) -> (i32, i32) {
    %c0_i32 = arith.constant 0 : i32
    %c0_i32_0 = arith.constant 0 : i32
    %c0_i32_1 = arith.constant 0 : i32
    return %c0_i32, %c0_i32_0 : i32, i32
  }
  func.func @transform_9(%arg0: i32) -> (i32, i32, i32) {
    %c0_i32 = arith.constant 0 : i32
    %c0_i32_0 = arith.constant 0 : i32
    %c0_i32_1 = arith.constant 0 : i32
    return %arg0, %c0_i32, %c0_i32_0 : i32, i32, i32
  }
}

module attributes {stable_mosaic.version = 11 : i64} {
  func.func @_dec_layer_kernel(%arg0: i32, %arg1: memref<1x8x16xbf16, #tpu.memory_space<vmem>>, %arg2: memref<1x8x32xbf16, #tpu.memory_space<vmem>>, %arg3: memref<1x16x32xbf16, #tpu.memory_space<vmem>>, %arg4: memref<1x16x32xbf16, #tpu.memory_space<vmem>>, %arg5: memref<1x1x16xf32, #tpu.memory_space<vmem>>, %arg6: memref<3x16x32xbf16, #tpu.memory_space<vmem>>, %arg7: memref<1x32xf32, #tpu.memory_space<vmem>>, %arg8: memref<16x32xbf16, #tpu.memory_space<vmem>>, %arg9: memref<1x32xf32, #tpu.memory_space<vmem>>, %arg10: memref<32x16xbf16, #tpu.memory_space<vmem>>, %arg11: memref<1x16xf32, #tpu.memory_space<vmem>>, %arg12: memref<1x8x16xbf16, #tpu.memory_space<vmem>>, %arg13: memref<1x8x16xf32, #tpu.memory_space<vmem>>) attributes {dimension_semantics = [#tpu.dimension_semantics<parallel>], iteration_bounds = array<i64: 2>, scalar_prefetch = 0 : i64, scratch_operands = 0 : i64, tpu.core_type = #tpu.core_type<tc>, window_params = [{transform_indices = @transform_0, window_bounds = array<i64: 1, 8, 16>}, {transform_indices = @transform_1, window_bounds = array<i64: 1, 8, 32>}, {transform_indices = @transform_2, window_bounds = array<i64: 1, 16, 32>}, {transform_indices = @transform_3, window_bounds = array<i64: 1, 16, 32>}, {transform_indices = @transform_4, window_bounds = array<i64: 1, 1, 16>}, {pipeline_mode = #tpu.pipeline_mode<synchronous>, transform_indices = @transform_5, window_bounds = array<i64: 3, 16, 32>}, {pipeline_mode = #tpu.pipeline_mode<synchronous>, transform_indices = @transform_6, window_bounds = array<i64: 1, 32>}, {pipeline_mode = #tpu.pipeline_mode<synchronous>, transform_indices = @transform_7, window_bounds = array<i64: 16, 32>}, {pipeline_mode = #tpu.pipeline_mode<synchronous>, transform_indices = @transform_8, window_bounds = array<i64: 1, 32>}, {pipeline_mode = #tpu.pipeline_mode<synchronous>, transform_indices = @transform_9, window_bounds = array<i64: 32, 16>}, {pipeline_mode = #tpu.pipeline_mode<synchronous>, transform_indices = @transform_10, window_bounds = array<i64: 1, 16>}, {transform_indices = @transform_11, window_bounds = array<i64: 1, 8, 16>}, {transform_indices = @transform_12, window_bounds = array<i64: 1, 8, 16>}]} {
    %c0 = arith.constant 0 : index
    %c0_0 = arith.constant 0 : index
    %c0_1 = arith.constant 0 : index
    %0 = vector.load %arg1[%c0, %c0_0, %c0_1] : memref<1x8x16xbf16, #tpu.memory_space<vmem>>, vector<1x8x16xbf16>
    %1 = vector.shape_cast %0 : vector<1x8x16xbf16> to vector<8x16xbf16>
    %2 = tpu.iota {dimensions = array<i32: 0>} : vector<8x8xi32>
    %3 = tpu.iota {dimensions = array<i32: 1>} : vector<8x8xi32>
    %cst = arith.constant 0.000000e+00 : f32
    %4 = vector.broadcast %cst : f32 to vector<8x32xf32>
    %c0_2 = arith.constant 0 : index
    %c0_3 = arith.constant 0 : index
    %5 = vector.load %arg7[%c0_2, %c0_3] : memref<1x32xf32, #tpu.memory_space<vmem>>, vector<1x32xf32>
    %6 = vector.broadcast %5 : vector<1x32xf32> to vector<8x32xf32>
    %7 = arith.addf %4, %6 : vector<8x32xf32>
    %c-2_i32 = arith.constant -2 : i32
    %8 = vector.broadcast %c-2_i32 : i32 to vector<8x8xi32>
    %9 = arith.addi %2, %8 : vector<8x8xi32>
    %10 = arith.cmpi eq, %3, %9 : vector<8x8xi32>
    %11 = arith.extui %10 : vector<8x8xi1> to vector<8x8xi32>
    %12 = arith.sitofp %11 : vector<8x8xi32> to vector<8x8xf32>
    %13 = arith.truncf %12 : vector<8x8xf32> to vector<8x8xbf16>
    %cst_4 = arith.constant dense<0.000000e+00> : vector<8x16xf32>
    %14 = tpu.matmul %13, %1, %cst_4 {dimension_numbers = #tpu.dot_dimension_numbers<[1], [0], [0], [1], [0, 0, 1, 1], [], []>} : vector<8x8xbf16>, vector<8x16xbf16>, vector<8x16xf32> -> vector<8x16xf32>
    %15 = arith.truncf %14 : vector<8x16xf32> to vector<8x16xbf16>
    %c0_5 = arith.constant 0 : index
    %c0_6 = arith.constant 0 : index
    %c0_7 = arith.constant 0 : index
    %16 = vector.load %arg6[%c0_5, %c0_6, %c0_7] : memref<3x16x32xbf16, #tpu.memory_space<vmem>>, vector<1x16x32xbf16>
    %17 = vector.shape_cast %16 : vector<1x16x32xbf16> to vector<16x32xbf16>
    %cst_8 = arith.constant dense<0.000000e+00> : vector<8x32xf32>
    %18 = tpu.matmul %15, %17, %cst_8 {dimension_numbers = #tpu.dot_dimension_numbers<[1], [0], [0], [1], [0, 0, 1, 1], [], []>} : vector<8x16xbf16>, vector<16x32xbf16>, vector<8x32xf32> -> vector<8x32xf32>
    %19 = arith.addf %7, %18 : vector<8x32xf32>
    %c-1_i32 = arith.constant -1 : i32
    %20 = vector.broadcast %c-1_i32 : i32 to vector<8x8xi32>
    %21 = arith.addi %2, %20 : vector<8x8xi32>
    %22 = arith.cmpi eq, %3, %21 : vector<8x8xi32>
    %23 = arith.extui %22 : vector<8x8xi1> to vector<8x8xi32>
    %24 = arith.sitofp %23 : vector<8x8xi32> to vector<8x8xf32>
    %25 = arith.truncf %24 : vector<8x8xf32> to vector<8x8xbf16>
    %cst_9 = arith.constant dense<0.000000e+00> : vector<8x16xf32>
    %26 = tpu.matmul %25, %1, %cst_9 {dimension_numbers = #tpu.dot_dimension_numbers<[1], [0], [0], [1], [0, 0, 1, 1], [], []>} : vector<8x8xbf16>, vector<8x16xbf16>, vector<8x16xf32> -> vector<8x16xf32>
    %27 = arith.truncf %26 : vector<8x16xf32> to vector<8x16xbf16>
    %c1 = arith.constant 1 : index
    %c0_10 = arith.constant 0 : index
    %c0_11 = arith.constant 0 : index
    %28 = vector.load %arg6[%c1, %c0_10, %c0_11] : memref<3x16x32xbf16, #tpu.memory_space<vmem>>, vector<1x16x32xbf16>
    %29 = vector.shape_cast %28 : vector<1x16x32xbf16> to vector<16x32xbf16>
    %cst_12 = arith.constant dense<0.000000e+00> : vector<8x32xf32>
    %30 = tpu.matmul %27, %29, %cst_12 {dimension_numbers = #tpu.dot_dimension_numbers<[1], [0], [0], [1], [0, 0, 1, 1], [], []>} : vector<8x16xbf16>, vector<16x32xbf16>, vector<8x32xf32> -> vector<8x32xf32>
    %31 = arith.addf %19, %30 : vector<8x32xf32>
    %c2 = arith.constant 2 : index
    %c0_13 = arith.constant 0 : index
    %c0_14 = arith.constant 0 : index
    %32 = vector.load %arg6[%c2, %c0_13, %c0_14] : memref<3x16x32xbf16, #tpu.memory_space<vmem>>, vector<1x16x32xbf16>
    %33 = vector.shape_cast %32 : vector<1x16x32xbf16> to vector<16x32xbf16>
    %cst_15 = arith.constant dense<0.000000e+00> : vector<8x32xf32>
    %34 = tpu.matmul %1, %33, %cst_15 {dimension_numbers = #tpu.dot_dimension_numbers<[1], [0], [0], [1], [0, 0, 1, 1], [], []>} : vector<8x16xbf16>, vector<16x32xbf16>, vector<8x32xf32> -> vector<8x32xf32>
    %35 = arith.addf %31, %34 : vector<8x32xf32>
    %36 = vector.extract_strided_slice %35 {offsets = [0, 0], sizes = [8, 16], strides = [1, 1]} : vector<8x32xf32> to vector<8x16xf32>
    %37 = vector.extract_strided_slice %35 {offsets = [0, 16], sizes = [8, 16], strides = [1, 1]} : vector<8x32xf32> to vector<8x16xf32>
    %38 = arith.negf %37 : vector<8x16xf32>
    %39 = math.exp %38 : vector<8x16xf32>
    %cst_16 = arith.constant 1.000000e+00 : f32
    %40 = vector.broadcast %cst_16 : f32 to vector<8x16xf32>
    %41 = arith.addf %40, %39 : vector<8x16xf32>
    %42 = arith.divf %40, %41 : vector<8x16xf32>
    %43 = arith.mulf %36, %42 : vector<8x16xf32>
    %c0_17 = arith.constant 0 : index
    %c0_18 = arith.constant 0 : index
    %c0_19 = arith.constant 0 : index
    %44 = vector.load %arg2[%c0_17, %c0_18, %c0_19] : memref<1x8x32xbf16, #tpu.memory_space<vmem>>, vector<1x8x32xbf16>
    %45 = vector.shape_cast %44 : vector<1x8x32xbf16> to vector<8x32xbf16>
    %46 = arith.extf %45 : vector<8x32xbf16> to vector<8x32xf32>
    %47 = arith.truncf %43 : vector<8x16xf32> to vector<8x16xbf16>
    %c0_20 = arith.constant 0 : index
    %c0_21 = arith.constant 0 : index
    %48 = vector.load %arg8[%c0_20, %c0_21] : memref<16x32xbf16, #tpu.memory_space<vmem>>, vector<16x32xbf16>
    %cst_22 = arith.constant dense<0.000000e+00> : vector<8x32xf32>
    %49 = tpu.matmul %47, %48, %cst_22 {dimension_numbers = #tpu.dot_dimension_numbers<[1], [0], [0], [1], [0, 0, 1, 1], [], []>} : vector<8x16xbf16>, vector<16x32xbf16>, vector<8x32xf32> -> vector<8x32xf32>
    %c0_23 = arith.constant 0 : index
    %c0_24 = arith.constant 0 : index
    %50 = vector.load %arg9[%c0_23, %c0_24] : memref<1x32xf32, #tpu.memory_space<vmem>>, vector<1x32xf32>
    %51 = vector.broadcast %50 : vector<1x32xf32> to vector<8x32xf32>
    %52 = arith.addf %49, %51 : vector<8x32xf32>
    %53 = arith.addf %52, %46 : vector<8x32xf32>
    %cst_25 = arith.constant 0.707106769 : f32
    %54 = vector.broadcast %cst_25 : f32 to vector<8x32xf32>
    %55 = arith.mulf %53, %54 : vector<8x32xf32>
    %c0_26 = arith.constant 0 : index
    %c0_27 = arith.constant 0 : index
    %c0_28 = arith.constant 0 : index
    %56 = vector.load %arg3[%c0_26, %c0_27, %c0_28] : memref<1x16x32xbf16, #tpu.memory_space<vmem>>, vector<1x16x32xbf16>
    %57 = vector.shape_cast %56 : vector<1x16x32xbf16> to vector<16x32xbf16>
    %58 = arith.truncf %55 : vector<8x32xf32> to vector<8x32xbf16>
    %cst_29 = arith.constant dense<0.000000e+00> : vector<8x16xf32>
    %59 = tpu.matmul %58, %57, %cst_29 {dimension_numbers = #tpu.dot_dimension_numbers<[1], [1], [0], [0], [0, 0, 1, 0], [], []>} : vector<8x32xbf16>, vector<16x32xbf16>, vector<8x16xf32> -> vector<8x16xf32>
    %c0_30 = arith.constant 0 : index
    %c0_31 = arith.constant 0 : index
    %c0_32 = arith.constant 0 : index
    %60 = vector.load %arg5[%c0_30, %c0_31, %c0_32] : memref<1x1x16xf32, #tpu.memory_space<vmem>>, vector<1x1x16xf32>
    %61 = vector.shape_cast %60 : vector<1x1x16xf32> to vector<1x16xf32>
    %cst_33 = arith.constant 5.000000e-01 : f32
    %62 = vector.broadcast %cst_33 : f32 to vector<1x16xf32>
    %63 = arith.cmpf ogt, %61, %62 : vector<1x16xf32>
    %cst_34 = arith.constant -1.000000e+30 : f32
    %64 = vector.shape_cast %63 : vector<1x16xi1> to vector<1x16xi1>
    %65 = vector.broadcast %64 : vector<1x16xi1> to vector<8x16xi1>
    %66 = vector.broadcast %cst_34 : f32 to vector<8x16xf32>
    %67 = arith.select %65, %66, %59 : vector<8x16xi1>, vector<8x16xf32>
    %cst_35 = arith.constant dense<0xFF800000> : vector<8xf32>
    %68 = vector.multi_reduction <maximumf>, %67, %cst_35 [1] : vector<8x16xf32> to vector<8xf32>
    %69 = vector.shape_cast %68 : vector<8xf32> to vector<8x1xf32>
    %70 = vector.broadcast %69 : vector<8x1xf32> to vector<8x16xf32>
    %71 = arith.subf %67, %70 : vector<8x16xf32>
    %72 = math.exp %71 : vector<8x16xf32>
    %cst_36 = arith.constant dense<0.000000e+00> : vector<8xf32>
    %73 = vector.multi_reduction <add>, %72, %cst_36 [1] : vector<8x16xf32> to vector<8xf32>
    %74 = vector.shape_cast %73 : vector<8xf32> to vector<8x1xf32>
    %75 = tpu.reciprocal %74 {approx = true} : vector<8x1xf32> -> vector<8x1xf32>
    %76 = vector.broadcast %75 : vector<8x1xf32> to vector<8x16xf32>
    %77 = arith.mulf %72, %76 : vector<8x16xf32>
    %c0_37 = arith.constant 0 : index
    %c0_38 = arith.constant 0 : index
    %c0_39 = arith.constant 0 : index
    %78 = vector.load %arg13[%c0_37, %c0_38, %c0_39] : memref<1x8x16xf32, #tpu.memory_space<vmem>>, vector<1x8x16xf32>
    %79 = vector.shape_cast %78 : vector<1x8x16xf32> to vector<8x16xf32>
    %80 = vector.shape_cast %77 : vector<8x16xf32> to vector<1x8x16xf32>
    tpu.vector_store %arg13[%c0_37, %c0_38, %c0_39], %80 {strides = array<i32>} : memref<1x8x16xf32, #tpu.memory_space<vmem>>, vector<1x8x16xf32>,
    %81 = arith.truncf %77 : vector<8x16xf32> to vector<8x16xbf16>
    %c0_40 = arith.constant 0 : index
    %c0_41 = arith.constant 0 : index
    %c0_42 = arith.constant 0 : index
    %82 = vector.load %arg4[%c0_40, %c0_41, %c0_42] : memref<1x16x32xbf16, #tpu.memory_space<vmem>>, vector<1x16x32xbf16>
    %83 = vector.shape_cast %82 : vector<1x16x32xbf16> to vector<16x32xbf16>
    %cst_43 = arith.constant dense<0.000000e+00> : vector<8x32xf32>
    %84 = tpu.matmul %81, %83, %cst_43 {dimension_numbers = #tpu.dot_dimension_numbers<[1], [0], [0], [1], [0, 0, 1, 1], [], []>} : vector<8x16xbf16>, vector<16x32xbf16>, vector<8x32xf32> -> vector<8x32xf32>
    %cst_44 = arith.constant 4.000000e+00 : f32
    %85 = vector.broadcast %cst_44 : f32 to vector<8x32xf32>
    %86 = arith.mulf %84, %85 : vector<8x32xf32>
    %87 = arith.truncf %86 : vector<8x32xf32> to vector<8x32xbf16>
    %c0_45 = arith.constant 0 : index
    %c0_46 = arith.constant 0 : index
    %88 = vector.load %arg10[%c0_45, %c0_46] : memref<32x16xbf16, #tpu.memory_space<vmem>>, vector<32x16xbf16>
    %cst_47 = arith.constant dense<0.000000e+00> : vector<8x16xf32>
    %89 = tpu.matmul %87, %88, %cst_47 {dimension_numbers = #tpu.dot_dimension_numbers<[1], [0], [0], [1], [0, 0, 1, 1], [], []>} : vector<8x32xbf16>, vector<32x16xbf16>, vector<8x16xf32> -> vector<8x16xf32>
    %c0_48 = arith.constant 0 : index
    %c0_49 = arith.constant 0 : index
    %90 = vector.load %arg11[%c0_48, %c0_49] : memref<1x16xf32, #tpu.memory_space<vmem>>, vector<1x16xf32>
    %91 = vector.broadcast %90 : vector<1x16xf32> to vector<8x16xf32>
    %92 = arith.addf %89, %91 : vector<8x16xf32>
    %93 = arith.addf %92, %43 : vector<8x16xf32>
    %cst_50 = arith.constant 0.707106769 : f32
    %94 = vector.broadcast %cst_50 : f32 to vector<8x16xf32>
    %95 = arith.mulf %93, %94 : vector<8x16xf32>
    %96 = arith.truncf %95 : vector<8x16xf32> to vector<8x16xbf16>
    %c0_51 = arith.constant 0 : index
    %c0_52 = arith.constant 0 : index
    %c0_53 = arith.constant 0 : index
    %97 = vector.load %arg12[%c0_51, %c0_52, %c0_53] : memref<1x8x16xbf16, #tpu.memory_space<vmem>>, vector<1x8x16xbf16>
    %98 = vector.shape_cast %97 : vector<1x8x16xbf16> to vector<8x16xbf16>
    %99 = vector.shape_cast %96 : vector<8x16xbf16> to vector<1x8x16xbf16>
    tpu.vector_store %arg12[%c0_51, %c0_52, %c0_53], %99 {strides = array<i32>} : memref<1x8x16xbf16, #tpu.memory_space<vmem>>, vector<1x8x16xbf16>,
    return
  }
  func.func @transform_0(%arg0: i32) -> (i32, i32, i32) {
    %c0_i32 = arith.constant 0 : i32
    %c0_i32_0 = arith.constant 0 : i32
    %c0_i32_1 = arith.constant 0 : i32
    return %arg0, %c0_i32, %c0_i32_0 : i32, i32, i32
  }
  func.func @transform_1(%arg0: i32) -> (i32, i32, i32) {
    %c0_i32 = arith.constant 0 : i32
    %c0_i32_0 = arith.constant 0 : i32
    %c0_i32_1 = arith.constant 0 : i32
    return %arg0, %c0_i32, %c0_i32_0 : i32, i32, i32
  }
  func.func @transform_2(%arg0: i32) -> (i32, i32, i32) {
    %c0_i32 = arith.constant 0 : i32
    %c0_i32_0 = arith.constant 0 : i32
    %c0_i32_1 = arith.constant 0 : i32
    return %arg0, %c0_i32, %c0_i32_0 : i32, i32, i32
  }
  func.func @transform_3(%arg0: i32) -> (i32, i32, i32) {
    %c0_i32 = arith.constant 0 : i32
    %c0_i32_0 = arith.constant 0 : i32
    %c0_i32_1 = arith.constant 0 : i32
    return %arg0, %c0_i32, %c0_i32_0 : i32, i32, i32
  }
  func.func @transform_4(%arg0: i32) -> (i32, i32, i32) {
    %c0_i32 = arith.constant 0 : i32
    %c0_i32_0 = arith.constant 0 : i32
    %c0_i32_1 = arith.constant 0 : i32
    return %arg0, %c0_i32, %c0_i32_0 : i32, i32, i32
  }
  func.func @transform_5(%arg0: i32) -> (i32, i32, i32) {
    %c0_i32 = arith.constant 0 : i32
    %c0_i32_0 = arith.constant 0 : i32
    %c0_i32_1 = arith.constant 0 : i32
    %c0_i32_2 = arith.constant 0 : i32
    return %c0_i32, %c0_i32_0, %c0_i32_1 : i32, i32, i32
  }
  func.func @transform_6(%arg0: i32) -> (i32, i32) {
    %c0_i32 = arith.constant 0 : i32
    %c0_i32_0 = arith.constant 0 : i32
    %c0_i32_1 = arith.constant 0 : i32
    return %c0_i32, %c0_i32_0 : i32, i32
  }
  func.func @transform_7(%arg0: i32) -> (i32, i32) {
    %c0_i32 = arith.constant 0 : i32
    %c0_i32_0 = arith.constant 0 : i32
    %c0_i32_1 = arith.constant 0 : i32
    return %c0_i32, %c0_i32_0 : i32, i32
  }
  func.func @transform_8(%arg0: i32) -> (i32, i32) {
    %c0_i32 = arith.constant 0 : i32
    %c0_i32_0 = arith.constant 0 : i32
    %c0_i32_1 = arith.constant 0 : i32
    return %c0_i32, %c0_i32_0 : i32, i32
  }
  func.func @transform_9(%arg0: i32) -> (i32, i32) {
    %c0_i32 = arith.constant 0 : i32
    %c0_i32_0 = arith.constant 0 : i32
    %c0_i32_1 = arith.constant 0 : i32
    return %c0_i32, %c0_i32_0 : i32, i32
  }
  func.func @transform_10(%arg0: i32) -> (i32, i32) {
    %c0_i32 = arith.constant 0 : i32
    %c0_i32_0 = arith.constant 0 : i32
    %c0_i32_1 = arith.constant 0 : i32
    return %c0_i32, %c0_i32_0 : i32, i32
  }
  func.func @transform_11(%arg0: i32) -> (i32, i32, i32) {
    %c0_i32 = arith.constant 0 : i32
    %c0_i32_0 = arith.constant 0 : i32
    %c0_i32_1 = arith.constant 0 : i32
    return %arg0, %c0_i32, %c0_i32_0 : i32, i32, i32
  }
  func.func @transform_12(%arg0: i32) -> (i32, i32, i32) {
    %c0_i32 = arith.constant 0 : i32
    %c0_i32_0 = arith.constant 0 : i32
    %c0_i32_1 = arith.constant 0 : i32
    return %arg0, %c0_i32, %c0_i32_0 : i32, i32, i32
  }
}

module attributes {stable_mosaic.version = 11 : i64} {
  func.func @_final_kernel(%arg0: i32, %arg1: memref<1x8x16xbf16, #tpu.memory_space<vmem>>, %arg2: memref<1x8x32xbf16, #tpu.memory_space<vmem>>, %arg3: memref<1x8x16xf32, #tpu.memory_space<vmem>>, %arg4: memref<1x16x1xi32, #tpu.memory_space<vmem>>, %arg5: memref<16x50xbf16, #tpu.memory_space<vmem>>, %arg6: memref<1x50xf32, #tpu.memory_space<vmem>>, %arg7: memref<1x16xf32, #tpu.memory_space<vmem>>, %arg8: memref<1x32xf32, #tpu.memory_space<vmem>>, %arg9: memref<1x1xf32, #tpu.memory_space<vmem>>, %arg10: memref<1x8x50xf32, #tpu.memory_space<vmem>>) attributes {dimension_semantics = [#tpu.dimension_semantics<parallel>], iteration_bounds = array<i64: 2>, scalar_prefetch = 0 : i64, scratch_operands = 0 : i64, tpu.core_type = #tpu.core_type<tc>, window_params = [{transform_indices = @transform_0, window_bounds = array<i64: 1, 8, 16>}, {transform_indices = @transform_1, window_bounds = array<i64: 1, 8, 32>}, {transform_indices = @transform_2, window_bounds = array<i64: 1, 8, 16>}, {transform_indices = @transform_3, window_bounds = array<i64: 1, 16, 1>}, {pipeline_mode = #tpu.pipeline_mode<synchronous>, transform_indices = @transform_4, window_bounds = array<i64: 16, 50>}, {pipeline_mode = #tpu.pipeline_mode<synchronous>, transform_indices = @transform_5, window_bounds = array<i64: 1, 50>}, {pipeline_mode = #tpu.pipeline_mode<synchronous>, transform_indices = @transform_6, window_bounds = array<i64: 1, 16>}, {pipeline_mode = #tpu.pipeline_mode<synchronous>, transform_indices = @transform_7, window_bounds = array<i64: 1, 32>}, {pipeline_mode = #tpu.pipeline_mode<synchronous>, transform_indices = @transform_8, window_bounds = array<i64: 1, 1>}, {transform_indices = @transform_9, window_bounds = array<i64: 1, 8, 50>}]} {
    %c0 = arith.constant 0 : index
    %c0_0 = arith.constant 0 : index
    %c0_1 = arith.constant 0 : index
    %0 = vector.load %arg1[%c0, %c0_0, %c0_1] : memref<1x8x16xbf16, #tpu.memory_space<vmem>>, vector<1x8x16xbf16>
    %1 = vector.shape_cast %0 : vector<1x8x16xbf16> to vector<8x16xbf16>
    %c0_2 = arith.constant 0 : index
    %c0_3 = arith.constant 0 : index
    %c0_4 = arith.constant 0 : index
    %2 = vector.load %arg2[%c0_2, %c0_3, %c0_4] : memref<1x8x32xbf16, #tpu.memory_space<vmem>>, vector<1x8x32xbf16>
    %3 = vector.shape_cast %2 : vector<1x8x32xbf16> to vector<8x32xbf16>
    %c0_5 = arith.constant 0 : index
    %c0_6 = arith.constant 0 : index
    %c0_7 = arith.constant 0 : index
    %4 = vector.load %arg3[%c0_5, %c0_6, %c0_7] : memref<1x8x16xf32, #tpu.memory_space<vmem>>, vector<1x8x16xf32>
    %5 = vector.shape_cast %4 : vector<1x8x16xf32> to vector<8x16xf32>
    %c0_8 = arith.constant 0 : index
    %c0_9 = arith.constant 0 : index
    %c0_10 = arith.constant 0 : index
    %6 = vector.load %arg4[%c0_8, %c0_9, %c0_10] : memref<1x16x1xi32, #tpu.memory_space<vmem>>, vector<1x16x1xi32>
    %7 = vector.shape_cast %6 : vector<1x16x1xi32> to vector<16x1xi32>
    %c0_11 = arith.constant 0 : index
    %c0_12 = arith.constant 0 : index
    %8 = vector.load %arg5[%c0_11, %c0_12] : memref<16x50xbf16, #tpu.memory_space<vmem>>, vector<16x50xbf16>
    %cst = arith.constant dense<0.000000e+00> : vector<8x50xf32>
    %9 = tpu.matmul %1, %8, %cst {dimension_numbers = #tpu.dot_dimension_numbers<[1], [0], [0], [1], [0, 0, 1, 1], [], []>} : vector<8x16xbf16>, vector<16x50xbf16>, vector<8x50xf32> -> vector<8x50xf32>
    %c0_13 = arith.constant 0 : index
    %c0_14 = arith.constant 0 : index
    %10 = vector.load %arg6[%c0_13, %c0_14] : memref<1x50xf32, #tpu.memory_space<vmem>>, vector<1x50xf32>
    %11 = vector.broadcast %10 : vector<1x50xf32> to vector<8x50xf32>
    %12 = arith.addf %9, %11 : vector<8x50xf32>
    %13 = arith.extf %1 : vector<8x16xbf16> to vector<8x16xf32>
    %c0_15 = arith.constant 0 : index
    %c0_16 = arith.constant 0 : index
    %14 = vector.load %arg7[%c0_15, %c0_16] : memref<1x16xf32, #tpu.memory_space<vmem>>, vector<1x16xf32>
    %15 = vector.broadcast %14 : vector<1x16xf32> to vector<8x16xf32>
    %16 = arith.mulf %13, %15 : vector<8x16xf32>
    %cst_17 = arith.constant dense<0.000000e+00> : vector<8xf32>
    %17 = vector.multi_reduction <add>, %16, %cst_17 [1] : vector<8x16xf32> to vector<8xf32>
    %18 = vector.shape_cast %17 : vector<8xf32> to vector<8x1xf32>
    %19 = arith.extf %3 : vector<8x32xbf16> to vector<8x32xf32>
    %c0_18 = arith.constant 0 : index
    %c0_19 = arith.constant 0 : index
    %20 = vector.load %arg8[%c0_18, %c0_19] : memref<1x32xf32, #tpu.memory_space<vmem>>, vector<1x32xf32>
    %21 = vector.broadcast %20 : vector<1x32xf32> to vector<8x32xf32>
    %22 = arith.mulf %19, %21 : vector<8x32xf32>
    %cst_20 = arith.constant dense<0.000000e+00> : vector<8xf32>
    %23 = vector.multi_reduction <add>, %22, %cst_20 [1] : vector<8x32xf32> to vector<8xf32>
    %24 = vector.shape_cast %23 : vector<8xf32> to vector<8x1xf32>
    %25 = arith.addf %18, %24 : vector<8x1xf32>
    %c0_21 = arith.constant 0 : index
    %c0_22 = arith.constant 0 : index
    %26 = vector.load %arg9[%c0_21, %c0_22] : memref<1x1xf32, #tpu.memory_space<vmem>>, vector<1x1xf32>
    %27 = vector.broadcast %26 : vector<1x1xf32> to vector<8x1xf32>
    %28 = arith.addf %25, %27 : vector<8x1xf32>
    %29 = arith.negf %28 : vector<8x1xf32>
    %30 = math.exp %29 : vector<8x1xf32>
    %cst_23 = arith.constant 1.000000e+00 : f32
    %31 = vector.broadcast %cst_23 : f32 to vector<8x1xf32>
    %32 = arith.addf %31, %30 : vector<8x1xf32>
    %33 = arith.divf %31, %32 : vector<8x1xf32>
    %cst_24 = arith.constant dense<0xFF800000> : vector<8xf32>
    %34 = vector.multi_reduction <maximumf>, %12, %cst_24 [1] : vector<8x50xf32> to vector<8xf32>
    %35 = vector.shape_cast %34 : vector<8xf32> to vector<8x1xf32>
    %36 = vector.broadcast %35 : vector<8x1xf32> to vector<8x50xf32>
    %37 = arith.subf %12, %36 : vector<8x50xf32>
    %38 = math.exp %37 : vector<8x50xf32>
    %cst_25 = arith.constant dense<0.000000e+00> : vector<8xf32>
    %39 = vector.multi_reduction <add>, %38, %cst_25 [1] : vector<8x50xf32> to vector<8xf32>
    %40 = vector.shape_cast %39 : vector<8xf32> to vector<8x1xf32>
    %41 = tpu.reciprocal %40 {approx = true} : vector<8x1xf32> -> vector<8x1xf32>
    %42 = vector.broadcast %41 : vector<8x1xf32> to vector<8x50xf32>
    %43 = arith.mulf %38, %42 : vector<8x50xf32>
    %44 = vector.broadcast %33 : vector<8x1xf32> to vector<8x50xf32>
    %45 = arith.mulf %43, %44 : vector<8x50xf32>
    %46 = tpu.iota {dimensions = array<i32: 1>} : vector<16x50xi32>
    %47 = vector.broadcast %7 : vector<16x1xi32> to vector<16x50xi32>
    %48 = arith.cmpi eq, %46, %47 : vector<16x50xi32>
    %49 = arith.extui %48 : vector<16x50xi1> to vector<16x50xi32>
    %50 = arith.sitofp %49 : vector<16x50xi32> to vector<16x50xf32>
    %51 = arith.truncf %50 : vector<16x50xf32> to vector<16x50xbf16>
    %cst_26 = arith.constant 1.000000e+00 : f32
    %52 = vector.broadcast %cst_26 : f32 to vector<8x1xf32>
    %53 = arith.subf %52, %33 : vector<8x1xf32>
    %54 = vector.broadcast %53 : vector<8x1xf32> to vector<8x16xf32>
    %55 = arith.mulf %5, %54 : vector<8x16xf32>
    %56 = arith.truncf %55 : vector<8x16xf32> to vector<8x16xbf16>
    %cst_27 = arith.constant dense<0.000000e+00> : vector<8x50xf32>
    %57 = tpu.matmul %56, %51, %cst_27 {dimension_numbers = #tpu.dot_dimension_numbers<[1], [0], [0], [1], [0, 0, 1, 1], [], []>} : vector<8x16xbf16>, vector<16x50xbf16>, vector<8x50xf32> -> vector<8x50xf32>
    %58 = arith.addf %45, %57 : vector<8x50xf32>
    %cst_28 = arith.constant 1.000000e-32 : f32
    %59 = vector.broadcast %cst_28 : f32 to vector<8x50xf32>
    %60 = arith.addf %58, %59 : vector<8x50xf32>
    %61 = math.log %60 : vector<8x50xf32>
    %c0_29 = arith.constant 0 : index
    %c0_30 = arith.constant 0 : index
    %c0_31 = arith.constant 0 : index
    %62 = vector.load %arg10[%c0_29, %c0_30, %c0_31] : memref<1x8x50xf32, #tpu.memory_space<vmem>>, vector<1x8x50xf32>
    %63 = vector.shape_cast %62 : vector<1x8x50xf32> to vector<8x50xf32>
    %64 = vector.shape_cast %61 : vector<8x50xf32> to vector<1x8x50xf32>
    tpu.vector_store %arg10[%c0_29, %c0_30, %c0_31], %64 {strides = array<i32>} : memref<1x8x50xf32, #tpu.memory_space<vmem>>, vector<1x8x50xf32>,
    return
  }
  func.func @transform_0(%arg0: i32) -> (i32, i32, i32) {
    %c0_i32 = arith.constant 0 : i32
    %c0_i32_0 = arith.constant 0 : i32
    %c0_i32_1 = arith.constant 0 : i32
    return %arg0, %c0_i32, %c0_i32_0 : i32, i32, i32
  }
  func.func @transform_1(%arg0: i32) -> (i32, i32, i32) {
    %c0_i32 = arith.constant 0 : i32
    %c0_i32_0 = arith.constant 0 : i32
    %c0_i32_1 = arith.constant 0 : i32
    return %arg0, %c0_i32, %c0_i32_0 : i32, i32, i32
  }
  func.func @transform_2(%arg0: i32) -> (i32, i32, i32) {
    %c0_i32 = arith.constant 0 : i32
    %c0_i32_0 = arith.constant 0 : i32
    %c0_i32_1 = arith.constant 0 : i32
    return %arg0, %c0_i32, %c0_i32_0 : i32, i32, i32
  }
  func.func @transform_3(%arg0: i32) -> (i32, i32, i32) {
    %c0_i32 = arith.constant 0 : i32
    %c0_i32_0 = arith.constant 0 : i32
    %c0_i32_1 = arith.constant 0 : i32
    return %arg0, %c0_i32, %c0_i32_0 : i32, i32, i32
  }
  func.func @transform_4(%arg0: i32) -> (i32, i32) {
    %c0_i32 = arith.constant 0 : i32
    %c0_i32_0 = arith.constant 0 : i32
    %c0_i32_1 = arith.constant 0 : i32
    return %c0_i32, %c0_i32_0 : i32, i32
  }
  func.func @transform_5(%arg0: i32) -> (i32, i32) {
    %c0_i32 = arith.constant 0 : i32
    %c0_i32_0 = arith.constant 0 : i32
    %c0_i32_1 = arith.constant 0 : i32
    return %c0_i32, %c0_i32_0 : i32, i32
  }
  func.func @transform_6(%arg0: i32) -> (i32, i32) {
    %c0_i32 = arith.constant 0 : i32
    %c0_i32_0 = arith.constant 0 : i32
    %c0_i32_1 = arith.constant 0 : i32
    return %c0_i32, %c0_i32_0 : i32, i32
  }
  func.func @transform_7(%arg0: i32) -> (i32, i32) {
    %c0_i32 = arith.constant 0 : i32
    %c0_i32_0 = arith.constant 0 : i32
    %c0_i32_1 = arith.constant 0 : i32
    return %c0_i32, %c0_i32_0 : i32, i32
  }
  func.func @transform_8(%arg0: i32) -> (i32, i32) {
    %c0_i32 = arith.constant 0 : i32
    %c0_i32_0 = arith.constant 0 : i32
    %c0_i32_1 = arith.constant 0 : i32
    return %c0_i32, %c0_i32_0 : i32, i32
  }
  func.func @transform_9(%arg0: i32) -> (i32, i32, i32) {
    %c0_i32 = arith.constant 0 : i32
    %c0_i32_0 = arith.constant 0 : i32
    %c0_i32_1 = arith.constant 0 : i32
    return %arg0, %c0_i32, %c0_i32_0 : i32, i32, i32
  }
}

module attributes {stable_mosaic.version = 11 : i64} {
  func.func @_lm_head_kernel(%arg0: memref<32x32xbf16, #tpu.memory_space<vmem>>, %arg1: memref<32x50xbf16, #tpu.memory_space<vmem>>, %arg2: memref<1x50xf32, #tpu.memory_space<vmem>>, %arg3: memref<32x50xf32, #tpu.memory_space<vmem>>) attributes {dimension_semantics = [], scalar_prefetch = 0 : i64, scratch_operands = 0 : i64, tpu.core_type = #tpu.core_type<tc>} {
    %c0 = arith.constant 0 : index
    %c0_0 = arith.constant 0 : index
    %0 = vector.load %arg0[%c0, %c0_0] : memref<32x32xbf16, #tpu.memory_space<vmem>>, vector<32x32xbf16>
    %c0_1 = arith.constant 0 : index
    %c0_2 = arith.constant 0 : index
    %1 = vector.load %arg1[%c0_1, %c0_2] : memref<32x50xbf16, #tpu.memory_space<vmem>>, vector<32x50xbf16>
    %cst = arith.constant dense<0.000000e+00> : vector<32x50xf32>
    %2 = tpu.matmul %0, %1, %cst {dimension_numbers = #tpu.dot_dimension_numbers<[1], [0], [0], [1], [0, 0, 1, 1], [], []>} : vector<32x32xbf16>, vector<32x50xbf16>, vector<32x50xf32> -> vector<32x50xf32>
    %c0_3 = arith.constant 0 : index
    %c0_4 = arith.constant 0 : index
    %3 = vector.load %arg2[%c0_3, %c0_4] : memref<1x50xf32, #tpu.memory_space<vmem>>, vector<1x50xf32>
    %4 = vector.broadcast %3 : vector<1x50xf32> to vector<32x50xf32>
    %5 = arith.addf %2, %4 : vector<32x50xf32>
    %cst_5 = arith.constant dense<0xFF800000> : vector<32xf32>
    %6 = vector.multi_reduction <maximumf>, %5, %cst_5 [1] : vector<32x50xf32> to vector<32xf32>
    %7 = vector.shape_cast %6 : vector<32xf32> to vector<32x1xf32>
    %8 = vector.broadcast %7 : vector<32x1xf32> to vector<32x50xf32>
    %9 = arith.subf %5, %8 : vector<32x50xf32>
    %10 = math.exp %9 : vector<32x50xf32>
    %cst_6 = arith.constant dense<0.000000e+00> : vector<32xf32>
    %11 = vector.multi_reduction <add>, %10, %cst_6 [1] : vector<32x50xf32> to vector<32xf32>
    %12 = vector.shape_cast %11 : vector<32xf32> to vector<32x1xf32>
    %13 = math.log %12 : vector<32x1xf32>
    %14 = arith.addf %13, %7 : vector<32x1xf32>
    %15 = vector.broadcast %14 : vector<32x1xf32> to vector<32x50xf32>
    %16 = arith.subf %5, %15 : vector<32x50xf32>
    %c0_7 = arith.constant 0 : index
    %c0_8 = arith.constant 0 : index
    %17 = vector.load %arg3[%c0_7, %c0_8] : memref<32x50xf32, #tpu.memory_space<vmem>>, vector<32x50xf32>
    tpu.vector_store %arg3[%c0_7, %c0_8], %16 {strides = array<i32>} : memref<32x50xf32, #tpu.memory_space<vmem>>, vector<32x50xf32>,
    return
  }
}

</mosaic_0001>

<bundles_post_ra>
// kernel: gpt_conut_forward.13
= control target key start
LH: loop header
LB: loop body
LE: loop exit
PB: predicated region body
PF: predicated region fallthrough
CT: control target
= control target key end

     0   :  { %vm27_vm0 = vcmask 261120   ;;  %v176_v5 = vmov 32.0   ;;  %vm93_vm7 = vcmask 257024   ;;  %vm140_vm9 = vcmask 125952   ;;  %s247_s0 = inlined_call_operand.vmem [shape: bf16[16,32], index: 0, kind: input, shape index: {}]   ;;  %s248_s1 = inlined_call_operand.vmem [shape: f32[1,32], index: 1, kind: input, shape index: {}]   ;;  %s249_s2 = inlined_call_operand.vmem [shape: f32[1,32], index: 2, kind: input, shape index: {}]   ;;  %s250_s4 = inlined_call_operand.vmem [shape: f32[1,16], index: 4, kind: input, shape index: {}]   ;;  %s251_s3 = inlined_call_operand.vmem [shape: bf16[32,16], index: 3, kind: input, shape index: {}]   ;;  %s252_s5 = inlined_call_operand.vmem [shape: bf16[16,32], index: 5, kind: output, shape index: {0}]   ;;  %s253_s6 = inlined_call_operand.vmem [shape: bf16[16,16], index: 6, kind: output, shape index: {1}]  }
   0x1   :  { %v163_v0 = vld [vmem:[%s247_s0] sm:$0xff]   ;;  %170 = vrcp.f32 %v176_v5  ;;  %v161_v22 = vld [vmem:[%s251_s3 + $0x8] sm:$0xff] }
   0x2   :  { %v164_v1 = vunpack.c.l.bf16 %v163_v0  ;;  %v165_v3 = vunpack.c.h.bf16 %v163_v0  ;;  %130 = vmatpush.bf16.msra.mxu0 %v161_v22  ;;  %v160_v25 = vld [vmem:[%s251_s3] sm:$0xff] }
   0x3   :  { %v167_v38 = vld [vmem:[%s248_s1] ss:$0 sm:$0xff] }
   0x4   :  { %v28_v2 = vsel %vm27_vm0, %v164_v1, 0.0  ;;  %v31_v4 = vsel %vm27_vm0, %v165_v3, 0.0  ;;  %v168_v42 = vld [vmem:[%s249_s2] ss:$0 sm:$0xff] }
   0x5   :  { %29 = vadd.xlane.f32.xlu0 %v28_v2  ;;  %v169_v57 = vld [vmem:[%s250_s4] ss:$0 sm:$0xff] }
   0x6   :  { %131 = vmatpush.bf16.msra.mxu0 %v160_v25 }
   0x7   :  { %v171_v6 = vpop.eup %170 }
   0x8   :  { %v35_v7 = vmul.f32 32.0, %v171_v6  ;;  %vm39_vm1 = vweird.f32 %v171_v6 }
   0xa   :  { %v36_v8 = vsub.f32 1.0, %v35_v7 }
   0xc   :  { %v37_v9 = vmul.f32 %v171_v6, %v36_v8 }
   0xd   :  { %32 = vadd.xlane.f32.xlu0 %v31_v4 }
   0xe   :  { %v38_v10 = vadd.f32 %v171_v6, %v37_v9 }
  0x10   :  { %v40_v11 = vsel %vm39_vm1, %v171_v6, %v38_v10 }
  0x78   :  { %v30_v12 = vpop.xlane.xlu0 %29 }
  0x79   :  { %v41_v13 = vmul.f32 %v40_v11, %v30_v12 }
  0x7b   :  { %v43_v14 = vsub.f32 %v164_v1, %v41_v13 }
  0x7d   :  { %v45_v15 = vmul.f32 %v43_v14, %v43_v14 }
  0x7f   :  { %v47_v16 = vsel %vm27_vm0, %v45_v15, 0.0 }
  0x80   :  { %48 = vadd.xlane.f32.xlu1 %v47_v16  ;;  %v33_v17 = vpop.xlane.xlu0 %32 }
  0x81   :  { %v42_v18 = vmul.f32 %v40_v11, %v33_v17 }
  0x83   :  { %v44_v19 = vsub.f32 %v165_v3, %v42_v18 }
  0x85   :  { %v46_v20 = vmul.f32 %v44_v19, %v44_v19 }
  0x87   :  { %v50_v21 = vsel %vm27_vm0, %v46_v20, 0.0 }
  0x88   :  { %51 = vadd.xlane.f32.xlu1 %v50_v21 }
  0xf3   :  { %v49_v23 = vpop.xlane.xlu1 %48 }
  0xf4   :  { %v53_v24 = vmul.f32 %v49_v23, %v40_v11 }
  0xf6   :  { %v55_v26 = vadd.f32 1e-05, %v53_v24 }
  0xf8   :  { %172 = vrsqrt.f32 %v55_v26  ;;  %vm63_vm3 = vweird.f32 %v55_v26 }
  0xfb   :  { %v52_v27 = vpop.xlane.xlu1 %51 }
  0xfc   :  { %v54_v28 = vmul.f32 %v52_v27, %v40_v11 }
  0xfe   :  { %v173_v29 = vpop.eup %172  ;;  %v56_v30 = vadd.f32 1e-05, %v54_v28 }
  0xff   :  { %v58_v31 = vmul.f32 %v173_v29, %v55_v26  ;;  %vm64_vm2 = vweird.f32 %v173_v29 }
 0x100   :  { %174 = vrsqrt.f32 %v56_v30  ;;  %vm65_vm4 = vmor %vm63_vm3, %vm64_vm2  ;;  %vm73_vm6 = vweird.f32 %v56_v30 }
 0x101   :  { %v59_v32 = vmul.f32 %v173_v29, %v58_v31 }
 0x103   :  { %v60_v33 = vmul.f32 0.5, %v59_v32 }
 0x105   :  { %v61_v34 = vsub.f32 1.5, %v60_v33 }
 0x106   :  { %v175_v35 = vpop.eup %174 }
 0x107   :  { %v62_v36 = vmul.f32 %v173_v29, %v61_v34  ;;  %v68_v37 = vmul.f32 %v175_v35, %v56_v30  ;;  %vm74_vm5 = vweird.f32 %v175_v35 }
 0x108   :  { %vm75_vm8 = vmor %vm73_vm6, %vm74_vm5 }
 0x109   :  { %v66_v39 = vsel %vm65_vm4, %v173_v29, %v62_v36  ;;  %v69_v40 = vmul.f32 %v175_v35, %v68_v37 }
 0x10a   :  { %v77_v41 = vmul.f32 %v66_v39, %v43_v14 }
 0x10b   :  { %v70_v43 = vmul.f32 0.5, %v69_v40 }
 0x10c   :  { %v83_v44 = vmul.f32 %v167_v38, %v77_v41 }
 0x10d   :  { %v71_v45 = vsub.f32 1.5, %v70_v43 }
 0x10e   :  { %v89_v46 = vadd.f32 %v168_v42, %v83_v44 }
 0x10f   :  { %v72_v47 = vmul.f32 %v175_v35, %v71_v45 }
 0x110   :  { %v91_v48 = vpack.c.bf16 %v89_v46, %v89_v46 }
 0x111   :  { %v76_v49 = vsel %vm75_vm8, %v175_v35, %v72_v47 }
 0x112   :  { %v78_v50 = vmul.f32 %v76_v49, %v44_v19  ;;  %94 = vst.msk [vmem:[%s252_s5] sm:$0xf] %vm93_vm7, %v91_v48  ;;  %v106_v54 = vunpack.c.l.b16 %v91_v48 }
 0x114   :  { %v84_v51 = vmul.f32 %v167_v38, %v78_v50 }
 0x116   :  { %v90_v52 = vadd.f32 %v168_v42, %v84_v51 }
 0x118   :  { %v92_v53 = vpack.c.bf16 %v90_v52, %v90_v52 }
 0x11a   :  { %95 = vst.msk [vmem:[%s252_s5 + $0x4] sm:$0xf] %vm93_vm7, %v92_v53  ;;  %v107_v55 = vunpack.c.l.b16 %v92_v53 }
 0x11c   :  { %v108_v56 = vpack.c.b16 %v107_v55, %v106_v54 }
 0x11e   :  { %159 = vmatmul.msk.bf16.vlgmr.msra.gmra.mxu0 %vm27_vm0, %v108_v56 }
 0x19b   :  { %v133_v58 = vpop.f32.mrf.mxu0 }
 0x19c   :  { %v134_v59 = vadd.f32 %v169_v57, %v133_v58 }
 0x19e   :  { %v138_v60 = vpack.c.bf16 %v134_v59, %v134_v59 }
 0x1a0   :  { %141 = vst.msk [vmem:[%s253_s6] sm:$0xf] %vm140_vm9, %v138_v60 }
 0x1a3   :  { %v135_v61 = vpop.f32.mrf.mxu0 }
 0x1a4   :  { %v136_v62 = vadd.f32 %v169_v57, %v135_v61 }
 0x1a6   :  { %v139_v63 = vpack.c.bf16 %v136_v62, %v136_v62 }
 0x1a8   :  { %142 = vst.msk [vmem:[%s253_s6 + $0x4] sm:$0xf] %vm140_vm9, %v139_v63 }

// kernel: gpt_conut_forward.14
= control target key start
LH: loop header
LB: loop body
LE: loop exit
PB: predicated region body
PF: predicated region fallthrough
CT: control target
= control target key end

     0   :  { %s538_s15 = smov 0   ;;  %s581_s0 = inlined_call_operand.vmem [shape: bf16[2,8,16], index: 0, kind: input, shape index: {}]   ;;  %s582_s1 = inlined_call_operand.vmem [shape: f32[2,8,1], index: 1, kind: input, shape index: {}]   ;;  %s583_s2 = inlined_call_operand.vmem [shape: bf16[3,16,32], index: 2, kind: input, shape index: {}]   ;;  %s584_s3 = inlined_call_operand.vmem [shape: f32[1,32], index: 3, kind: input, shape index: {}]   ;;  %s585_s4 = inlined_call_operand.vmem [shape: bf16[2,8,16], index: 4, kind: output, shape index: {}]  }
   0x1 LB: > { %s448_s16 = sadd.s32 4294967295, %s508_s15   ;;  %p452_p0 = scmp.ge.s32.totalorder %s508_s15, 1  ;;  %s508_s15 = sphi %s538_s15, %s14_s15  }
   0x2   : > { %p170_p1 = scmp.lt.s32.totalorder %s508_s15, 3 }
   0x4   : > { %p171_p2 = pnand %p452_p0, %p170_p1 }
   0x5   : > { %p198_p3 = scmp.lt.s32.totalorder (!%p171_p2), %s448_s16, 1  ;;  %s512_s7 = smov (!%p171_p2), 112  }
   0x6   : > { %174 = sbr.rel (%p171_p2) target bundleno = 549 (0x225), region = 36 }
   0xb   : > { %v510_v0 = vmov 0   ;;  %s587_s16 = smov (!%p198_p3, %s448_s16), 1  ;;  %v483_v3 = vld [vmem:[%s583_s2 + $0x8] sm:$0xff]  ;;  %v221_v4 = vlaneseq  ;;  %vm265_vm3 = vcmask 130048   ;;  %vm239_vm5 = vcmask 1043456   ;;  %v484_v14 = vld [vmem:[%s583_s2 + $0x10] sm:$0xff] }
   0xc   : > { %496 = vset.pattern.permute.xlu0 %v510_v0  ;;  %s454_s17 = sshll.u32 %s587_s16, 3  ;;  %301 = vmatpush.bf16.msra.mxu2 %v483_v3  ;;  %s453_s23 = sshll.u32 %s587_s16, 2  ;;  %v511_v11 = vmov 0.0   ;;  %vm235_vm7 = vcmask 64512   ;;  %v482_v19 = vld [vmem:[%s583_s2] sm:$0xff]  ;;  %vm381_vm12 = vcmask 125952  }
   0xd   : > { %s205_s20 = scalar_lea.vmem %s582_s1, %s454_s17  ;;  %v222_v5 = vshrl.u32 %v221_v4, 7  ;;  %v224_v6 = vand.u32 127, %v221_v4  ;;  %s201_s26 = scalar_lea.vmem %s581_s0, %s453_s23  ;;  %276 = vmatpush.bf16.msra.mxu1 %v482_v19  ;;  %v497_v28 = vld [vmem:[%s584_s3] ss:$0 sm:$0xff] }
   0xe   : > { %v212_v1 = vld [vmem:[%s205_s20] sm:$0xff]  ;;  %s209_s10 = scalar_lea.vmem %s585_s4, %s453_s23 }
   0xf   : > { %vm213_vm0 = vcmp.gt.f32.partialorder %v212_v1, 0.5  ;;  %v230_v7 = vadd.s32 4294967295, %v222_v5  ;;  %v308_v8 = vadd.s32 1, %v222_v5  ;;  %v211_v10 = vld [vmem:[%s201_s26] sm:$0xf] }
  0x10   : > { %v214_v2 = vsel %vm213_vm0, 1, %v510_v0 }
  0x11   : > { %216 = vperm.xlu0 %496, %v214_v2   ;;  %vm231_vm1 = vcmp.eq.s32.totalorder %v224_v6, %v230_v7  ;;  %vm309_vm2 = vcmp.eq.s32.totalorder %v224_v6, %v308_v8 }
  0x12   : > { %v456_v12 = vsel %vm231_vm1, 1.0, %v511_v11  ;;  %v470_v13 = vsel %vm309_vm2, 1.0, %v511_v11 }
  0x13   : > { %v234_v17 = vpack.c.bf16 %v456_v12, %v456_v12  ;;  %v312_v18 = vpack.c.bf16 %v470_v13, %v470_v13 }
  0x83   : > { %v217_v9 = vpop.permute.xlu0 %216 }
  0x84   : > { %vm218_vm4 = vcmp.eq.s32.totalorder %v217_v9, 1 }
  0x85   : > { %vm219_vm6 = vmpackc.low %vm218_vm4, %vm218_vm4 }
  0x86   : > { %v220_v15 = vsel %vm219_vm6, 0, %v211_v10 }
  0x87   : > { %469 = vmatmul.msk.bf16.vlgmr.msra.gmra.mxu2 %vm265_vm3, %v220_v15  ;;  %v241_v16 = vsel %vm239_vm5, %v220_v15, 0 }
  0x88   : > { %250 = vmatpush.bf16.msra.mxu0 %v241_v16  ;;  %323 = vmatpush.bf16.msra.mxu3 %v241_v16 }
  0x8b   : > { %457 = vmatmul.msk.bf16.vlgmr.msra.gmra.mxu0 %vm235_vm7, %v234_v17  ;;  %471 = vmatmul.msk.bf16.vlgmr.msra.gmra.mxu3 %vm235_vm7, %v312_v18 }
  0x8c   : > { %349 = vmatpush.bf16.msrb.mxu0 %v484_v14 }
 0x108   : > { %v252_v20 = vpop.f32.mrf.mxu0 }
 0x109   : > { %v256_v21 = vpack.c.bf16 %v252_v20, %v252_v20 }
 0x10a   : > { %v303_v22 = vpop.f32.mrf.mxu2 }
 0x10b   : > { %462 = vmatmul.msk.bf16.vlgmr.msra.gmra.mxu1 %vm265_vm3, %v256_v21 }
 0x10e   : > { %v325_v23 = vpop.f32.mrf.mxu3 }
 0x10f   : > { %v329_v24 = vpack.c.bf16 %v325_v23, %v325_v23 }
 0x110   : > { %v254_v25 = vpop.f32.mrf.mxu0 }
 0x111   : > { %478 = vmatmul.msk.bf16.vlgmr.msrb.gmra.mxu0 %vm265_vm3, %v329_v24 }
 0x112   : > { %v305_v26 = vpop.f32.mrf.mxu2 }
 0x116   : > { %v327_v27 = vpop.f32.mrf.mxu3 }
 0x188   : > { %v278_v29 = vpop.f32.mrf.mxu1 }
 0x189   : > { %v282_v30 = vadd.f32 %v497_v28, %v278_v29 }
 0x18b   : > { %v307_v31 = vadd.f32 %v303_v22, %v282_v30 }
 0x18e   : > { %v351_v32 = vpop.f32.mrf.mxu0 }
 0x18f   : > { %v355_v33 = vadd.f32 %v351_v32, %v307_v31 }
 0x190   : > { %v280_v34 = vpop.f32.mrf.mxu1 }
 0x191   : > { %v479_v35 = vmul.f32 -1.442695, %v355_v33 }
 0x193   : > { %498 = vpow2.f32 %v479_v35 }
 0x196   : > { %v353_v36 = vpop.f32.mrf.mxu0 }
 0x199   : > { %v499_v37 = vpop.eup %498 }
 0x19a   : > { %v359_v38 = vadd.f32 1.0, %v499_v37 }
 0x19c   : > { %500 = vrcp.f32 %v359_v38  ;;  %v371_v42 = vand.u32 2147483648, %v359_v38  ;;  %v369_v44 = vand.u32 2147483647, %v359_v38  ;;  %vm365_vm9 = vweird.f32 %v359_v38 }
 0x19e   : > { %v372_v46 = vor.u32 1.1754944e-38, %v371_v42  ;;  %vm370_vm11 = vcmp.eq.f32.partialorder %v369_v44, 8.507059e+37 }
 0x1a2   : > { %v501_v39 = vpop.eup %500 }
 0x1a3   : > { %v361_v40 = vmul.f32 %v501_v39, %v359_v38  ;;  %vm366_vm8 = vweird.f32 %v501_v39 }
 0x1a4   : > { %vm367_vm10 = vmor %vm365_vm9, %vm366_vm8 }
 0x1a5   : > { %v362_v41 = vsub.f32 1.0, %v361_v40 }
 0x1a7   : > { %v363_v43 = vmul.f32 %v501_v39, %v362_v41 }
 0x1a9   : > { %v364_v45 = vadd.f32 %v501_v39, %v363_v43 }
 0x1ab   : > { %v368_v47 = vsel %vm367_vm10, %v501_v39, %v364_v45 }
 0x1ac   : > { %v373_v48 = vsel %vm370_vm11, %v372_v46, %v368_v47 }
 0x1ad   : > { %376 = vrot.lane.b32.xlu0 %v373_v48, %s512_s7 }
 0x21f   : > { %v377_v49 = vpop.permute.xlu0 %376 }
 0x220   : > { %v379_v50 = vmul.f32 %v377_v49, %v355_v33 }
 0x222   : > { %v380_v51 = vpack.c.bf16 %v379_v50, %v379_v50 }
 0x224   : > { %382 = vst.msk [vmem:[%s209_s10] sm:$0xf] %vm381_vm12, %v380_v51 }
 0x225 PF: > { %s14_s15 = sadd.s32 1, %s508_s15  }
 0x226   : > { %p11_p4 = scmp.ge.s32.totalorder %s14_s15, 4  }
 0x228   :  { %13 = sbr.rel (!%p11_p4) target bundleno = 1 (0x1), region = 71 }

// kernel: gpt_conut_forward.15
= control target key start
LH: loop header
LB: loop body
LE: loop exit
PB: predicated region body
PF: predicated region fallthrough
CT: control target
= control target key end

     0   :  { %s883_s30 = smov 0   ;;  %s967_s0 = inlined_call_operand.vmem [shape: bf16[2,8,16], index: 0, kind: input, shape index: {}]   ;;  %s968_s1 = inlined_call_operand.vmem [shape: f32[2,8,1], index: 1, kind: input, shape index: {}]   ;;  %s969_s2 = inlined_call_operand.vmem [shape: bf16[3,16,32], index: 2, kind: input, shape index: {}]   ;;  %s970_s3 = inlined_call_operand.vmem [shape: f32[1,32], index: 3, kind: input, shape index: {}]   ;;  %s971_s4 = inlined_call_operand.vmem [shape: f32[2,1,8], index: 4, kind: input, shape index: {}]   ;;  %s972_s5 = inlined_call_operand.vmem [shape: bf16[16,16], index: 5, kind: input, shape index: {}]   ;;  %s973_s6 = inlined_call_operand.vmem [shape: f32[1,16], index: 6, kind: input, shape index: {}]   ;;  %s974_s7 = inlined_call_operand.vmem [shape: bf16[16,16], index: 7, kind: input, shape index: {}]   ;;  %s975_s8 = inlined_call_operand.vmem [shape: f32[1,16], index: 8, kind: input, shape index: {}]   ;;  %s976_s9 = inlined_call_operand.vmem [shape: bf16[2,8,16], index: 9, kind: output, shape index: {}]  }
   0x1 LB: > { %s743_s10 = sadd.s32 4294967295, %s828_s30   ;;  %p747_p0 = scmp.ge.s32.totalorder %s828_s30, 1  ;;  %s828_s30 = sphi %s883_s30, %s19_s30  }
   0x2   : > { %p303_p1 = scmp.lt.s32.totalorder %s828_s30, 3 }
   0x4   : > { %p304_p2 = pnand %p747_p0, %p303_p1 }
   0x5   : > { %p344_p3 = scmp.lt.s32.totalorder (!%p304_p2), %s743_s10, 1  ;;  %s832_s29 = smov (!%p304_p2), 112  }
   0x6   : > { %307 = sbr.rel (%p304_p2) target bundleno = 1372 (0x55c), region = 56 }
   0xb   : > { %v830_v0 = vmov 0   ;;  %s978_s10 = smov (!%p344_p3, %s743_s10), 1  ;;  %v791_v3 = vld [vmem:[%s969_s2 + $0x8] sm:$0xff]  ;;  %v370_v4 = vlaneseq  ;;  %vm414_vm3 = vcmask 130048   ;;  %vm388_vm5 = vcmask 1043456   ;;  %v792_v14 = vld [vmem:[%s969_s2 + $0x10] sm:$0xff] }
   0xc   : > { %806 = vset.pattern.permute.xlu0 %v830_v0  ;;  %s749_s11 = sshll.u32 %s978_s10, 3  ;;  %450 = vmatpush.bf16.msra.mxu2 %v791_v3  ;;  %s748_s17 = sshll.u32 %s978_s10, 2  ;;  %v831_v11 = vmov 0.0   ;;  %vm384_vm7 = vcmask 64512   ;;  %v790_v19 = vld [vmem:[%s969_s2] sm:$0xff] }
   0xd   : > { %s351_s14 = scalar_lea.vmem %s968_s1, %s749_s11  ;;  %v371_v5 = vshrl.u32 %v370_v4, 7  ;;  %v373_v6 = vand.u32 127, %v370_v4  ;;  %s347_s20 = scalar_lea.vmem %s967_s0, %s748_s17  ;;  %425 = vmatpush.bf16.msra.mxu1 %v790_v19  ;;  %v807_v28 = vld [vmem:[%s970_s3] ss:$0 sm:$0xff] }
   0xe   : > { %v361_v1 = vld [vmem:[%s351_s14] sm:$0xff]  ;;  %s354_s15 = scalar_lea.vmem %s971_s4, %s978_s10  ;;  %s358_s23 = scalar_lea.vmem %s976_s9, %s748_s17 }
   0xf   : > { %vm362_vm0 = vcmp.gt.f32.partialorder %v361_v1, 0.5  ;;  %v379_v7 = vadd.s32 4294967295, %v371_v5  ;;  %v457_v8 = vadd.s32 1, %v371_v5  ;;  %v360_v10 = vld [vmem:[%s347_s20] sm:$0xf] }
  0x10   : > { %v363_v2 = vsel %vm362_vm0, 1, %v830_v0  ;;  %v793_v32 = vld [vmem:[%s972_s5] sm:$0xff] }
  0x11   : > { %365 = vperm.xlu0 %806, %v363_v2   ;;  %vm380_vm1 = vcmp.eq.s32.totalorder %v373_v6, %v379_v7  ;;  %vm458_vm2 = vcmp.eq.s32.totalorder %v373_v6, %v457_v8  ;;  %554 = vmatpush.bf16.msrb.mxu1 %v793_v32  ;;  %v808_v55 = vld [vmem:[%s973_s6] ss:$0 sm:$0xff] }
  0x12   : > { %v751_v12 = vsel %vm380_vm1, 1.0, %v831_v11  ;;  %v765_v13 = vsel %vm458_vm2, 1.0, %v831_v11  ;;  %v529_v63 = vld [vmem:[%s354_s15] sm:$0x1]  ;;  %vm667_vm2 = vcmask 125952  }
  0x13   : > { %v383_v17 = vpack.c.bf16 %v751_v12, %v751_v12  ;;  %v461_v18 = vpack.c.bf16 %v765_v13, %v765_v13  ;;  %vm579_vm12 = vcmp.gt.f32.partialorder %v529_v63, 0.5 }
  0x14   : > { %v580_v1 = vsel %vm579_vm12, 1, %v830_v0  ;;  %v794_v0 = vld [vmem:[%s974_s7] sm:$0xff] }
  0x15   : > { %v581_v2 = vperm.slane %v580_v1, 0 }
  0x17   : > { %vm582_vm13 = vcmp.eq.s32.totalorder %v581_v2, 1 }
  0x83   : > { %v366_v9 = vpop.permute.xlu0 %365 }
  0x84   : > { %vm367_vm4 = vcmp.eq.s32.totalorder %v366_v9, 1 }
  0x85   : > { %vm368_vm6 = vmpackc.low %vm367_vm4, %vm367_vm4 }
  0x86   : > { %v911_v15 = vsel %vm368_vm6, 0, %v360_v10 }
  0x87   : > { %764 = vmatmul.msk.bf16.vlgmr.msra.gmra.mxu2 %vm414_vm3, %v911_v15  ;;  %v390_v16 = vsel %vm388_vm5, %v911_v15, 0  ;;  %v530_v57 = vunpack.c.l.bf16 %v911_v15 }
  0x88   : > { %399 = vmatpush.bf16.msra.mxu0 %v390_v16  ;;  %472 = vmatpush.bf16.msra.mxu3 %v390_v16 }
  0x8b   : > { %752 = vmatmul.msk.bf16.vlgmr.msra.gmra.mxu0 %vm384_vm7, %v383_v17  ;;  %766 = vmatmul.msk.bf16.vlgmr.msra.gmra.mxu3 %vm384_vm7, %v461_v18 }
  0x8c   : > { %498 = vmatpush.bf16.msrb.mxu0 %v792_v14 }
  0x90   : > { %638 = vmatpush.bf16.msra.mxu0 %v794_v0 }
 0x108   : > { %v401_v20 = vpop.f32.mrf.mxu0 }
 0x109   : > { %v405_v21 = vpack.c.bf16 %v401_v20, %v401_v20  ;;  %v809_v20 = vld [vmem:[%s975_s8] ss:$0 sm:$0xff] }
 0x10a   : > { %v452_v22 = vpop.f32.mrf.mxu2 }
 0x10b   : > { %757 = vmatmul.msk.bf16.vlgmr.msra.gmra.mxu1 %vm414_vm3, %v405_v21 }
 0x10e   : > { %v474_v23 = vpop.f32.mrf.mxu3 }
 0x10f   : > { %v478_v24 = vpack.c.bf16 %v474_v23, %v474_v23 }
 0x110   : > { %v403_v25 = vpop.f32.mrf.mxu0 }
 0x111   : > { %773 = vmatmul.msk.bf16.vlgmr.msrb.gmra.mxu0 %vm414_vm3, %v478_v24 }
 0x112   : > { %v454_v26 = vpop.f32.mrf.mxu2 }
 0x116   : > { %v476_v27 = vpop.f32.mrf.mxu3 }
 0x188   : > { %v427_v29 = vpop.f32.mrf.mxu1 }
 0x189   : > { %v431_v30 = vadd.f32 %v807_v28, %v427_v29 }
 0x18b   : > { %v456_v31 = vadd.f32 %v452_v22, %v431_v30 }
 0x18e   : > { %v500_v33 = vpop.f32.mrf.mxu0 }
 0x18f   : > { %v504_v34 = vadd.f32 %v500_v33, %v456_v31 }
 0x190   : > { %v429_v35 = vpop.f32.mrf.mxu1 }
 0x191   : > { %v774_v36 = vmul.f32 -1.442695, %v504_v34 }
 0x193   : > { %810 = vpow2.f32 %v774_v36 }
 0x196   : > { %v502_v37 = vpop.f32.mrf.mxu0 }
 0x199   : > { %v811_v38 = vpop.eup %810 }
 0x19a   : > { %v508_v39 = vadd.f32 1.0, %v811_v38 }
 0x19c   : > { %812 = vrcp.f32 %v508_v39  ;;  %v520_v43 = vand.u32 2147483648, %v508_v39  ;;  %v518_v45 = vand.u32 2147483647, %v508_v39  ;;  %vm514_vm9 = vweird.f32 %v508_v39 }
 0x19e   : > { %v521_v47 = vor.u32 1.1754944e-38, %v520_v43  ;;  %vm519_vm11 = vcmp.eq.f32.partialorder %v518_v45, 8.507059e+37 }
 0x1a2   : > { %v813_v40 = vpop.eup %812 }
 0x1a3   : > { %v510_v41 = vmul.f32 %v813_v40, %v508_v39  ;;  %vm515_vm8 = vweird.f32 %v813_v40 }
 0x1a4   : > { %vm516_vm10 = vmor %vm514_vm9, %vm515_vm8 }
 0x1a5   : > { %v511_v42 = vsub.f32 1.0, %v510_v41 }
 0x1a7   : > { %v512_v44 = vmul.f32 %v813_v40, %v511_v42 }
 0x1a9   : > { %v513_v46 = vadd.f32 %v813_v40, %v512_v44 }
 0x1ab   : > { %v517_v48 = vsel %vm516_vm10, %v813_v40, %v513_v46 }
 0x1ac   : > { %v522_v49 = vsel %vm519_vm11, %v521_v47, %v517_v48 }
 0x1ad   : > { %525 = vrot.lane.b32.xlu0 %v522_v49, %s832_s29 }
 0x21f   : > { %v526_v50 = vpop.permute.xlu0 %525 }
 0x220   : > { %v930_v51 = vmul.f32 %v526_v50, %v504_v34 }
 0x222   : > { %v531_v52 = vpack.c.bf16 %v930_v51, %v930_v51 }
 0x224   : > { %779 = vmatmul.msk.bf16.vlgmr.msrb.gmra.mxu1 %vm414_vm3, %v531_v52  ;;  %v545_v53 = vsel %vm414_vm3, %v531_v52, 0  ;;  %v599_v54 = vsel %vm388_vm5, %v531_v52, 0 }
 0x225   : > { %573 = vmatpush.bf16.xpose.msrb.mxu2 %v545_v53  ;;  %608 = vmatpush.bf16.msrb.mxu3 %v599_v54 }
 0x2a1   : > { %v556_v56 = vpop.f32.mrf.mxu1 }
 0x2a2   : > { %v557_v58 = vadd.f32 %v808_v55, %v556_v56 }
 0x2a4   : > { %v560_v59 = vadd.f32 %v557_v58, %v530_v57 }
 0x2a6   : > { %v561_v60 = vmul.f32 0.70710677, %v560_v59 }
 0x2a8   : > { %v562_v61 = vpack.c.bf16 %v561_v60, %v561_v60 }
 0x2a9   : > { %v558_v62 = vpop.f32.mrf.mxu1 }
 0x2aa   : > { %780 = vmatmul.msk.bf16.vlgmr.msrb.gmra.mxu2 %vm414_vm3, %v562_v61 }
 0x32d   : > { %v575_v3 = vpop.f32.mrf.mxu2 }
 0x32e   : > { %v583_v4 = vsel %vm582_vm13, -1e+30, %v575_v3 }
 0x32f   : > { %v584_v5 = vsel %vm384_vm7, %v583_v4, -inf }
 0x330   : > { %585 = vmax.xlane.f32.xlu1 %v584_v5 }
 0x335   : > { %v577_v6 = vpop.f32.mrf.mxu2 }
 0x3a3   : > { %v586_v7 = vpop.xlane.xlu1 %585 }
 0x3a4   : > { %v587_v8 = vsub.f32 %v583_v4, %v586_v7 }
 0x3a6   : > { %v588_v9 = vmul.f32 1.442695, %v587_v8 }
 0x3a8   : > { %814 = vpow2.f32 %v588_v9 }
 0x3ae   : > { %v815_v10 = vpop.eup %814 }
 0x3af   : > { %v590_v11 = vsel %vm384_vm7, %v815_v10, 0.0 }
 0x3b0   : > { %591 = vadd.xlane.f32.xlu1 %v590_v11 }
 0x423   : > { %v592_v12 = vpop.xlane.xlu1 %591 }
 0x424   : > { %816 = vrcp.f32 %v592_v12 }
 0x42a   : > { %v817_v13 = vpop.eup %816 }
 0x42b   : > { %v594_v14 = vmul.f32 %v817_v13, %v815_v10 }
 0x42d   : > { %v595_v15 = vpack.c.bf16 %v594_v14, %v594_v14 }
 0x42f   : > { %781 = vmatmul.msk.bf16.vlgmr.msrb.gmra.mxu3 %vm384_vm7, %v595_v15 }
 0x4b2   : > { %v610_v16 = vpop.f32.mrf.mxu3 }
 0x4b3   : > { %v614_v17 = vmul.f32 2.828427, %v610_v16 }
 0x4b5   : > { %v615_v18 = vpack.c.bf16 %v614_v17, %v614_v17 }
 0x4b7   : > { %786 = vmatmul.msk.bf16.vlgmr.msra.gmra.mxu0 %vm414_vm3, %v615_v18 }
 0x4ba   : > { %v612_v19 = vpop.f32.mrf.mxu3 }
 0x534   : > { %v640_v21 = vpop.f32.mrf.mxu0 }
 0x535   : > { %v641_v22 = vadd.f32 %v809_v20, %v640_v21 }
 0x537   : > { %v644_v23 = vadd.f32 %v641_v22, %v930_v51 }
 0x539   : > { %v787_v24 = vmul.f32 -0.70710677, %v644_v23 }
 0x53b   : > { %v647_v25 = vmul.f32 1.442695, %v787_v24 }
 0x53c   : > { %v642_v26 = vpop.f32.mrf.mxu0 }
 0x53d   : > { %818 = vpow2.f32 %v647_v25 }
 0x543   : > { %v819_v27 = vpop.eup %818 }
 0x544   : > { %v649_v28 = vadd.f32 1.0, %v819_v27 }
 0x546   : > { %820 = vrcp.f32 %v649_v28  ;;  %v661_v32 = vand.u32 2147483648, %v649_v28  ;;  %v659_v34 = vand.u32 2147483647, %v649_v28  ;;  %vm655_vm15 = vweird.f32 %v649_v28 }
 0x548   : > { %v662_v36 = vor.u32 1.1754944e-38, %v661_v32  ;;  %vm660_vm1 = vcmp.eq.f32.partialorder %v659_v34, 8.507059e+37 }
 0x54c   : > { %v821_v29 = vpop.eup %820 }
 0x54d   : > { %v651_v30 = vmul.f32 %v821_v29, %v649_v28  ;;  %vm656_vm14 = vweird.f32 %v821_v29 }
 0x54e   : > { %vm657_vm0 = vmor %vm655_vm15, %vm656_vm14 }
 0x54f   : > { %v652_v31 = vsub.f32 1.0, %v651_v30 }
 0x551   : > { %v653_v33 = vmul.f32 %v821_v29, %v652_v31 }
 0x553   : > { %v654_v35 = vadd.f32 %v821_v29, %v653_v33 }
 0x555   : > { %v658_v37 = vsel %vm657_vm0, %v821_v29, %v654_v35 }
 0x556   : > { %v663_v38 = vsel %vm660_vm1, %v662_v36, %v658_v37 }
 0x557   : > { %v665_v39 = vmul.f32 %v663_v38, %v930_v51 }
 0x559   : > { %v666_v40 = vpack.c.bf16 %v665_v39, %v665_v39 }
 0x55b   : > { %668 = vst.msk [vmem:[%s358_s23] sm:$0xf] %vm667_vm2, %v666_v40 }
 0x55c PF: > { %s19_s30 = sadd.s32 1, %s828_s30  }
 0x55d   : > { %p16_p4 = scmp.ge.s32.totalorder %s19_s30, 4  }
 0x55f   :  { %18 = sbr.rel (!%p16_p4) target bundleno = 1 (0x1), region = 94 }

// kernel: gpt_conut_forward.16
= control target key start
LH: loop header
LB: loop body
LE: loop exit
PB: predicated region body
PF: predicated region fallthrough
CT: control target
= control target key end

     0   :  { %v119_v1 = vmov 0   ;;  %vm42_vm1 = vcmask 130048   ;;  %vm78_vm4 = vcmask 257024   ;;  %s189_s3 = inlined_call_operand.vmem [shape: bf16[16,32], index: 3, kind: input, shape index: {}]   ;;  %s190_s0 = inlined_call_operand.vmem [shape: bf16[16,16], index: 0, kind: input, shape index: {}]   ;;  %s191_s2 = inlined_call_operand.vmem [shape: f32[16,1], index: 2, kind: input, shape index: {}]   ;;  %s192_s4 = inlined_call_operand.vmem [shape: f32[1,32], index: 4, kind: input, shape index: {}]   ;;  %s193_s1 = inlined_call_operand.vmem [shape: bf16[16,32], index: 1, kind: input, shape index: {}]   ;;  %s194_s5 = inlined_call_operand.vmem [shape: bf16[16,32], index: 5, kind: output, shape index: {0}]   ;;  %s195_s6 = inlined_call_operand.vmem [shape: bf16[16,32], index: 6, kind: output, shape index: {1}]  }
   0x1   :  { %v111_v0 = vld [vmem:[%s189_s3] sm:$0xff]  ;;  %117 = vset.pattern.permute.xlu0 %v119_v1  ;;  %v61_v5 = vld [vmem:[%s191_s2 + $0x8] sm:$0xff] }
   0x2   :  { %v60_v2 = vld [vmem:[%s191_s2] sm:$0xff]  ;;  %53 = vmatpush.bf16.msra.mxu0 %v111_v0  ;;  %vm63_vm2 = vcmp.gt.f32.partialorder %v61_v5, 0.5 }
   0x3   :  { %v110_v3 = vld [vmem:[%s190_s0] sm:$0xff]  ;;  %vm62_vm0 = vcmp.gt.f32.partialorder %v60_v2, 0.5  ;;  %v65_v6 = vsel %vm63_vm2, 1, %v119_v1 }
   0x4   :  { %v64_v4 = vsel %vm62_vm0, 1, %v119_v1  ;;  %v118_v8 = vld [vmem:[%s192_s4] ss:$0 sm:$0xff] }
   0x5   :  { %67 = vperm.xlu0 %117, %v64_v4   ;;  %109 = vmatmul.msk.bf16.vlgmr.msra.gmra.mxu0 %vm42_vm1, %v110_v3  ;;  %v113_v9 = vld [vmem:[%s193_s1] sm:$0xff]  }
   0x6   :  { %v114_v11 = vunpack.c.l.bf16 %v113_v9  ;;  %v115_v20 = vunpack.c.h.bf16 %v113_v9 }
   0xd   :  { %70 = vperm.xlu0 %117, %v65_v6  }
  0x77   :  { %v68_v7 = vpop.permute.xlu0 %67 }
  0x78   :  { %vm72_vm3 = vcmp.eq.s32.totalorder %v68_v7, 1 }
  0x7f   :  { %v71_v17 = vpop.permute.xlu0 %70 }
  0x80   :  { %vm73_vm5 = vcmp.eq.s32.totalorder %v71_v17, 1 }
  0x82   :  { %v55_v10 = vpop.f32.mrf.mxu0 }
  0x83   :  { %v56_v12 = vadd.f32 %v118_v8, %v55_v10 }
  0x85   :  { %v74_v13 = vsel %vm72_vm3, 0.0, %v56_v12 }
  0x86   :  { %v76_v14 = vpack.c.bf16 %v74_v13, %v74_v13  ;;  %v85_v15 = vadd.f32 %v114_v11, %v74_v13 }
  0x88   :  { %79 = vst.msk [vmem:[%s194_s5] sm:$0xf] %vm78_vm4, %v76_v14  ;;  %v87_v16 = vmul.f32 0.70710677, %v85_v15 }
  0x8a   :  { %v89_v18 = vpack.c.bf16 %v87_v16, %v87_v16  ;;  %v57_v19 = vpop.f32.mrf.mxu0 }
  0x8b   :  { %v58_v21 = vadd.f32 %v118_v8, %v57_v19 }
  0x8c   :  { %91 = vst.msk [vmem:[%s195_s6] sm:$0xf] %vm78_vm4, %v89_v18 }
  0x8d   :  { %v75_v22 = vsel %vm73_vm5, 0.0, %v58_v21 }
  0x8e   :  { %v77_v23 = vpack.c.bf16 %v75_v22, %v75_v22  ;;  %v86_v24 = vadd.f32 %v115_v20, %v75_v22 }
  0x90   :  { %80 = vst.msk [vmem:[%s194_s5 + $0x4] sm:$0xf] %vm78_vm4, %v77_v23  ;;  %v88_v25 = vmul.f32 0.70710677, %v86_v24 }
  0x92   :  { %v90_v26 = vpack.c.bf16 %v88_v25, %v88_v25 }
  0x94   :  { %92 = vst.msk [vmem:[%s195_s6 + $0x4] sm:$0xf] %vm78_vm4, %v90_v26 }

// kernel: gpt_conut_forward.17
= control target key start
LH: loop header
LB: loop body
LE: loop exit
PB: predicated region body
PF: predicated region fallthrough
CT: control target
= control target key end

     0   :  { %vm27_vm0 = vcmask 261120   ;;  %v175_v5 = vmov 32.0   ;;  %vm93_vm7 = vcmask 257024   ;;  %s250_s0 = inlined_call_operand.vmem [shape: bf16[16,32], index: 0, kind: input, shape index: {}]   ;;  %s251_s1 = inlined_call_operand.vmem [shape: f32[1,32], index: 1, kind: input, shape index: {}]   ;;  %s252_s2 = inlined_call_operand.vmem [shape: f32[1,32], index: 2, kind: input, shape index: {}]   ;;  %s253_s4 = inlined_call_operand.vmem [shape: f32[1,32], index: 4, kind: input, shape index: {}]   ;;  %s254_s3 = inlined_call_operand.vmem [shape: bf16[32,32], index: 3, kind: input, shape index: {}]   ;;  %s255_s5 = inlined_call_operand.vmem [shape: bf16[16,32], index: 5, kind: output, shape index: {0}]   ;;  %s256_s6 = inlined_call_operand.vmem [shape: bf16[16,32], index: 6, kind: output, shape index: {1}]  }
   0x1   :  { %v162_v0 = vld [vmem:[%s250_s0] sm:$0xff]   ;;  %169 = vrcp.f32 %v175_v5  ;;  %v160_v22 = vld [vmem:[%s254_s3 + $0x8] sm:$0xff] }
   0x2   :  { %v163_v1 = vunpack.c.l.bf16 %v162_v0  ;;  %v164_v3 = vunpack.c.h.bf16 %v162_v0  ;;  %130 = vmatpush.bf16.msra.mxu0 %v160_v22  ;;  %v159_v25 = vld [vmem:[%s254_s3] sm:$0xff] }
   0x3   :  { %v166_v38 = vld [vmem:[%s251_s1] ss:$0 sm:$0xff] }
   0x4   :  { %v28_v2 = vsel %vm27_vm0, %v163_v1, 0.0  ;;  %v31_v4 = vsel %vm27_vm0, %v164_v3, 0.0  ;;  %v167_v42 = vld [vmem:[%s252_s2] ss:$0 sm:$0xff] }
   0x5   :  { %29 = vadd.xlane.f32.xlu0 %v28_v2  ;;  %v168_v57 = vld [vmem:[%s253_s4] ss:$0 sm:$0xff] }
   0x6   :  { %131 = vmatpush.bf16.msra.mxu0 %v159_v25 }
   0x7   :  { %v170_v6 = vpop.eup %169 }
   0x8   :  { %v35_v7 = vmul.f32 32.0, %v170_v6  ;;  %vm39_vm1 = vweird.f32 %v170_v6 }
   0xa   :  { %v36_v8 = vsub.f32 1.0, %v35_v7 }
   0xc   :  { %v37_v9 = vmul.f32 %v170_v6, %v36_v8 }
   0xd   :  { %32 = vadd.xlane.f32.xlu0 %v31_v4 }
   0xe   :  { %v38_v10 = vadd.f32 %v170_v6, %v37_v9 }
  0x10   :  { %v40_v11 = vsel %vm39_vm1, %v170_v6, %v38_v10 }
  0x78   :  { %v30_v12 = vpop.xlane.xlu0 %29 }
  0x79   :  { %v41_v13 = vmul.f32 %v40_v11, %v30_v12 }
  0x7b   :  { %v43_v14 = vsub.f32 %v163_v1, %v41_v13 }
  0x7d   :  { %v45_v15 = vmul.f32 %v43_v14, %v43_v14 }
  0x7f   :  { %v47_v16 = vsel %vm27_vm0, %v45_v15, 0.0 }
  0x80   :  { %48 = vadd.xlane.f32.xlu1 %v47_v16  ;;  %v33_v17 = vpop.xlane.xlu0 %32 }
  0x81   :  { %v42_v18 = vmul.f32 %v40_v11, %v33_v17 }
  0x83   :  { %v44_v19 = vsub.f32 %v164_v3, %v42_v18 }
  0x85   :  { %v46_v20 = vmul.f32 %v44_v19, %v44_v19 }
  0x87   :  { %v50_v21 = vsel %vm27_vm0, %v46_v20, 0.0 }
  0x88   :  { %51 = vadd.xlane.f32.xlu1 %v50_v21 }
  0xf3   :  { %v49_v23 = vpop.xlane.xlu1 %48 }
  0xf4   :  { %v53_v24 = vmul.f32 %v49_v23, %v40_v11 }
  0xf6   :  { %v55_v26 = vadd.f32 1e-05, %v53_v24 }
  0xf8   :  { %171 = vrsqrt.f32 %v55_v26  ;;  %vm63_vm3 = vweird.f32 %v55_v26 }
  0xfb   :  { %v52_v27 = vpop.xlane.xlu1 %51 }
  0xfc   :  { %v54_v28 = vmul.f32 %v52_v27, %v40_v11 }
  0xfe   :  { %v172_v29 = vpop.eup %171  ;;  %v56_v30 = vadd.f32 1e-05, %v54_v28 }
  0xff   :  { %v58_v31 = vmul.f32 %v172_v29, %v55_v26  ;;  %vm64_vm2 = vweird.f32 %v172_v29 }
 0x100   :  { %173 = vrsqrt.f32 %v56_v30  ;;  %vm65_vm4 = vmor %vm63_vm3, %vm64_vm2  ;;  %vm73_vm6 = vweird.f32 %v56_v30 }
 0x101   :  { %v59_v32 = vmul.f32 %v172_v29, %v58_v31 }
 0x103   :  { %v60_v33 = vmul.f32 0.5, %v59_v32 }
 0x105   :  { %v61_v34 = vsub.f32 1.5, %v60_v33 }
 0x106   :  { %v174_v35 = vpop.eup %173 }
 0x107   :  { %v62_v36 = vmul.f32 %v172_v29, %v61_v34  ;;  %v68_v37 = vmul.f32 %v174_v35, %v56_v30  ;;  %vm74_vm5 = vweird.f32 %v174_v35 }
 0x108   :  { %vm75_vm8 = vmor %vm73_vm6, %vm74_vm5 }
 0x109   :  { %v66_v39 = vsel %vm65_vm4, %v172_v29, %v62_v36  ;;  %v69_v40 = vmul.f32 %v174_v35, %v68_v37 }
 0x10a   :  { %v77_v41 = vmul.f32 %v66_v39, %v43_v14 }
 0x10b   :  { %v70_v43 = vmul.f32 0.5, %v69_v40 }
 0x10c   :  { %v83_v44 = vmul.f32 %v166_v38, %v77_v41 }
 0x10d   :  { %v71_v45 = vsub.f32 1.5, %v70_v43 }
 0x10e   :  { %v89_v46 = vadd.f32 %v167_v42, %v83_v44 }
 0x10f   :  { %v72_v47 = vmul.f32 %v174_v35, %v71_v45 }
 0x110   :  { %v91_v48 = vpack.c.bf16 %v89_v46, %v89_v46 }
 0x111   :  { %v76_v49 = vsel %vm75_vm8, %v174_v35, %v72_v47 }
 0x112   :  { %v78_v50 = vmul.f32 %v76_v49, %v44_v19  ;;  %94 = vst.msk [vmem:[%s255_s5] sm:$0xf] %vm93_vm7, %v91_v48  ;;  %v106_v54 = vunpack.c.l.b16 %v91_v48 }
 0x114   :  { %v84_v51 = vmul.f32 %v166_v38, %v78_v50 }
 0x116   :  { %v90_v52 = vadd.f32 %v167_v42, %v84_v51 }
 0x118   :  { %v92_v53 = vpack.c.bf16 %v90_v52, %v90_v52 }
 0x11a   :  { %v107_v55 = vunpack.c.l.b16 %v92_v53  ;;  %95 = vst.msk [vmem:[%s255_s5 + $0x4] sm:$0xf] %vm93_vm7, %v92_v53 }
 0x11c   :  { %v108_v56 = vpack.c.b16 %v107_v55, %v106_v54 }
 0x11e   :  { %158 = vmatmul.msk.bf16.vlgmr.msra.gmra.mxu0 %vm27_vm0, %v108_v56 }
 0x19b   :  { %v133_v58 = vpop.f32.mrf.mxu0 }
 0x19c   :  { %v134_v59 = vadd.f32 %v168_v57, %v133_v58 }
 0x19e   :  { %v138_v60 = vpack.c.bf16 %v134_v59, %v134_v59 }
 0x1a0   :  { %140 = vst.msk [vmem:[%s256_s6] sm:$0xf] %vm93_vm7, %v138_v60 }
 0x1a3   :  { %v135_v61 = vpop.f32.mrf.mxu0 }
 0x1a4   :  { %v136_v62 = vadd.f32 %v168_v57, %v135_v61 }
 0x1a6   :  { %v139_v63 = vpack.c.bf16 %v136_v62, %v136_v62 }
 0x1a8   :  { %141 = vst.msk [vmem:[%s256_s6 + $0x4] sm:$0xf] %vm93_vm7, %v139_v63 }

// kernel: gpt_conut_forward.20
= control target key start
LH: loop header
LB: loop body
LE: loop exit
PB: predicated region body
PF: predicated region fallthrough
CT: control target
= control target key end

     0   :  { %v132_v1 = vmov 0   ;;  %vm50_vm1 = vcmask 261120   ;;  %vm86_vm4 = vcmask 257024   ;;  %s205_s3 = inlined_call_operand.vmem [shape: bf16[32,32], index: 3, kind: input, shape index: {}]   ;;  %s206_s2 = inlined_call_operand.vmem [shape: f32[16,1], index: 2, kind: input, shape index: {}]   ;;  %s207_s4 = inlined_call_operand.vmem [shape: f32[1,32], index: 4, kind: input, shape index: {}]   ;;  %s208_s0 = inlined_call_operand.vmem [shape: bf16[16,32], index: 0, kind: input, shape index: {}]   ;;  %s209_s1 = inlined_call_operand.vmem [shape: bf16[16,32], index: 1, kind: input, shape index: {}]   ;;  %s210_s5 = inlined_call_operand.vmem [shape: bf16[16,32], index: 5, kind: output, shape index: {0}]   ;;  %s211_s6 = inlined_call_operand.vmem [shape: bf16[16,32], index: 6, kind: output, shape index: {1}]  }
   0x1   :  { %v124_v0 = vld [vmem:[%s205_s3 + $0x8] sm:$0xff]  ;;  %130 = vset.pattern.permute.xlu0 %v132_v1  ;;  %v68_v2 = vld [vmem:[%s206_s2] sm:$0xff] }
   0x2   :  { %60 = vmatpush.bf16.msra.mxu0 %v124_v0  ;;  %v123_v3 = vld [vmem:[%s205_s3] sm:$0xff]  ;;  %vm70_vm0 = vcmp.gt.f32.partialorder %v68_v2, 0.5  ;;  %v69_v5 = vld [vmem:[%s206_s2 + $0x8] sm:$0xff] }
   0x3   :  { %v72_v4 = vsel %vm70_vm0, 1, %v132_v1  ;;  %v122_v6 = vld [vmem:[%s208_s0] sm:$0xff]  ;;  %vm71_vm2 = vcmp.gt.f32.partialorder %v69_v5, 0.5 }
   0x4   :  { %75 = vperm.xlu0 %130, %v72_v4   ;;  %v73_v7 = vsel %vm71_vm2, 1, %v132_v1  ;;  %v131_v9 = vld [vmem:[%s207_s4] ss:$0 sm:$0xff] }
   0x5   :  { %v126_v10 = vld [vmem:[%s209_s1] sm:$0xff]  }
   0x6   :  { %61 = vmatpush.bf16.msra.mxu0 %v123_v3  ;;  %v127_v12 = vunpack.c.l.bf16 %v126_v10  ;;  %v128_v21 = vunpack.c.h.bf16 %v126_v10 }
   0x9   :  { %121 = vmatmul.msk.bf16.vlgmr.msra.gmra.mxu0 %vm50_vm1, %v122_v6 }
   0xc   :  { %78 = vperm.xlu0 %130, %v73_v7  }
  0x76   :  { %v76_v8 = vpop.permute.xlu0 %75 }
  0x77   :  { %vm80_vm3 = vcmp.eq.s32.totalorder %v76_v8, 1 }
  0x7e   :  { %v79_v18 = vpop.permute.xlu0 %78 }
  0x7f   :  { %vm81_vm5 = vcmp.eq.s32.totalorder %v79_v18, 1 }
  0x86   :  { %v63_v11 = vpop.f32.mrf.mxu0 }
  0x87   :  { %v64_v13 = vadd.f32 %v131_v9, %v63_v11 }
  0x89   :  { %v82_v14 = vsel %vm80_vm3, 0.0, %v64_v13 }
  0x8a   :  { %v84_v15 = vpack.c.bf16 %v82_v14, %v82_v14  ;;  %v93_v16 = vadd.f32 %v127_v12, %v82_v14 }
  0x8c   :  { %87 = vst.msk [vmem:[%s210_s5] sm:$0xf] %vm86_vm4, %v84_v15  ;;  %v95_v17 = vmul.f32 0.70710677, %v93_v16 }
  0x8e   :  { %v97_v19 = vpack.c.bf16 %v95_v17, %v95_v17  ;;  %v65_v20 = vpop.f32.mrf.mxu0 }
  0x8f   :  { %v66_v22 = vadd.f32 %v131_v9, %v65_v20 }
  0x90   :  { %99 = vst.msk [vmem:[%s211_s6] sm:$0xf] %vm86_vm4, %v97_v19 }
  0x91   :  { %v83_v23 = vsel %vm81_vm5, 0.0, %v66_v22 }
  0x92   :  { %v85_v24 = vpack.c.bf16 %v83_v23, %v83_v23  ;;  %v94_v25 = vadd.f32 %v128_v21, %v83_v23 }
  0x94   :  { %88 = vst.msk [vmem:[%s210_s5 + $0x4] sm:$0xf] %vm86_vm4, %v85_v24  ;;  %v96_v26 = vmul.f32 0.70710677, %v94_v25 }
  0x96   :  { %v98_v27 = vpack.c.bf16 %v96_v26, %v96_v26 }
  0x98   :  { %100 = vst.msk [vmem:[%s211_s6 + $0x4] sm:$0xf] %vm86_vm4, %v98_v27 }

// kernel: gpt_conut_forward.18
= control target key start
LH: loop header
LB: loop body
LE: loop exit
PB: predicated region body
PF: predicated region fallthrough
CT: control target
= control target key end

     0   :  { %s581_s15 = smov 0   ;;  %s633_s0 = inlined_call_operand.vmem [shape: bf16[2,8,32], index: 0, kind: input, shape index: {}]   ;;  %s634_s1 = inlined_call_operand.vmem [shape: f32[2,8,1], index: 1, kind: input, shape index: {}]   ;;  %s635_s2 = inlined_call_operand.vmem [shape: bf16[3,32,64], index: 2, kind: input, shape index: {}]   ;;  %s636_s3 = inlined_call_operand.vmem [shape: f32[1,64], index: 3, kind: input, shape index: {}]   ;;  %s637_s4 = inlined_call_operand.vmem [shape: bf16[2,8,32], index: 4, kind: output, shape index: {}]  }
   0x1 LB: > { %s472_s16 = sadd.s32 4294967295, %s551_s15   ;;  %p476_p0 = scmp.ge.s32.totalorder %s551_s15, 1  ;;  %s551_s15 = sphi %s581_s15, %s14_s15  }
   0x2   : > { %p170_p1 = scmp.lt.s32.totalorder %s551_s15, 3 }
   0x4   : > { %p171_p2 = pnand %p476_p0, %p170_p1 }
   0x5   : > { %p198_p3 = scmp.lt.s32.totalorder (!%p171_p2), %s472_s16, 1  ;;  %s555_s13 = smov (!%p171_p2), 96  }
   0x6   : > { %174 = sbr.rel (%p171_p2) target bundleno = 549 (0x225), region = 36 }
   0xb   : > { %v525_v0 = vld [vmem:[%s635_s2 + $0x18] sm:$0xff]  ;;  %v553_v1 = vmov 0   ;;  %s639_s16 = smov (!%p198_p3, %s472_s16), 1  ;;  %v524_v4 = vld [vmem:[%s635_s2 + $0x10] sm:$0xff]  ;;  %v523_v5 = vld [vmem:[%s635_s2 + $0x8] sm:$0xff]  ;;  %v221_v6 = vlaneseq  ;;  %vm273_vm3 = vcmask 261120  }
   0xc   : > { %539 = vset.pattern.permute.xlu0 %v553_v1  ;;  %316 = vmatpush.bf16.msra.mxu2 %v525_v0  ;;  %s478_s19 = sshll.u32 %s639_s16, 3  ;;  %s477_s27 = sshll.u32 %s639_s16, 2  ;;  %vm239_vm5 = vcmask 1043456   ;;  %v554_v13 = vmov 0.0   ;;  %v527_v16 = vld [vmem:[%s635_s2 + $0x28] sm:$0xff]  ;;  %vm235_vm7 = vcmask 64512  }
   0xd   : > { %s205_s22 = scalar_lea.vmem %s634_s1, %s478_s19  ;;  %283 = vmatpush.bf16.msra.mxu1 %v523_v5  ;;  %v222_v7 = vshrl.u32 %v221_v6, 7  ;;  %v224_v8 = vand.u32 127, %v221_v6  ;;  %s201_s30 = scalar_lea.vmem %s633_s0, %s477_s27  ;;  %v522_v21 = vld [vmem:[%s635_s2] sm:$0xff]  ;;  %vm405_vm12 = vcmask 257024  }
   0xe   : > { %v212_v2 = vld [vmem:[%s205_s22] sm:$0xff]  ;;  %s209_s18 = scalar_lea.vmem %s637_s4, %s477_s27 }
   0xf   : > { %vm213_vm0 = vcmp.gt.f32.partialorder %v212_v2, 0.5  ;;  %v230_v9 = vadd.s32 4294967295, %v222_v7  ;;  %v324_v10 = vadd.s32 1, %v222_v7  ;;  %v211_v12 = vld [vmem:[%s201_s30] sm:$0xf] }
  0x10   : > { %v214_v3 = vsel %vm213_vm0, 1, %v553_v1  ;;  %317 = vmatpush.bf16.msra.mxu2 %v524_v4  ;;  %v526_v22 = vld [vmem:[%s635_s2 + $0x20] sm:$0xff] }
  0x11   : > { %216 = vperm.xlu0 %539, %v214_v3   ;;  %vm231_vm1 = vcmp.eq.s32.totalorder %v224_v8, %v230_v9  ;;  %vm325_vm2 = vcmp.eq.s32.totalorder %v224_v8, %v324_v10  ;;  %284 = vmatpush.bf16.msra.mxu1 %v522_v21  ;;  %v540_v31 = vld [vmem:[%s636_s3] ss:$0 sm:$0xff] }
  0x12   : > { %v480_v14 = vsel %vm231_vm1, 1.0, %v554_v13  ;;  %v504_v15 = vsel %vm325_vm2, 1.0, %v554_v13 }
  0x13   : > { %v234_v19 = vpack.c.bf16 %v480_v14, %v480_v14  ;;  %v328_v20 = vpack.c.bf16 %v504_v15, %v504_v15 }
  0x83   : > { %v217_v11 = vpop.permute.xlu0 %216 }
  0x84   : > { %vm218_vm4 = vcmp.eq.s32.totalorder %v217_v11, 1 }
  0x85   : > { %vm219_vm6 = vmpackc.low %vm218_vm4, %vm218_vm4 }
  0x86   : > { %v220_v17 = vsel %vm219_vm6, 0, %v211_v12 }
  0x87   : > { %503 = vmatmul.msk.bf16.vlgmr.msra.gmra.mxu2 %vm273_vm3, %v220_v17  ;;  %v241_v18 = vsel %vm239_vm5, %v220_v17, 0 }
  0x88   : > { %250 = vmatpush.bf16.msra.mxu0 %v241_v18  ;;  %339 = vmatpush.bf16.msra.mxu3 %v241_v18 }
  0x8b   : > { %481 = vmatmul.msk.bf16.vlgmr.msra.gmra.mxu0 %vm235_vm7, %v234_v19  ;;  %505 = vmatmul.msk.bf16.vlgmr.msra.gmra.mxu3 %vm235_vm7, %v328_v20 }
  0x8c   : > { %372 = vmatpush.bf16.msrb.mxu0 %v527_v16 }
  0x90   : > { %373 = vmatpush.bf16.msrb.mxu0 %v526_v22 }
 0x108   : > { %v252_v23 = vpop.f32.mrf.mxu0 }
 0x109   : > { %v256_v24 = vpack.c.bf16 %v252_v23, %v252_v23 }
 0x10a   : > { %v319_v25 = vpop.f32.mrf.mxu2 }
 0x10b   : > { %490 = vmatmul.msk.bf16.vlgmr.msra.gmra.mxu1 %vm273_vm3, %v256_v24 }
 0x10e   : > { %v341_v26 = vpop.f32.mrf.mxu3 }
 0x10f   : > { %v345_v27 = vpack.c.bf16 %v341_v26, %v341_v26 }
 0x110   : > { %v254_v28 = vpop.f32.mrf.mxu0 }
 0x111   : > { %518 = vmatmul.msk.bf16.vlgmr.msrb.gmra.mxu0 %vm273_vm3, %v345_v27 }
 0x112   : > { %v321_v29 = vpop.f32.mrf.mxu2 }
 0x116   : > { %v343_v30 = vpop.f32.mrf.mxu3 }
 0x188   : > { %v286_v32 = vpop.f32.mrf.mxu1 }
 0x189   : > { %v290_v33 = vadd.f32 %v540_v31, %v286_v32 }
 0x18b   : > { %v323_v34 = vadd.f32 %v319_v25, %v290_v33 }
 0x18e   : > { %v375_v35 = vpop.f32.mrf.mxu0 }
 0x18f   : > { %v379_v36 = vadd.f32 %v375_v35, %v323_v34 }
 0x190   : > { %v288_v37 = vpop.f32.mrf.mxu1 }
 0x191   : > { %v519_v38 = vmul.f32 -1.442695, %v379_v36 }
 0x193   : > { %541 = vpow2.f32 %v519_v38 }
 0x196   : > { %v377_v39 = vpop.f32.mrf.mxu0 }
 0x199   : > { %v542_v40 = vpop.eup %541 }
 0x19a   : > { %v383_v41 = vadd.f32 1.0, %v542_v40 }
 0x19c   : > { %543 = vrcp.f32 %v383_v41  ;;  %v395_v45 = vand.u32 2147483648, %v383_v41  ;;  %v393_v47 = vand.u32 2147483647, %v383_v41  ;;  %vm389_vm9 = vweird.f32 %v383_v41 }
 0x19e   : > { %v396_v49 = vor.u32 1.1754944e-38, %v395_v45  ;;  %vm394_vm11 = vcmp.eq.f32.partialorder %v393_v47, 8.507059e+37 }
 0x1a2   : > { %v544_v42 = vpop.eup %543 }
 0x1a3   : > { %v385_v43 = vmul.f32 %v544_v42, %v383_v41  ;;  %vm390_vm8 = vweird.f32 %v544_v42 }
 0x1a4   : > { %vm391_vm10 = vmor %vm389_vm9, %vm390_vm8 }
 0x1a5   : > { %v386_v44 = vsub.f32 1.0, %v385_v43 }
 0x1a7   : > { %v387_v46 = vmul.f32 %v544_v42, %v386_v44 }
 0x1a9   : > { %v388_v48 = vadd.f32 %v544_v42, %v387_v46 }
 0x1ab   : > { %v392_v50 = vsel %vm391_vm10, %v544_v42, %v388_v48 }
 0x1ac   : > { %v397_v51 = vsel %vm394_vm11, %v396_v49, %v392_v50 }
 0x1ad   : > { %400 = vrot.lane.b32.xlu0 %v397_v51, %s555_s13 }
 0x21f   : > { %v401_v52 = vpop.permute.xlu0 %400 }
 0x220   : > { %v403_v53 = vmul.f32 %v401_v52, %v379_v36 }
 0x222   : > { %v404_v54 = vpack.c.bf16 %v403_v53, %v403_v53 }
 0x224   : > { %406 = vst.msk [vmem:[%s209_s18] sm:$0xf] %vm405_vm12, %v404_v54 }
 0x225 PF: > { %s14_s15 = sadd.s32 1, %s551_s15  }
 0x226   : > { %p11_p4 = scmp.ge.s32.totalorder %s14_s15, 4  }
 0x228   :  { %13 = sbr.rel (!%p11_p4) target bundleno = 1 (0x1), region = 71 }

// kernel: gpt_conut_forward.19
= control target key start
LH: loop header
LB: loop body
LE: loop exit
PB: predicated region body
PF: predicated region fallthrough
CT: control target
= control target key end

     0   :  { %s952_s30 = smov 0   ;;  %s1051_s0 = inlined_call_operand.vmem [shape: bf16[2,8,32], index: 0, kind: input, shape index: {}]   ;;  %s1052_s1 = inlined_call_operand.vmem [shape: f32[2,8,1], index: 1, kind: input, shape index: {}]   ;;  %s1053_s2 = inlined_call_operand.vmem [shape: bf16[3,32,64], index: 2, kind: input, shape index: {}]   ;;  %s1054_s3 = inlined_call_operand.vmem [shape: f32[1,64], index: 3, kind: input, shape index: {}]   ;;  %s1055_s4 = inlined_call_operand.vmem [shape: f32[2,1,8], index: 4, kind: input, shape index: {}]   ;;  %s1056_s5 = inlined_call_operand.vmem [shape: bf16[32,32], index: 5, kind: input, shape index: {}]   ;;  %s1057_s6 = inlined_call_operand.vmem [shape: f32[1,32], index: 6, kind: input, shape index: {}]   ;;  %s1058_s7 = inlined_call_operand.vmem [shape: bf16[32,32], index: 7, kind: input, shape index: {}]   ;;  %s1059_s8 = inlined_call_operand.vmem [shape: f32[1,32], index: 8, kind: input, shape index: {}]   ;;  %s1060_s9 = inlined_call_operand.vmem [shape: bf16[2,8,32], index: 9, kind: output, shape index: {}]  }
   0x1 LB: > { %s783_s10 = sadd.s32 4294967295, %s897_s30   ;;  %p787_p0 = scmp.ge.s32.totalorder %s897_s30, 1  ;;  %s897_s30 = sphi %s952_s30, %s19_s30  }
   0x2   : > { %p303_p1 = scmp.lt.s32.totalorder %s897_s30, 3 }
   0x4   : > { %p304_p2 = pnand %p787_p0, %p303_p1 }
   0x5   : > { %p344_p3 = scmp.lt.s32.totalorder (!%p304_p2), %s783_s10, 1  ;;  %s901_s18 = smov (!%p304_p2), 96  }
   0x6   : > { %307 = sbr.rel (%p304_p2) target bundleno = 1372 (0x55c), region = 56 }
   0xb   : > { %v857_v0 = vld [vmem:[%s1053_s2 + $0x18] sm:$0xff]  ;;  %v899_v1 = vmov 0   ;;  %s1062_s10 = smov (!%p344_p3, %s783_s10), 1  ;;  %v856_v4 = vld [vmem:[%s1053_s2 + $0x10] sm:$0xff]  ;;  %v855_v5 = vld [vmem:[%s1053_s2 + $0x8] sm:$0xff]  ;;  %v370_v6 = vlaneseq  ;;  %vm422_vm3 = vcmask 261120  }
   0xc   : > { %875 = vset.pattern.permute.xlu0 %v899_v1  ;;  %465 = vmatpush.bf16.msra.mxu2 %v857_v0  ;;  %s789_s13 = sshll.u32 %s1062_s10, 3  ;;  %s788_s21 = sshll.u32 %s1062_s10, 2  ;;  %vm388_vm5 = vcmask 1043456   ;;  %v900_v13 = vmov 0.0   ;;  %v859_v16 = vld [vmem:[%s1053_s2 + $0x28] sm:$0xff]  ;;  %vm384_vm7 = vcmask 64512  }
   0xd   : > { %s351_s16 = scalar_lea.vmem %s1052_s1, %s789_s13  ;;  %432 = vmatpush.bf16.msra.mxu1 %v855_v5  ;;  %v371_v7 = vshrl.u32 %v370_v6, 7  ;;  %v373_v8 = vand.u32 127, %v370_v6  ;;  %s347_s24 = scalar_lea.vmem %s1051_s0, %s788_s21  ;;  %v854_v21 = vld [vmem:[%s1053_s2] sm:$0xff]  ;;  %v861_v35 = vld [vmem:[%s1056_s5 + $0x8] sm:$0xff] }
   0xe   : > { %v361_v2 = vld [vmem:[%s351_s16] sm:$0xff]  ;;  %s358_s14 = scalar_lea.vmem %s1060_s9, %s788_s21 }
   0xf   : > { %vm362_vm0 = vcmp.gt.f32.partialorder %v361_v2, 0.5  ;;  %v379_v9 = vadd.s32 4294967295, %v371_v7  ;;  %v473_v10 = vadd.s32 1, %v371_v7  ;;  %v360_v12 = vld [vmem:[%s347_s24] sm:$0xf]  ;;  %s354_s24 = scalar_lea.vmem %s1055_s4, %s1062_s10 }
  0x10   : > { %v363_v3 = vsel %vm362_vm0, 1, %v899_v1  ;;  %466 = vmatpush.bf16.msra.mxu2 %v856_v4  ;;  %v858_v22 = vld [vmem:[%s1053_s2 + $0x20] sm:$0xff] }
  0x11   : > { %365 = vperm.xlu0 %875, %v363_v3   ;;  %vm380_vm1 = vcmp.eq.s32.totalorder %v373_v8, %v379_v9  ;;  %vm474_vm2 = vcmp.eq.s32.totalorder %v373_v8, %v473_v10  ;;  %433 = vmatpush.bf16.msra.mxu1 %v854_v21  ;;  %v876_v31 = vld [vmem:[%s1054_s3] ss:$0 sm:$0xff] }
  0x12   : > { %v791_v14 = vsel %vm380_vm1, 1.0, %v900_v13  ;;  %v815_v15 = vsel %vm474_vm2, 1.0, %v900_v13  ;;  %v860_v38 = vld [vmem:[%s1056_s5] sm:$0xff]  ;;  %vm707_vm2 = vcmask 257024  }
  0x13   : > { %v383_v19 = vpack.c.bf16 %v791_v14, %v791_v14  ;;  %v477_v20 = vpack.c.bf16 %v815_v15, %v815_v15  ;;  %v877_v59 = vld [vmem:[%s1057_s6] ss:$0 sm:$0xff] }
  0x14   : > { %v553_v4 = vld [vmem:[%s354_s24] sm:$0x1] }
  0x15   : > { %vm611_vm12 = vcmp.gt.f32.partialorder %v553_v4, 0.5 }
  0x16   : > { %v612_v5 = vsel %vm611_vm12, 1, %v899_v1  ;;  %v863_v1 = vld [vmem:[%s1058_s7 + $0x8] sm:$0xff] }
  0x17   : > { %v613_v6 = vperm.slane %v612_v5, 0 }
  0x19   : > { %vm614_vm13 = vcmp.eq.s32.totalorder %v613_v6, 1 }
  0x83   : > { %v366_v11 = vpop.permute.xlu0 %365 }
  0x84   : > { %vm367_vm4 = vcmp.eq.s32.totalorder %v366_v11, 1 }
  0x85   : > { %vm368_vm6 = vmpackc.low %vm367_vm4, %vm367_vm4 }
  0x86   : > { %v986_v17 = vsel %vm368_vm6, 0, %v360_v12 }
  0x87   : > { %814 = vmatmul.msk.bf16.vlgmr.msra.gmra.mxu2 %vm422_vm3, %v986_v17  ;;  %v390_v18 = vsel %vm388_vm5, %v986_v17, 0  ;;  %v554_v61 = vunpack.c.l.bf16 %v986_v17 }
  0x88   : > { %399 = vmatpush.bf16.msra.mxu0 %v390_v18  ;;  %488 = vmatpush.bf16.msra.mxu3 %v390_v18 }
  0x8b   : > { %792 = vmatmul.msk.bf16.vlgmr.msra.gmra.mxu0 %vm384_vm7, %v383_v19  ;;  %816 = vmatmul.msk.bf16.vlgmr.msra.gmra.mxu3 %vm384_vm7, %v477_v20 }
  0x8c   : > { %521 = vmatpush.bf16.msrb.mxu0 %v859_v16  ;;  %585 = vmatpush.bf16.msrb.mxu3 %v861_v35  ;;  %v862_v16 = vld [vmem:[%s1058_s7] sm:$0xff] }
  0x90   : > { %522 = vmatpush.bf16.msrb.mxu0 %v858_v22  ;;  %586 = vmatpush.bf16.msrb.mxu3 %v860_v38 }
  0x94   : > { %677 = vmatpush.bf16.msra.mxu0 %v863_v1 }
  0x98   : > { %678 = vmatpush.bf16.msra.mxu0 %v862_v16 }
 0x108   : > { %v401_v23 = vpop.f32.mrf.mxu0 }
 0x109   : > { %v405_v24 = vpack.c.bf16 %v401_v23, %v401_v23 }
 0x10a   : > { %v468_v25 = vpop.f32.mrf.mxu2 }
 0x10b   : > { %801 = vmatmul.msk.bf16.vlgmr.msra.gmra.mxu1 %vm422_vm3, %v405_v24 }
 0x10e   : > { %v490_v26 = vpop.f32.mrf.mxu3 }
 0x10f   : > { %v494_v27 = vpack.c.bf16 %v490_v26, %v490_v26 }
 0x110   : > { %v403_v28 = vpop.f32.mrf.mxu0 }
 0x111   : > { %829 = vmatmul.msk.bf16.vlgmr.msrb.gmra.mxu0 %vm422_vm3, %v494_v27 }
 0x112   : > { %v470_v29 = vpop.f32.mrf.mxu2 }
 0x116   : > { %v492_v30 = vpop.f32.mrf.mxu3 }
 0x188   : > { %v435_v32 = vpop.f32.mrf.mxu1 }
 0x189   : > { %v439_v33 = vadd.f32 %v876_v31, %v435_v32 }
 0x18b   : > { %v472_v34 = vadd.f32 %v468_v25, %v439_v33  ;;  %v878_v25 = vld [vmem:[%s1059_s8] ss:$0 sm:$0xff] }
 0x18e   : > { %v524_v36 = vpop.f32.mrf.mxu0 }
 0x18f   : > { %v528_v37 = vadd.f32 %v524_v36, %v472_v34 }
 0x190   : > { %v437_v39 = vpop.f32.mrf.mxu1 }
 0x191   : > { %v830_v40 = vmul.f32 -1.442695, %v528_v37 }
 0x193   : > { %879 = vpow2.f32 %v830_v40 }
 0x196   : > { %v526_v41 = vpop.f32.mrf.mxu0 }
 0x199   : > { %v880_v42 = vpop.eup %879 }
 0x19a   : > { %v532_v43 = vadd.f32 1.0, %v880_v42 }
 0x19c   : > { %881 = vrcp.f32 %v532_v43  ;;  %v544_v47 = vand.u32 2147483648, %v532_v43  ;;  %v542_v49 = vand.u32 2147483647, %v532_v43  ;;  %vm538_vm9 = vweird.f32 %v532_v43 }
 0x19e   : > { %v545_v51 = vor.u32 1.1754944e-38, %v544_v47  ;;  %vm543_vm11 = vcmp.eq.f32.partialorder %v542_v49, 8.507059e+37 }
 0x1a2   : > { %v882_v44 = vpop.eup %881 }
 0x1a3   : > { %v534_v45 = vmul.f32 %v882_v44, %v532_v43  ;;  %vm539_vm8 = vweird.f32 %v882_v44 }
 0x1a4   : > { %vm540_vm10 = vmor %vm538_vm9, %vm539_vm8 }
 0x1a5   : > { %v535_v46 = vsub.f32 1.0, %v534_v45 }
 0x1a7   : > { %v536_v48 = vmul.f32 %v882_v44, %v535_v46 }
 0x1a9   : > { %v537_v50 = vadd.f32 %v882_v44, %v536_v48 }
 0x1ab   : > { %v541_v52 = vsel %vm540_vm10, %v882_v44, %v537_v50 }
 0x1ac   : > { %v546_v53 = vsel %vm543_vm11, %v545_v51, %v541_v52 }
 0x1ad   : > { %549 = vrot.lane.b32.xlu0 %v546_v53, %s901_s18 }
 0x21f   : > { %v550_v54 = vpop.permute.xlu0 %549 }
 0x220   : > { %v1011_v55 = vmul.f32 %v550_v54, %v528_v37 }
 0x222   : > { %v555_v56 = vpack.c.bf16 %v1011_v55, %v1011_v55 }
 0x224   : > { %839 = vmatmul.msk.bf16.vlgmr.msrb.gmra.mxu3 %vm422_vm3, %v555_v56  ;;  %v577_v57 = vsel %vm422_vm3, %v555_v56, 0  ;;  %v631_v58 = vsel %vm388_vm5, %v555_v56, 0 }
 0x225   : > { %605 = vmatpush.bf16.xpose.msrb.mxu1 %v577_v57  ;;  %640 = vmatpush.bf16.msrb.mxu2 %v631_v58 }
 0x2a7   : > { %v588_v60 = vpop.f32.mrf.mxu3 }
 0x2a8   : > { %v589_v62 = vadd.f32 %v877_v59, %v588_v60 }
 0x2aa   : > { %v592_v63 = vadd.f32 %v589_v62, %v554_v61 }
 0x2ac   : > { %v593_v0 = vmul.f32 0.70710677, %v592_v63 }
 0x2ae   : > { %v594_v2 = vpack.c.bf16 %v593_v0, %v593_v0 }
 0x2af   : > { %v590_v3 = vpop.f32.mrf.mxu3 }
 0x2b0   : > { %840 = vmatmul.msk.bf16.vlgmr.msrb.gmra.mxu1 %vm422_vm3, %v594_v2 }
 0x32d   : > { %v607_v7 = vpop.f32.mrf.mxu1 }
 0x32e   : > { %v615_v8 = vsel %vm614_vm13, -1e+30, %v607_v7 }
 0x32f   : > { %v616_v9 = vsel %vm384_vm7, %v615_v8, -inf }
 0x330   : > { %617 = vmax.xlane.f32.xlu1 %v616_v9 }
 0x335   : > { %v609_v10 = vpop.f32.mrf.mxu1 }
 0x3a3   : > { %v618_v11 = vpop.xlane.xlu1 %617 }
 0x3a4   : > { %v619_v12 = vsub.f32 %v615_v8, %v618_v11 }
 0x3a6   : > { %v620_v13 = vmul.f32 1.442695, %v619_v12 }
 0x3a8   : > { %883 = vpow2.f32 %v620_v13 }
 0x3ae   : > { %v884_v14 = vpop.eup %883 }
 0x3af   : > { %v622_v15 = vsel %vm384_vm7, %v884_v14, 0.0 }
 0x3b0   : > { %623 = vadd.xlane.f32.xlu1 %v622_v15 }
 0x423   : > { %v624_v17 = vpop.xlane.xlu1 %623 }
 0x424   : > { %885 = vrcp.f32 %v624_v17 }
 0x42a   : > { %v886_v18 = vpop.eup %885 }
 0x42b   : > { %v626_v19 = vmul.f32 %v886_v18, %v884_v14 }
 0x42d   : > { %v627_v20 = vpack.c.bf16 %v626_v19, %v626_v19 }
 0x42f   : > { %841 = vmatmul.msk.bf16.vlgmr.msrb.gmra.mxu2 %vm384_vm7, %v627_v20 }
 0x4b2   : > { %v642_v21 = vpop.f32.mrf.mxu2 }
 0x4b3   : > { %v646_v22 = vmul.f32 2.828427, %v642_v21 }
 0x4b5   : > { %v647_v23 = vpack.c.bf16 %v646_v22, %v646_v22 }
 0x4b7   : > { %850 = vmatmul.msk.bf16.vlgmr.msra.gmra.mxu0 %vm422_vm3, %v647_v23 }
 0x4ba   : > { %v644_v24 = vpop.f32.mrf.mxu2 }
 0x534   : > { %v680_v26 = vpop.f32.mrf.mxu0 }
 0x535   : > { %v681_v27 = vadd.f32 %v878_v25, %v680_v26 }
 0x537   : > { %v684_v28 = vadd.f32 %v681_v27, %v1011_v55 }
 0x539   : > { %v851_v29 = vmul.f32 -0.70710677, %v684_v28 }
 0x53b   : > { %v687_v30 = vmul.f32 1.442695, %v851_v29 }
 0x53c   : > { %v682_v31 = vpop.f32.mrf.mxu0 }
 0x53d   : > { %887 = vpow2.f32 %v687_v30 }
 0x543   : > { %v888_v32 = vpop.eup %887 }
 0x544   : > { %v689_v33 = vadd.f32 1.0, %v888_v32 }
 0x546   : > { %889 = vrcp.f32 %v689_v33  ;;  %v701_v37 = vand.u32 2147483648, %v689_v33  ;;  %v699_v39 = vand.u32 2147483647, %v689_v33  ;;  %vm695_vm15 = vweird.f32 %v689_v33 }
 0x548   : > { %v702_v41 = vor.u32 1.1754944e-38, %v701_v37  ;;  %vm700_vm1 = vcmp.eq.f32.partialorder %v699_v39, 8.507059e+37 }
 0x54c   : > { %v890_v34 = vpop.eup %889 }
 0x54d   : > { %v691_v35 = vmul.f32 %v890_v34, %v689_v33  ;;  %vm696_vm14 = vweird.f32 %v890_v34 }
 0x54e   : > { %vm697_vm0 = vmor %vm695_vm15, %vm696_vm14 }
 0x54f   : > { %v692_v36 = vsub.f32 1.0, %v691_v35 }
 0x551   : > { %v693_v38 = vmul.f32 %v890_v34, %v692_v36 }
 0x553   : > { %v694_v40 = vadd.f32 %v890_v34, %v693_v38 }
 0x555   : > { %v698_v42 = vsel %vm697_vm0, %v890_v34, %v694_v40 }
 0x556   : > { %v703_v43 = vsel %vm700_vm1, %v702_v41, %v698_v42 }
 0x557   : > { %v705_v44 = vmul.f32 %v703_v43, %v1011_v55 }
 0x559   : > { %v706_v45 = vpack.c.bf16 %v705_v44, %v705_v44 }
 0x55b   : > { %708 = vst.msk [vmem:[%s358_s14] sm:$0xf] %vm707_vm2, %v706_v45 }
 0x55c PF: > { %s19_s30 = sadd.s32 1, %s897_s30  }
 0x55d   : > { %p16_p4 = scmp.ge.s32.totalorder %s19_s30, 4  }
 0x55f   :  { %18 = sbr.rel (!%p16_p4) target bundleno = 1 (0x1), region = 94 }

// kernel: gpt_conut_forward.21
= control target key start
LH: loop header
LB: loop body
LE: loop exit
PB: predicated region body
PF: predicated region fallthrough
CT: control target
= control target key end

     0   :  { %s284_s0 = inlined_call_operand.vmem [shape: bf16[32,32], index: 0, kind: input, shape index: {}]   ;;  %s285_s1 = inlined_call_operand.vmem [shape: bf16[32,50], index: 1, kind: input, shape index: {}]   ;;  %s286_s2 = inlined_call_operand.vmem [shape: f32[1,50], index: 2, kind: input, shape index: {}]   ;;  %s287_s3 = inlined_call_operand.hbm [shape: f32[32,50], index: 3, kind: output, shape index: {}]  }
   0x1   :  { %v172_v0 = vld [vmem:[%s285_s1 + $0x8] sm:$0xff]  ;;  %v171_v1 = vld [vmem:[%s285_s1] sm:$0xff] }
   0x2   :  { %63 = vmatpush.bf16.msra.mxu0 %v172_v0  ;;  %173 = vmatpush.bf16.msra.mxu1 %v172_v0 }
   0x3   :  { %8 = vsyncpa [#allocation3], 0  ;;  %v169_v2 = vld [vmem:[%s284_s0] sm:$0xff]  ;;  %v170_v3 = vld [vmem:[%s284_s0 + $0x8] sm:$0xff]  ;;  %vm50_vm0 = vcmask 261120   ;;  %vm76_vm1 = vcmask 408576  }
   0x4   :  { %v178_v4 = vld [vmem:[%s286_s2] ss:$0 sm:$0xff]  ;;  %s221_s0 = smov [#allocation2]   ;;  %s139_s23 = sshll.u32 %s287_s3, 4  ;;  %s140_s23 = int_to_ptr.hbm [resolvable:$true] %s139_s23 }
   0x5   :  { %s137_s1 = sshll.u32 %s221_s0, 4  ;;  %s222_s24 = smov 128   ;;  %s138_s1 = int_to_ptr.vmem [resolvable:$true] %s137_s1 }
   0x6   :  { %64 = vmatpush.bf16.msra.mxu0 %v171_v1  ;;  %174 = vmatpush.bf16.msra.mxu1 %v171_v1  ;;  %s223_s25 = smov 8  }
   0x9   :  { %167 = vmatmul.msk.bf16.vlgmr.msra.gmra.mxu0 %vm50_vm0, %v169_v2  ;;  %168 = vmatmul.msk.bf16.vlgmr.msra.gmra.mxu1 %vm50_vm0, %v170_v3 }
  0x86   :  { %v66_v5 = vpop.f32.mrf.mxu0  ;;  %v71_v6 = vpop.f32.mrf.mxu1 }
  0x87   :  { %v67_v7 = vadd.f32 %v178_v4, %v66_v5  ;;  %v72_v8 = vadd.f32 %v178_v4, %v71_v6 }
  0x89   :  { %v83_v9 = vsel %vm76_vm1, %v72_v8, -inf  ;;  %v77_v10 = vsel %vm76_vm1, %v67_v7, -inf }
  0x8a   :  { %84 = vmax.xlane.f32.xlu1 %v83_v9  ;;  %78 = vmax.xlane.f32.xlu0 %v77_v10 }
  0x8e   :  { %v68_v11 = vpop.f32.mrf.mxu0  ;;  %v73_v12 = vpop.f32.mrf.mxu1 }
  0x8f   :  { %v261_v13 = vadd.f32 %v178_v4, %v68_v11  ;;  %v263_v14 = vadd.f32 %v178_v4, %v73_v12 }
  0x91   :  { %v86_v15 = vsel %vm76_vm1, %v263_v14, -inf  ;;  %v80_v16 = vsel %vm76_vm1, %v261_v13, -inf }
  0x92   :  { %87 = vmax.xlane.f32.xlu1 %v86_v15  ;;  %81 = vmax.xlane.f32.xlu0 %v80_v16 }
  0xfd   :  { %v85_v17 = vpop.xlane.xlu1 %84  ;;  %v79_v18 = vpop.xlane.xlu0 %78 }
  0xfe   :  { %v91_v19 = vsub.f32 %v72_v8, %v85_v17  ;;  %v89_v20 = vsub.f32 %v67_v7, %v79_v18 }
 0x100   :  { %v97_v21 = vmul.f32 1.442695, %v91_v19  ;;  %v93_v22 = vmul.f32 1.442695, %v89_v20 }
 0x102   :  { %179 = vpow2.f32 %v97_v21 }
 0x103   :  { %181 = vpow2.f32 %v93_v22 }
 0x105   :  { %v88_v23 = vpop.xlane.xlu1 %87  ;;  %v82_v24 = vpop.xlane.xlu0 %81 }
 0x106   :  { %v92_v25 = vsub.f32 %v263_v14, %v88_v23  ;;  %v90_v26 = vsub.f32 %v261_v13, %v82_v24 }
 0x108   :  { %v180_v27 = vpop.eup %179  ;;  %v99_v28 = vmul.f32 1.442695, %v92_v25  ;;  %v95_v29 = vmul.f32 1.442695, %v90_v26 }
 0x109   :  { %v182_v30 = vpop.eup %181  ;;  %v107_v31 = vsel %vm76_vm1, %v180_v27, 0.0 }
 0x10a   :  { %183 = vpow2.f32 %v99_v28  ;;  %108 = vadd.xlane.f32.xlu0 %v107_v31  ;;  %v101_v32 = vsel %vm76_vm1, %v182_v30, 0.0 }
 0x10b   :  { %185 = vpow2.f32 %v95_v29  ;;  %102 = vadd.xlane.f32.xlu2 %v101_v32 }
 0x110   :  { %v184_v33 = vpop.eup %183 }
 0x111   :  { %v186_v34 = vpop.eup %185  ;;  %v110_v35 = vsel %vm76_vm1, %v184_v33, 0.0 }
 0x112   :  { %111 = vadd.xlane.f32.xlu1 %v110_v35  ;;  %v104_v36 = vsel %vm76_vm1, %v186_v34, 0.0 }
 0x113   :  { %105 = vadd.xlane.f32.xlu2 %v104_v36 }
 0x17d   :  { %v109_v37 = vpop.xlane.xlu0 %108 }
 0x17e   :  { %v103_v38 = vpop.xlane.xlu2 %102  ;;  %187 = vlog2.f32 %v109_v37 }
 0x17f   :  { %189 = vlog2.f32 %v103_v38 }
 0x184   :  { %v188_v39 = vpop.eup %187 }
 0x185   :  { %v190_v40 = vpop.eup %189  ;;  %v118_v41 = vmul.f32 0.6931472, %v188_v39  ;;  %v112_v42 = vpop.xlane.xlu1 %111 }
 0x186   :  { %v114_v43 = vmul.f32 0.6931472, %v190_v40  ;;  %191 = vlog2.f32 %v112_v42  ;;  %v106_v44 = vpop.xlane.xlu2 %105 }
 0x187   :  { %v123_v45 = vadd.f32 %v118_v41, %v85_v17  ;;  %193 = vlog2.f32 %v106_v44 }
 0x188   :  { %v121_v46 = vadd.f32 %v114_v43, %v79_v18 }
 0x189   :  { %v127_v47 = vsub.f32 %v72_v8, %v123_v45 }
 0x18a   :  { %v125_v48 = vsub.f32 %v67_v7, %v121_v46 }
 0x18b   :  { %131 = vst.msk [vmem:[#allocation2 + $0x10] sm:$0xff] %vm76_vm1, %v127_v47 }
 0x18c   :  { %v192_v49 = vpop.eup %191  ;;  %129 = vst.msk [vmem:[#allocation2] sm:$0xff] %vm76_vm1, %v125_v48 }
 0x18d   :  { %v194_v50 = vpop.eup %193  ;;  %v120_v51 = vmul.f32 0.6931472, %v192_v49 }
 0x18e   :  { %v116_v52 = vmul.f32 0.6931472, %v194_v50 }
 0x18f   :  { %v124_v53 = vadd.f32 %v120_v51, %v88_v23 }
 0x190   :  { %v122_v54 = vadd.f32 %v116_v52, %v82_v24 }
 0x191   :  { %v128_v55 = vsub.f32 %v263_v14, %v124_v53 }
 0x192   :  { %v126_v56 = vsub.f32 %v261_v13, %v122_v54 }
 0x193   :  { %132 = vst.msk [vmem:[#allocation2 + $0x18] sm:$0xff] %vm76_vm1, %v128_v55 }
 0x194   :  { %130 = vst.msk [vmem:[#allocation2 + $0x8] sm:$0xff] %vm76_vm1, %v126_v56 }
 0x195   :  { %145 = dma.vmem_to_hbm [thread:$0]  %s138_s1, 512, %s140_s23, [#allocation3], %s222_s24, %s222_s24, %s223_s25  }
 0x196   :  { %219 = dma.done.wait [#allocation3], 512  }
 0x197   :  { %220 = vsyncadd [#allocation3], 4294966784 }
 0x198   :  { %150 = vsyncpa [#allocation3], 1 }

// kernel: gpt_conut_forward.23
= control target key start
LH: loop header
LB: loop body
LE: loop exit
PB: predicated region body
PF: predicated region fallthrough
CT: control target
= control target key end

     0   :  { %s1099_s21 = smov 0   ;;  %s1184_s0 = inlined_call_operand.vmem [shape: bf16[2,8,16], index: 0, kind: input, shape index: {}]   ;;  %s1185_s1 = inlined_call_operand.vmem [shape: bf16[2,8,32], index: 1, kind: input, shape index: {}]   ;;  %s1186_s2 = inlined_call_operand.vmem [shape: bf16[2,16,32], index: 2, kind: input, shape index: {}]   ;;  %s1187_s3 = inlined_call_operand.vmem [shape: bf16[2,16,32], index: 3, kind: input, shape index: {}]   ;;  %s1188_s4 = inlined_call_operand.vmem [shape: f32[2,1,16], index: 4, kind: input, shape index: {}]   ;;  %s1189_s5 = inlined_call_operand.vmem [shape: bf16[3,16,32], index: 5, kind: input, shape index: {}]   ;;  %s1190_s6 = inlined_call_operand.vmem [shape: f32[1,32], index: 6, kind: input, shape index: {}]   ;;  %s1191_s7 = inlined_call_operand.vmem [shape: bf16[16,32], index: 7, kind: input, shape index: {}]   ;;  %s1192_s8 = inlined_call_operand.vmem [shape: f32[1,32], index: 8, kind: input, shape index: {}]   ;;  %s1193_s9 = inlined_call_operand.vmem [shape: bf16[32,16], index: 9, kind: input, shape index: {}]   ;;  %s1194_s10 = inlined_call_operand.vmem [shape: f32[1,16], index: 10, kind: input, shape index: {}]   ;;  %s1195_s11 = inlined_call_operand.vmem [shape: bf16[2,8,16], index: 11, kind: output, shape index: {0}]   ;;  %s1196_s12 = inlined_call_operand.vmem [shape: f32[2,8,16], index: 12, kind: output, shape index: {1}]  }
   0x1 LB: > { %s928_s22 = sadd.s32 4294967295, %s1029_s21   ;;  %p932_p0 = scmp.ge.s32.totalorder %s1029_s21, 1  ;;  %s1029_s21 = sphi %s1099_s21, %s23_s21  }
   0x2   : > { %p401_p1 = scmp.lt.s32.totalorder %s1029_s21, 3 }
   0x4   : > { %p402_p2 = pnand %p932_p0, %p401_p1 }
   0x5   : > { %p462_p3 = scmp.lt.s32.totalorder (!%p402_p2), %s928_s22, 1  ;;  %s1032_s19 = smov (!%p402_p2), 112  }
   0x6   : > { %405 = sbr.rel (%p402_p2) target bundleno = 1232 (0x4d0), region = 64 }
   0xb   : > { %v493_v0 = vlaneseq  ;;  %s1198_s22 = smov (!%p462_p3, %s928_s22), 1  ;;  %vm511_vm0 = vcmask 1043456   ;;  %v995_v5 = vld [vmem:[%s1189_s5 + $0x10] sm:$0xff]  ;;  %v1031_v8 = vmov 0.0   ;;  %vm507_vm3 = vcmask 64512   ;;  %v993_v13 = vld [vmem:[%s1189_s5] sm:$0xff] }
   0xc   : > { %s1110_s23 = sshll.u32 %s1198_s22, 2  ;;  %vm537_vm4 = vcmask 130048   ;;  %548 = vmatpush.bf16.msra.mxu1 %v993_v13  ;;  %v994_v14 = vld [vmem:[%s1189_s5 + $0x8] sm:$0xff]  ;;  %v1012_v24 = vld [vmem:[%s1190_s6] ss:$0 sm:$0xff]  ;;  %s1135_s20 = sshll.u32 %s1198_s22, 3 }
   0xd   : > { %v494_v1 = vshrl.u32 %v493_v0, 7  ;;  %v496_v2 = vand.u32 127, %v493_v0  ;;  %s465_s26 = scalar_lea.vmem %s1184_s0, %s1110_s23  ;;  %596 = vmatpush.bf16.msra.mxu3 %v994_v14  ;;  %v996_v29 = vld [vmem:[%s1191_s7] sm:$0xff]  ;;  %vm693_vm9 = vcmask 261120   ;;  %s469_s29 = scalar_lea.vmem %s1185_s1, %s1110_s23  ;;  %v1033_v60 = vmov 0  }
   0xe   : > { %v492_v6 = vld [vmem:[%s465_s26] sm:$0xf]  ;;  %s474_s26 = scalar_lea.vmem %s1186_s2, %s1135_s20  ;;  %s482_s16 = scalar_lea.vmem %s1188_s4, %s1198_s22  ;;  %vm797_vm12 = vcmask 125952  }
   0xf   : > { %v555_v3 = vadd.s32 4294967295, %v494_v1  ;;  %v502_v4 = vadd.s32 4294967294, %v494_v1  ;;  %v513_v7 = vsel %vm511_vm0, %v492_v6, 0  ;;  %v997_v45 = vld [vmem:[%s474_s26] sm:$0xff]  ;;  %s486_s15 = scalar_lea.vmem %s1195_s11, %s1110_s23 }
  0x10   : > { %570 = vmatpush.bf16.msra.mxu2 %v513_v7  ;;  %522 = vmatpush.bf16.msra.mxu0 %v513_v7  ;;  %v698_v46 = vsel %vm693_vm9, %v997_v45, 0  ;;  %v652_v50 = vld [vmem:[%s469_s29] sm:$0xf]  ;;  %s490_s29 = scalar_lea.vmem %s1196_s12, %s1135_s20 }
  0x11   : > { %vm556_vm1 = vcmp.eq.s32.totalorder %v496_v2, %v555_v3  ;;  %vm503_vm2 = vcmp.eq.s32.totalorder %v496_v2, %v502_v4  ;;  %677 = vmatpush.bf16.msrb.mxu1 %v996_v29  ;;  %v1013_v51 = vld [vmem:[%s1192_s8] ss:$0 sm:$0xff]  ;;  %v653_v52 = vunpack.c.l.bf16 %v652_v50 }
  0x12   : > { %v948_v9 = vsel %vm556_vm1, 1.0, %v1031_v8  ;;  %v941_v10 = vsel %vm503_vm2, 1.0, %v1031_v8  ;;  %v713_v59 = vld [vmem:[%s482_s16] sm:$0x1] }
  0x13   : > { %v559_v11 = vpack.c.bf16 %v948_v9, %v948_v9  ;;  %v506_v12 = vpack.c.bf16 %v941_v10, %v941_v10  ;;  %vm714_vm10 = vcmp.gt.f32.partialorder %v713_v59, 0.5  ;;  %v1000_v9 = vld [vmem:[%s1193_s9 + $0x8] sm:$0xff]  ;;  %v999_v10 = vld [vmem:[%s1193_s9] sm:$0xff] }
  0x14   : > { %621 = vmatpush.bf16.msrb.mxu0 %v995_v5  ;;  %707 = vmatpush.bf16.xpose.msrb.mxu2 %v698_v46  ;;  %v715_v61 = vsel %vm714_vm10, 1, %v1033_v60 }
  0x15   : > { %949 = vmatmul.msk.bf16.vlgmr.msra.gmra.mxu2 %vm507_vm3, %v559_v11  ;;  %942 = vmatmul.msk.bf16.vlgmr.msra.gmra.mxu0 %vm507_vm3, %v506_v12  ;;  %v716_v62 = vperm.slane %v715_v61, 0 }
  0x17   : > { %vm717_vm11 = vcmp.eq.s32.totalorder %v716_v62, 1 }
  0x18   : > { %787 = vmatpush.bf16.msra.mxu0 %v1000_v9 }
  0x1c   : > { %788 = vmatpush.bf16.msra.mxu0 %v999_v10 }
  0x25   : > { %963 = vmatmul.msk.bf16.vlgmr.msrb.gmra.mxu0 %vm537_vm4, %v492_v6 }
  0x92   : > { %v524_v15 = vpop.f32.mrf.mxu0 }
  0x93   : > { %v528_v16 = vpack.c.bf16 %v524_v15, %v524_v15 }
  0x95   : > { %947 = vmatmul.msk.bf16.vlgmr.msra.gmra.mxu1 %vm537_vm4, %v528_v16 }
  0x98   : > { %v572_v17 = vpop.f32.mrf.mxu2 }
  0x99   : > { %v576_v18 = vpack.c.bf16 %v572_v17, %v572_v17 }
  0x9a   : > { %v526_v19 = vpop.f32.mrf.mxu0 }
  0x9b   : > { %956 = vmatmul.msk.bf16.vlgmr.msra.gmra.mxu3 %vm537_vm4, %v576_v18  ;;  %v1014_v19 = vld [vmem:[%s1194_s10] ss:$0 sm:$0xff] }
  0xa0   : > { %v574_v20 = vpop.f32.mrf.mxu2 }
  0xa2   : > { %v623_v21 = vpop.f32.mrf.mxu0 }
  0xaa   : > { %v625_v22 = vpop.f32.mrf.mxu0 }
 0x112   : > { %v550_v23 = vpop.f32.mrf.mxu1 }
 0x113   : > { %v554_v26 = vadd.f32 %v1012_v24, %v550_v23 }
 0x11a   : > { %v552_v25 = vpop.f32.mrf.mxu1 }
 0x11e   : > { %v598_v27 = vpop.f32.mrf.mxu3 }
 0x11f   : > { %v602_v28 = vadd.f32 %v598_v27, %v554_v26 }
 0x121   : > { %v627_v30 = vadd.f32 %v623_v21, %v602_v28 }
 0x123   : > { %v964_v31 = vmul.f32 -1.442695, %v627_v30 }
 0x125   : > { %1015 = vpow2.f32 %v964_v31 }
 0x126   : > { %v600_v32 = vpop.f32.mrf.mxu3 }
 0x12b   : > { %v1016_v33 = vpop.eup %1015 }
 0x12c   : > { %v631_v34 = vadd.f32 1.0, %v1016_v33 }
 0x12e   : > { %1017 = vrcp.f32 %v631_v34  ;;  %v643_v38 = vand.u32 2147483648, %v631_v34  ;;  %v641_v40 = vand.u32 2147483647, %v631_v34  ;;  %vm637_vm6 = vweird.f32 %v631_v34 }
 0x130   : > { %v644_v42 = vor.u32 1.1754944e-38, %v643_v38  ;;  %vm642_vm8 = vcmp.eq.f32.partialorder %v641_v40, 8.507059e+37 }
 0x134   : > { %v1018_v35 = vpop.eup %1017 }
 0x135   : > { %v633_v36 = vmul.f32 %v1018_v35, %v631_v34  ;;  %vm638_vm5 = vweird.f32 %v1018_v35 }
 0x136   : > { %vm639_vm7 = vmor %vm637_vm6, %vm638_vm5 }
 0x137   : > { %v634_v37 = vsub.f32 1.0, %v633_v36 }
 0x139   : > { %v635_v39 = vmul.f32 %v1018_v35, %v634_v37 }
 0x13b   : > { %v636_v41 = vadd.f32 %v1018_v35, %v635_v39 }
 0x13d   : > { %v640_v43 = vsel %vm639_vm7, %v1018_v35, %v636_v41 }
 0x13e   : > { %v645_v44 = vsel %vm642_vm8, %v644_v42, %v640_v43 }
 0x13f   : > { %648 = vrot.lane.b32.xlu0 %v645_v44, %s1032_s19  ;;  %s479_s19 = scalar_lea.vmem %s1187_s3, %s1135_s20 }
 0x140   : > { %v998_v3 = vld [vmem:[%s479_s19] sm:$0xff] }
 0x141   : > { %750 = vmatpush.bf16.msrb.mxu3 %v998_v3 }
 0x1b1   : > { %v649_v47 = vpop.permute.xlu0 %648 }
 0x1b2   : > { %v651_v48 = vmul.f32 %v649_v47, %v627_v30 }
 0x1b4   : > { %v654_v49 = vpack.c.bf16 %v651_v48, %v651_v48 }
 0x1b6   : > { %969 = vmatmul.msk.bf16.vlgmr.msrb.gmra.mxu1 %vm537_vm4, %v654_v49 }
 0x233   : > { %v679_v53 = vpop.f32.mrf.mxu1 }
 0x234   : > { %v680_v54 = vadd.f32 %v1013_v51, %v679_v53 }
 0x236   : > { %v683_v55 = vadd.f32 %v680_v54, %v653_v52 }
 0x238   : > { %v684_v56 = vmul.f32 0.70710677, %v683_v55 }
 0x23a   : > { %v687_v57 = vpack.c.bf16 %v684_v56, %v684_v56 }
 0x23b   : > { %v681_v58 = vpop.f32.mrf.mxu1 }
 0x23c   : > { %974 = vmatmul.msk.bf16.vlgmr.msrb.gmra.mxu2 %vm693_vm9, %v687_v57 }
 0x2bf   : > { %v709_v63 = vpop.f32.mrf.mxu2 }
 0x2c0   : > { %v718_v0 = vsel %vm717_vm11, -1e+30, %v709_v63 }
 0x2c1   : > { %v719_v1 = vsel %vm537_vm4, %v718_v0, -inf }
 0x2c2   : > { %720 = vmax.xlane.f32.xlu0 %v719_v1 }
 0x2c7   : > { %v711_v2 = vpop.f32.mrf.mxu2 }
 0x335   : > { %v721_v4 = vpop.xlane.xlu0 %720 }
 0x336   : > { %v722_v5 = vsub.f32 %v718_v0, %v721_v4 }
 0x338   : > { %v723_v6 = vmul.f32 1.442695, %v722_v5 }
 0x33a   : > { %1019 = vpow2.f32 %v723_v6 }
 0x340   : > { %v1020_v7 = vpop.eup %1019 }
 0x341   : > { %v725_v8 = vsel %vm537_vm4, %v1020_v7, 0.0 }
 0x342   : > { %726 = vadd.xlane.f32.xlu1 %v725_v8 }
 0x3b5   : > { %v727_v11 = vpop.xlane.xlu1 %726 }
 0x3b6   : > { %1021 = vrcp.f32 %v727_v11 }
 0x3bc   : > { %v1022_v12 = vpop.eup %1021 }
 0x3bd   : > { %v729_v13 = vmul.f32 %v1022_v12, %v1020_v7 }
 0x3bf   : > { %730 = vst.msk [vmem:[%s490_s29] sm:$0xff] %vm537_vm4, %v729_v13  ;;  %v731_v14 = vpack.c.bf16 %v729_v13, %v729_v13 }
 0x3c1   : > { %979 = vmatmul.msk.bf16.vlgmr.msrb.gmra.mxu3 %vm537_vm4, %v731_v14 }
 0x444   : > { %v752_v15 = vpop.f32.mrf.mxu3 }
 0x445   : > { %v756_v16 = vmul.f32 4.0, %v752_v15 }
 0x447   : > { %v757_v17 = vpack.c.bf16 %v756_v16, %v756_v16 }
 0x449   : > { %988 = vmatmul.msk.bf16.vlgmr.msra.gmra.mxu0 %vm693_vm9, %v757_v17 }
 0x44c   : > { %v754_v18 = vpop.f32.mrf.mxu3 }
 0x4c6   : > { %v790_v20 = vpop.f32.mrf.mxu0 }
 0x4c7   : > { %v791_v21 = vadd.f32 %v1014_v19, %v790_v20 }
 0x4c9   : > { %v794_v22 = vadd.f32 %v791_v21, %v651_v48 }
 0x4cb   : > { %v795_v23 = vmul.f32 0.70710677, %v794_v22 }
 0x4cd   : > { %v796_v24 = vpack.c.bf16 %v795_v23, %v795_v23 }
 0x4ce   : > { %v792_v25 = vpop.f32.mrf.mxu0 }
 0x4cf   : > { %798 = vst.msk [vmem:[%s486_s15] sm:$0xf] %vm797_vm12, %v796_v24 }
 0x4d0 PF: > { %s23_s21 = sadd.s32 1, %s1029_s21  }
 0x4d1   : > { %p20_p4 = scmp.ge.s32.totalorder %s23_s21, 4  }
 0x4d3   :  { %22 = sbr.rel (!%p20_p4) target bundleno = 1 (0x1), region = 120 }

// kernel: gpt_conut_forward.25
= control target key start
LH: loop header
LB: loop body
LE: loop exit
PB: predicated region body
PF: predicated region fallthrough
CT: control target
= control target key end

     0   :  { %s957_s0 = inlined_call_operand.vmem [shape: bf16[2,8,16], index: 0, kind: input, shape index: {}]   ;;  %s958_s1 = inlined_call_operand.vmem [shape: bf16[2,8,32], index: 1, kind: input, shape index: {}]   ;;  %s959_s2 = inlined_call_operand.vmem [shape: f32[2,8,16], index: 2, kind: input, shape index: {}]   ;;  %s960_s3 = inlined_call_operand.vmem [shape: s32[2,16,1], index: 3, kind: input, shape index: {}]   ;;  %s961_s4 = inlined_call_operand.vmem [shape: bf16[16,50], index: 4, kind: input, shape index: {}]   ;;  %s962_s5 = inlined_call_operand.vmem [shape: f32[1,50], index: 5, kind: input, shape index: {}]   ;;  %s963_s6 = inlined_call_operand.vmem [shape: f32[1,16], index: 6, kind: input, shape index: {}]   ;;  %s964_s7 = inlined_call_operand.vmem [shape: f32[1,32], index: 7, kind: input, shape index: {}]   ;;  %s965_s8 = inlined_call_operand.<no memory space> [shape: f32[1,1], index: 8, kind: input, shape index: {}]   ;;  %s966_s9 = inlined_call_operand.hbm [shape: f32[2,8,50], index: 9, kind: output, shape index: {}]  }
   0x1   :  { %v14_v0 = vstv %s965_s8 }
   0x2   :  { %15 = vst [vmem:[#allocation2] sm:$0x1] %v14_v0 }
   0x3   :  { %16 = vsyncpa [#allocation4], 0 }
   0x4   :  { %18 = vsyncpa [#allocation4 + $0x1], 0  ;;  %s840_s11 = smov 0   ;;  %s842_s12 = smov 0  }
   0x5   :  { %s844_s13 = smov 0   ;;  %s846_s14 = smov 0  }
   0x6 LB: > { %s861_s8 = sadd.s32 4294967295, %s783_s14   ;;  %s636_s15 = sadd.s32 4294967294, %s783_s14   ;;  %s783_s14 = sphi %s846_s14, %s972_s14   ;;  %s779_s13 = sphi %s844_s13, %s971_s13   ;;  %s775_s12 = sphi %s842_s12, %s970_s12   ;;  %s771_s11 = sphi %s840_s11, %s969_s11  }
   0x7   : > { %s865_s16 = sadd.s32 1, %s783_s14   ;;  %s240_s17 = sadd.s32 1, %s779_s13 }
   0x8   : > { %s237_s18 = ssub.s32 %s783_s14, %s865_s16  ;;  %p250_p0 = scmp.ne.s32.totalorder %s779_s13, %s775_s12 }
   0x9   : > { %p238_p1 = scmp.eq.s32.totalorder %s237_s18, 0  ;;  %p251_p2 = scmp.eq.s32.totalorder %s861_s8, 1 }
   0xa   : > { %p256_p3 = scmp.ne.s32.totalorder %s775_s12, %s771_s11  ;;  %p257_p4 = scmp.eq.s32.totalorder %s636_s15, 1 }
   0xb   : > { %s876_s19 = scalar_select %p238_p1, %s779_s13, %s240_s17  }
   0xc   : > { %p878_p5 = por %p251_p2, %p250_p0  ;;  %p882_p6 = por %p257_p4, %p256_p3 }
   0xd   : > { %p639_p7 = scmp.ge.s32.totalorder %s783_s14, 1  ;;  %p319_p8 = scmp.lt.s32.totalorder %s783_s14, 3 }
   0xf   : > { %p320_p9 = pnand %p639_p7, %p319_p8 }
  0x10   : > { %p367_p10 = scmp.lt.s32.totalorder (!%p320_p9), %s861_s8, 1  ;;  %s658_s22 = sshll.u32 (!%p320_p9), %s861_s8, 3 }
  0x11   : > { %323 = sbr.rel (%p320_p9) target bundleno = 502 (0x1f6), region = 56  ;;  %s536_s26 = scalar_lea.hbm (!%p320_p9), %s966_s9, %s658_s22 }
  0x12   : > { %s540_s29 = sshll.u32 (!%p320_p9), %s536_s26, 4  ;;  %s541_s29 = int_to_ptr.hbm [resolvable:$true] %s540_s29 }
  0x13   : > { %s735_s10 = sshra.s32 (!%p320_p9), %s541_s29, 4  ;;  %s736_s10 = int_to_ptr.hbm [resolvable:$true] %s735_s10 }
  0x14   : > { %s737_s15 = scalar_lea.hbm (!%p320_p9), %s736_s10, 8  ;;  %p742_p0 = scmp.lt.s32.totalorder (!%p320_p9), %s736_s10, %s966_s9 }
  0x15   : > { %p738_p11 = scmp.ne.s32.totalorder (!%p320_p9), %s736_s10, %s737_s15 }
  0x16   : > { %v662_v1 = vld [vmem:[%s961_s4] sm:$0xff]  ;;  %s893_s24 = scalar_select %p367_p10, %s861_s8, 1  ;;  %vm402_vm0 = vcmask 130048   ;;  %vm434_vm1 = vcmask 261120   ;;  %v785_v12 = vmov 0   ;;  %vm463_vm6 = vcmask 408576  }
  0x17   : > { %413 = vmatpush.bf16.msra.mxu0 %v662_v1  ;;  %v707_v2 = vld [vmem:[%s963_s6] ss:$0 sm:$0xff]  ;;  %704 = vset.pattern.permute.xlu1 %v785_v12  ;;  %v481_v39 = vlaneseq  ;;  %v786_v43 = vmov 1.0|1.0   ;;  %p739_p12 = pnand %p738_p11, %p878_p5 }
  0x18   : > { %s641_s25 = sshll.u32 %s893_s24, 2  ;;  %v708_v8 = vld [vmem:[%s964_s7] ss:$0 sm:$0xff]  ;;  %s661_s23 = sshll.u32 %s893_s24, 4  ;;  %705 = vset.pattern.permute.xlu2 %v785_v12  ;;  %706 = vset.pattern.permute.xlu0 %v785_v12 }
  0x19   : > { %s370_s28 = scalar_lea.vmem %s957_s0, %s641_s25  ;;  %s374_s17 = scalar_lea.vmem %s958_s1, %s641_s25  ;;  %v709_v16 = vld [vmem:[#allocation2] ss:$0 sm:$0xff]  ;;  %v482_v41 = vand.u32 127, %v481_v39 }
  0x1a   : > { %v385_v3 = vld [vmem:[%s370_s28] sm:$0xf]  ;;  %s383_s27 = scalar_lea.vmem %s960_s3, %s661_s23  ;;  %s643_s30 = sshll.u32 %s893_s24, 3 }
  0x1b   : > { %v386_v4 = vld [vmem:[%s374_s17] sm:$0xf]  ;;  %v419_v5 = vunpack.c.l.bf16 %v385_v3  ;;  %650 = vmatmul.msk.bf16.vlgmr.msra.gmra.mxu0 %vm402_vm0, %v385_v3  ;;  %v389_v14 = vld [vmem:[%s383_s27 + $0x8] sm:$0xff]  ;;  %s378_s17 = scalar_lea.vmem %s959_s2, %s643_s30  ;;  %s364_s24 = sand.u32 1, %s775_s12  }
  0x1c   : > { %v428_v7 = vunpack.c.l.bf16 %v386_v4  ;;  %v388_v13 = vld [vmem:[%s383_s27] sm:$0xff]  ;;  %s640_s18 = sshll.u32 %s364_s24, 3  ;;  %s526_s30 = scalar_lea.sflag [#allocation4], %s364_s24 }
  0x1d   : > { %v424_v6 = vmul.f32 %v707_v2, %v419_v5  ;;  %484 = vperm.xlu1 %704, %v388_v13   ;;  %v710_v36 = vld [vmem:[%s962_s5] ss:$0 sm:$0xff]  ;;  %s366_s27 = scalar_lea.vmem [#allocation3], %s640_s18  ;;  %p740_p13 = pneg %p739_p12 }
  0x1e   : > { %v433_v10 = vmul.f32 %v708_v8, %v428_v7  ;;  %v387_v44 = vld [vmem:[%s378_s17] sm:$0xff]  ;;  %s538_s28 = sshll.u32 %s366_s27, 4  ;;  %s741_s18 = scalar_lea.hbm %s966_s9, 16  ;;  %s539_s28 = int_to_ptr.vmem [resolvable:$true] %s538_s28 }
  0x1f   : > { %v425_v9 = vsel %vm402_vm0, %v424_v6, 0.0  ;;  %p743_p1 = scmp.lt.s32.totalorder %s741_s18, %s737_s15 }
  0x20   : > { %426 = vadd.xlane.f32.xlu0 %v425_v9  ;;  %v435_v11 = vsel %vm434_vm1, %v433_v10, 0.0 }
  0x21   : > { %p744_p2 = por %p743_p1, %p742_p0 }
  0x23   : > { %p745_p3 = pnand %p744_p2, %p740_p13 }
  0x25   : > { %487 = vperm.xlu1 %704, %v389_v14  }
  0x28   : > { %436 = vadd.xlane.f32.xlu0 %v435_v11 }
  0x8f   : > { %v485_v40 = vpop.permute.xlu1 %484 }
  0x90   : > { %vm489_vm7 = vcmp.eq.s32.totalorder %v482_v41, %v485_v40 }
  0x93   : > { %v427_v15 = vpop.xlane.xlu0 %426 }
  0x97   : > { %v488_v42 = vpop.permute.xlu1 %487 }
  0x98   : > { %v415_v20 = vpop.f32.mrf.mxu0  ;;  %vm490_vm8 = vcmp.eq.s32.totalorder %v482_v41, %v488_v42 }
  0x99   : > { %v416_v37 = vadd.f32 %v710_v36, %v415_v20  ;;  %vm654_vm9 = vmpackc.low %vm490_vm8, %vm489_vm7 }
  0x9a   : > { %655 = vmatpush.bf16.msk.msra.mxu1 %vm654_vm9, %v786_v43 }
  0x9b   : > { %v437_v17 = vpop.xlane.xlu0 %436  ;;  %v464_v38 = vsel %vm463_vm6, %v416_v37, -inf }
  0x9c   : > { %v438_v18 = vadd.f32 %v437_v17, %v427_v15 }
  0x9e   : > { %v443_v19 = vadd.f32 %v709_v16, %v438_v18 }
  0xa0   : > { %v651_v21 = vmul.f32 -1.442695, %v443_v19  ;;  %v417_v22 = vpop.f32.mrf.mxu0 }
  0xa2   : > { %711 = vpow2.f32 %v651_v21 }
  0xa8   : > { %v712_v23 = vpop.eup %711 }
  0xa9   : > { %v447_v24 = vadd.f32 1.0, %v712_v23 }
  0xab   : > { %713 = vrcp.f32 %v447_v24  ;;  %v459_v28 = vand.u32 2147483648, %v447_v24  ;;  %v457_v30 = vand.u32 2147483647, %v447_v24  ;;  %vm453_vm3 = vweird.f32 %v447_v24 }
  0xad   : > { %v460_v32 = vor.u32 1.1754944e-38, %v459_v28  ;;  %vm458_vm5 = vcmp.eq.f32.partialorder %v457_v30, 8.507059e+37 }
  0xb1   : > { %v714_v25 = vpop.eup %713 }
  0xb2   : > { %v449_v26 = vmul.f32 %v714_v25, %v447_v24  ;;  %vm454_vm2 = vweird.f32 %v714_v25 }
  0xb3   : > { %vm455_vm4 = vmor %vm453_vm3, %vm454_vm2 }
  0xb4   : > { %v450_v27 = vsub.f32 1.0, %v449_v26 }
  0xb6   : > { %v451_v29 = vmul.f32 %v714_v25, %v450_v27 }
  0xb8   : > { %v452_v31 = vadd.f32 %v714_v25, %v451_v29 }
  0xba   : > { %v456_v33 = vsel %vm455_vm4, %v714_v25, %v452_v31 }
  0xbb   : > { %v461_v34 = vsel %vm458_vm5, %v460_v32, %v456_v33 }
  0xbc   : > { %477 = vperm.xlu1 %704, %v461_v34   ;;  %v496_v35 = vsub.f32 1.0, %v461_v34 }
  0xbe   : > { %499 = vperm.xlu2 %705, %v496_v35  }
  0xe7   : > { %465 = vmax.xlane.f32.xlu2 %v464_v38 }
 0x118   : > { %v500_v45 = vpop.permute.xlu2 %499 }
 0x119   : > { %v502_v46 = vmul.f32 %v500_v45, %v387_v44 }
 0x11b   : > { %v503_v47 = vpack.c.bf16 %v502_v46, %v502_v46 }
 0x11d   : > { %656 = vmatmul.msk.bf16.vlgmr.msra.gmra.mxu1 %vm402_vm0, %v503_v47 }
 0x12e   : > { %v478_v58 = vpop.permute.xlu1 %477 }
 0x15a   : > { %v466_v48 = vpop.xlane.xlu2 %465 }
 0x15b   : > { %v467_v49 = vsub.f32 %v416_v37, %v466_v48 }
 0x15d   : > { %v468_v50 = vmul.f32 1.442695, %v467_v49 }
 0x15f   : > { %715 = vpow2.f32 %v468_v50 }
 0x165   : > { %v716_v51 = vpop.eup %715 }
 0x166   : > { %v470_v52 = vsel %vm463_vm6, %v716_v51, 0.0 }
 0x167   : > { %471 = vadd.xlane.f32.xlu0 %v470_v52 }
 0x19a   : > { %v516_v53 = vpop.f32.mrf.mxu1 }
 0x1a2   : > { %v518_v54 = vpop.f32.mrf.mxu1 }
 0x1da   : > { %v472_v55 = vpop.xlane.xlu0 %471 }
 0x1db   : > { %717 = vrcp.f32 %v472_v55 }
 0x1e1   : > { %v718_v56 = vpop.eup %717 }
 0x1e2   : > { %v474_v57 = vmul.f32 %v718_v56, %v716_v51 }
 0x1e4   : > { %v480_v59 = vmul.f32 %v478_v58, %v474_v57 }
 0x1e6   : > { %v520_v60 = vadd.f32 %v516_v53, %v480_v59 }
 0x1e8   : > { %v521_v61 = vadd.f32 1e-32, %v520_v60 }
 0x1ea   : > { %719 = vlog2.f32 %v521_v61 }
 0x1f0   : > { %v720_v62 = vpop.eup %719 }
 0x1f1   : > { %v523_v63 = vmul.f32 0.6931472, %v720_v62 }
 0x1f3   : > { %524 = vst.msk [vmem:[%s366_s27] sm:$0xff] %vm463_vm6, %v523_v63 }
 0x1f4   : > { %748 = shalt.err (!%p745_p3)
}
 0x1f5   : > { %663 = dma.vmem_to_hbm [thread:$0]  (%p878_p5), %s539_s28, 128, %s541_s29, %s526_s30  }
 0x1f6 PF: > { %p669_p4 = scmp.ge.s32.totalorder %s783_s14, 2  ;;  %s552_s24 = sand.u32 1, %s771_s11  }
 0x1f7   : > { %s553_s25 = scalar_lea.sflag [#allocation4], %s552_s24 }
 0x1f8   : > { %p666_p7 = pnand %p669_p4, %p882_p6 }
 0x1fa   : > { %p667_p8 = pneg %p666_p7 }
 0x1fc   : > { %766 = dma.done.wait (%p667_p8), %s553_s25, 128  }
 0x1fd   : > { %768 = vsyncadd (%p667_p8), %s553_s25, 4294967168  ;;  %p21_p9 = scmp.ge.s32.totalorder %s865_s16, 4   ;;  %s969_s11 = smov %s775_s12 }
 0x1fe   : > { %s970_s12 = smov %s779_s13  ;;  %s971_s13 = smov %s876_s19 }
 0x1ff   : > { %s972_s14 = smov %s865_s16  ;;  %23 = sbr.rel (!%p21_p9) target bundleno = 6 (0x6), region = 100 }
 0x204   :  { %559 = vsyncpa [#allocation4], 1 }
 0x205   :  { %561 = vsyncpa [#allocation4 + $0x1], 1 }

</bundles_post_ra>
